<compile_context>
chip_gen: v7x
topology: tpu7x:2x2x1
jax: 0.10.0
libtpu: 0.0.40
codegen_flags: <defaults>
</compile_context>

<pallas_src>
import math

import numpy as np
import jax
import jax.numpy as jnp
from jax.experimental import pallas as pl
from jax.experimental.pallas import tpu as pltpu

BN_EPS = 1e-5
LANE = 128


# ---------------------------------------------------------------------------
# Constant builders (run once at model construction; hoisted out of the jit)
# ---------------------------------------------------------------------------

def _conv3x3_gather(h, w, stride):
    """0/1 patch-gather matrix for a 3x3 conv, padding=1.

    Returns G (h*w, 9*slot) bf16 with (x @ G)[:, t*slot + m] == input pixel under
    tap t = ky*3+kx at output position m (0 where padded), plus (ho, wo, slot).
    slot is a multiple of 128 so per-tap slices are lane-aligned."""
    ho = (h + 2 - 3) // stride + 1
    wo = (w + 2 - 3) // stride + 1
    mo = ho * wo
    slot = max(LANE, ((mo + LANE - 1) // LANE) * LANE)
    g = np.zeros((h * w, 9 * slot), np.float32)
    for ky in range(3):
        for kx in range(3):
            t = ky * 3 + kx
            for oy in range(ho):
                iy = oy * stride + ky - 1
                if iy < 0 or iy >= h:
                    continue
                for ox in range(wo):
                    ix = ox * stride + kx - 1
                    if ix < 0 or ix >= w:
                        continue
                    g[iy * w + ix, t * slot + oy * wo + ox] = 1.0
    return jnp.asarray(g, jnp.bfloat16), ho, wo, slot


def _stride2_select(h, w):
    """0/1 selection matrix implementing the stride-2 subsample of a 1x1/s2 conv."""
    ho = (h - 1) // 2 + 1
    wo = (w - 1) // 2 + 1
    s = np.zeros((h * w, ho * wo), np.float32)
    for oy in range(ho):
        for ox in range(wo):
            s[(2 * oy) * w + (2 * ox), oy * wo + ox] = 1.0
    return jnp.asarray(s, jnp.bfloat16), ho, wo


def _fold_bn3x3(w, bn):
    """Fold eval-mode BN into a 3x3 conv.  w: (Cout, Cin, 3, 3) ->
    ((9, Cout, Cin) bf16 per-tap weights [tap = ky*3+kx], (Cout, 1) f32 bias)."""
    scale = bn['gamma'] * jax.lax.rsqrt(bn['var'] + BN_EPS)
    bias = bn['beta'] - bn['mean'] * scale
    cout, cin = w.shape[0], w.shape[1]
    w_s = w * scale[:, None, None, None]
    w9 = jnp.transpose(w_s, (2, 3, 0, 1)).reshape(9, cout, cin)
    return w9.astype(jnp.bfloat16), bias.reshape(cout, 1).astype(jnp.float32)


def _fold_bn1x1(w, bn):
    scale = bn['gamma'] * jax.lax.rsqrt(bn['var'] + BN_EPS)
    bias = bn['beta'] - bn['mean'] * scale
    wd = (w[:, :, 0, 0] * scale[:, None]).astype(jnp.bfloat16)
    return wd, bias.reshape(-1, 1).astype(jnp.float32)


# ---------------------------------------------------------------------------
# Fused forward builder
# ---------------------------------------------------------------------------

def make_resnet_forward(params, image_hw=(16, 16), is_feat=True):
    h_in, w_in = image_hw

    consts = []        # constant operands (after x): weights / gather matrices
    in_specs = []      # their full-array BlockSpecs (constant index maps)

    def add_const(arr):
        idx = len(consts) + 1                       # +1: x is operand 0
        consts.append(arr)
        nd = arr.ndim
        in_specs.append(pl.BlockSpec(arr.shape, lambda i, _nd=nd: (0,) * _nd))
        return idx

    gcache = {}

    def conv_gather(h, w, stride):
        key = (h, w, stride)
        if key not in gcache:
            g, ho, wo, slot = _conv3x3_gather(h, w, stride)
            gcache[key] = (add_const(g), ho, wo, slot)
        return gcache[key]

    scache = {}

    def subsample(h, w):
        key = (h, w)
        if key not in scache:
            s, ho, wo = _stride2_select(h, w)
            scache[key] = (add_const(s), ho, wo)
        return scache[key]

    # --- stem: conv1 + bn1 (+ relu) and maxpool(3, 2, 1) ---
    w9s, bs = _fold_bn3x3(params['conv1_w'], params['bn1'])
    gi, oh, ow, slot = conv_gather(h_in, w_in, 1)
    stem = dict(g=gi, w=add_const(w9s), b=add_const(bs), mo=oh * ow, slot=slot,
                cout=int(w9s.shape[1]))
    gp, ph, pw, pslot = conv_gather(oh, ow, 2)      # maxpool geometry == 3x3 s2 p1
    pool = dict(g=gp, mo=ph * pw, slot=pslot)
    cur_h, cur_w = ph, pw

    # --- residual blocks ---
    blocks = []
    for li, layer in enumerate(params['layers']):
        for bi, bp in enumerate(layer):
            stride = 2 if (li > 0 and bi == 0) else 1
            w9_1, b1 = _fold_bn3x3(bp['conv1_w'], bp['bn1'])
            w9_2, b2 = _fold_bn3x3(bp['conv2_w'], bp['bn2'])
            g1, bh, bw, slot1 = conv_gather(cur_h, cur_w, stride)
            g2, _, _, slot2 = conv_gather(bh, bw, 1)
            bm = dict(g1=g1, w1=add_const(w9_1), b1=add_const(b1), slot1=slot1,
                      g2=g2, w2=add_const(w9_2), b2=add_const(b2), slot2=slot2,
                      mo=bh * bw, hw=(bh, bw), cout=int(w9_1.shape[1]),
                      down=('down_w' in bp), down_stride=stride)
            if bm['down']:
                wd, bd = _fold_bn1x1(bp['down_w'], bp['down_bn'])
                bm['wd'] = add_const(wd)
                bm['bd'] = add_const(bd)
                if stride == 2:
                    si, _, _ = subsample(cur_h, cur_w)
                    bm['s'] = si
            blocks.append(bm)
            cur_h, cur_w = bh, bw

    # --- head: avgpool + fc + L2 normalize + last_linear ---
    ncls = int(params['fc_w'].shape[0])
    nout = int(params['ll_w'].shape[0])
    c_last = int(params['fc_w'].shape[1])
    head = dict(wfc=add_const(params['fc_w'].astype(jnp.float32)),
                bfc=add_const(params['fc_b'].reshape(ncls, 1).astype(jnp.float32)),
                wll=add_const(params['ll_w'].astype(jnp.float32)),
                bll=add_const(params['ll_b'].reshape(nout, 1).astype(jnp.float32)),
                m_last=cur_h * cur_w, c_last=c_last, ncls=ncls, nout=nout)

    n_in = 1 + len(consts)

    # -----------------------------------------------------------------------
    # Kernel body: entire forward for one batch sample, VMEM/vreg resident.
    # -----------------------------------------------------------------------
    def kernel(*refs):
        in_refs, out_refs = refs[:n_in], refs[n_in:]

        def conv3x3(x_bf, gidx, widx, bidx, mo, slot, relu):
            # im2col via one gather matmul, then 9 accumulating MXU tap matmuls.
            p = jnp.dot(x_bf, in_refs[gidx][...],
                        preferred_element_type=jnp.float32).astype(jnp.bfloat16)
            w9 = in_refs[widx]
            acc = jnp.dot(w9[0], p[:, 0:mo], preferred_element_type=jnp.float32)
            for t in range(1, 9):
                acc = acc + jnp.dot(w9[t], p[:, t * slot:t * slot + mo],
                                    preferred_element_type=jnp.float32)
            acc = acc + in_refs[bidx][...]
            if relu:
                acc = jnp.maximum(acc, 0.0)
            return acc

        def maxpool3x3(x_bf, gidx, mo, slot):
            # Window gather via matmul; 0-padding is safe because input is ReLU'd.
            p = jnp.dot(x_bf, in_refs[gidx][...], preferred_element_type=jnp.float32)
            out = p[:, 0:mo]
            for t in range(1, 9):
                out = jnp.maximum(out, p[:, t * slot:t * slot + mo])
            return out

        oi = 0
        x = in_refs[0][0].astype(jnp.bfloat16)                       # (Cin, H*W)

        f0r = conv3x3(x, stem['g'], stem['w'], stem['b'],
                      stem['mo'], stem['slot'], relu=True)           # relu(bn1(conv1))
        if is_feat:
            out_refs[oi][0] = f0r
            oi += 1

        cur = maxpool3x3(f0r.astype(jnp.bfloat16), pool['g'], pool['mo'], pool['slot'])
        cur_bf = cur.astype(jnp.bfloat16)

        for bm in blocks:
            h1 = conv3x3(cur_bf, bm['g1'], bm['w1'], bm['b1'],
                         bm['mo'], bm['slot1'], relu=True)
            out = conv3x3(h1.astype(jnp.bfloat16), bm['g2'], bm['w2'], bm['b2'],
                          bm['mo'], bm['slot2'], relu=False)
            if bm['down']:
                xd = cur_bf
                if bm['down_stride'] == 2:
                    xd = jnp.dot(cur_bf, in_refs[bm['s']][...],
                                 preferred_element_type=jnp.float32).astype(jnp.bfloat16)
                res = jnp.dot(in_refs[bm['wd']][...], xd,
                              preferred_element_type=jnp.float32) + in_refs[bm['bd']][...]
            else:
                res = cur                                            # f32 identity residual
            cur = jnp.maximum(out + res, 0.0)                        # relu(block output)
            cur_bf = cur.astype(jnp.bfloat16)
            if is_feat:
                out_refs[oi][0] = cur
                oi += 1

        # head: adaptive avg-pool -> fc -> L2 normalize -> last_linear
        f4 = jnp.sum(cur, axis=-1, keepdims=True) * (1.0 / head['m_last'])   # (C, 1)
        feat = jnp.dot(in_refs[head['wfc']][...], f4,
                       preferred_element_type=jnp.float32) + in_refs[head['bfc']][...]
        ss = jnp.sum(feat * feat)
        fnorm = feat * jax.lax.rsqrt(jnp.maximum(ss, 1e-24))         # F.normalize(dim=1)
        # TODO(synk): dropout before last_linear is eval-mode identity (no RNG-state match).
        logits = jnp.dot(in_refs[head['wll']][...], feat,
                         preferred_element_type=jnp.float32) + in_refs[head['bll']][...]
        if is_feat:
            out_refs[oi][0] = f4
            out_refs[oi + 1][0] = feat
            out_refs[oi + 2][0] = fnorm
            out_refs[oi + 3][0] = logits
        else:
            out_refs[oi][0] = logits

    # -----------------------------------------------------------------------
    # Wrapper: one pallas_call gridded over the batch (megacore-parallel).
    # -----------------------------------------------------------------------
    def forward(x):
        n, cin = x.shape[0], x.shape[1]
        x_r = x.astype(jnp.float32).reshape(n, cin, h_in * w_in)

        out_shapes, out_specs = [], []

        def add_out(c, m):
            out_shapes.append(jax.ShapeDtypeStruct((n, c, m), jnp.float32))
            out_specs.append(pl.BlockSpec((1, c, m), lambda i: (i, 0, 0)))

        if is_feat:
            add_out(stem['cout'], stem['mo'])
            for bm in blocks:
                add_out(bm['cout'], bm['mo'])
            add_out(head['c_last'], 1)           # f4
            add_out(head['ncls'], 1)             # feat
            add_out(head['ncls'], 1)             # feat_norm
            add_out(head['nout'], 1)             # logits
        else:
            add_out(head['nout'], 1)             # logits only

        outs = pl.pallas_call(
            kernel,
            grid=(n,),
            in_specs=[pl.BlockSpec((1, cin, h_in * w_in), lambda i: (i, 0, 0))] + in_specs,
            out_specs=tuple(out_specs),
            out_shape=tuple(out_shapes),
            compiler_params=pltpu.CompilerParams(
                dimension_semantics=("parallel",)),
        )(x_r, *consts)

        if not is_feat:
            return outs[0].reshape(n, head['nout'])

        feats = [outs[0].reshape(n, stem['cout'], h_in, w_in)]
        for j, bm in enumerate(blocks):
            bh, bw = bm['hw']
            feats.append(outs[1 + j].reshape(n, bm['cout'], bh, bw))
        base = 1 + len(blocks)
        f4 = outs[base].reshape(n, head['c_last'])
        feat = outs[base + 1].reshape(n, head['ncls'])
        feat_norm = outs[base + 2].reshape(n, head['ncls'])
        logits = outs[base + 3].reshape(n, head['nout'])
        return feats + [f4], logits, feat, feat_norm

    return jax.jit(forward)


# ---------------------------------------------------------------------------
# Deterministic parameter initialization (mirrors the PyTorch __init__)
# ---------------------------------------------------------------------------

def init_params(key, depth=8, num_filters=(8, 8, 16, 32), num_classes=10):
    assert (depth - 2) % 6 == 0
    n_blocks = (depth - 2) // 6
    keys = jax.random.split(key, 256)
    _ki = iter(range(256))

    def nk():
        return keys[next(_ki)]

    def conv_w(cout, cin, k):
        # kaiming_normal_(mode='fan_out', nonlinearity='relu')
        fan_out = cout * k * k
        std = math.sqrt(2.0 / fan_out)
        return std * jax.random.normal(nk(), (cout, cin, k, k), jnp.float32)

    def bn(c):
        # weight=1, bias=0; eval-mode running stats mean=0, var=1
        return dict(gamma=jnp.ones((c,), jnp.float32), beta=jnp.zeros((c,), jnp.float32),
                    mean=jnp.zeros((c,), jnp.float32), var=jnp.ones((c,), jnp.float32))

    params = dict(conv1_w=conv_w(num_filters[0], 3, 3), bn1=bn(num_filters[0]))

    layers = []
    inplanes = num_filters[0]
    for li, planes in enumerate(num_filters[1:]):
        stride0 = 1 if li == 0 else 2
        blocks = []
        for bi in range(n_blocks):
            stride = stride0 if bi == 0 else 1
            bp = dict(conv1_w=conv_w(planes, inplanes, 3), bn1=bn(planes),
                      conv2_w=conv_w(planes, planes, 3), bn2=bn(planes))
            if bi == 0 and (stride != 1 or inplanes != planes):
                bp['down_w'] = conv_w(planes, inplanes, 1)
                bp['down_bn'] = bn(planes)
            blocks.append(bp)
            inplanes = planes
        layers.append(blocks)
    params['layers'] = layers

    fan_in = num_filters[3]
    bound = 1.0 / math.sqrt(fan_in)
    params['fc_w'] = jax.random.uniform(nk(), (num_classes, fan_in), jnp.float32, -bound, bound)
    params['fc_b'] = jax.random.uniform(nk(), (num_classes,), jnp.float32, -bound, bound)
    params['ll_w'] = 0.01 * jax.random.normal(nk(), (2, num_classes), jnp.float32)
    params['ll_b'] = jnp.zeros((2,), jnp.float32)
    return params


if __name__ == "__main__":
    key = jax.random.PRNGKey(0)
    pkey, xkey = jax.random.split(key)
    params = init_params(pkey, depth=8, num_filters=(8, 8, 16, 32), num_classes=10)
    x = jax.random.normal(xkey, (2, 3, 16, 16), jnp.float32)   # NCHW, like PyTorch

    fwd = make_resnet_forward(params, image_hw=(16, 16), is_feat=True)
    feats, logits, feat, feat_norm = fwd(x)
    jax.block_until_ready((feats, logits, feat, feat_norm))

    assert logits.shape == (2, 2)
    assert feat.shape == (2, 10) and feat_norm.shape == (2, 10)
    assert feats[0].shape == (2, 8, 16, 16)
    assert feats[-1].shape == (2, 32)           # f4
    print("KERNEL_OK")
</pallas_src>

<mosaic_0001>
module attributes {stable_mosaic.version = 11 : i64} {
  func.func @kernel(%arg0: i32, %arg1: memref<1x3x256xf32, #tpu.memory_space<vmem>>, %arg2: memref<256x2304xbf16, #tpu.memory_space<vmem>>, %arg3: memref<9x8x3xbf16, #tpu.memory_space<vmem>>, %arg4: memref<8x1xf32, #tpu.memory_space<vmem>>, %arg5: memref<256x1152xbf16, #tpu.memory_space<vmem>>, %arg6: memref<64x1152xbf16, #tpu.memory_space<vmem>>, %arg7: memref<9x8x8xbf16, #tpu.memory_space<vmem>>, %arg8: memref<8x1xf32, #tpu.memory_space<vmem>>, %arg9: memref<9x8x8xbf16, #tpu.memory_space<vmem>>, %arg10: memref<8x1xf32, #tpu.memory_space<vmem>>, %arg11: memref<64x1152xbf16, #tpu.memory_space<vmem>>, %arg12: memref<16x1152xbf16, #tpu.memory_space<vmem>>, %arg13: memref<9x16x8xbf16, #tpu.memory_space<vmem>>, %arg14: memref<16x1xf32, #tpu.memory_space<vmem>>, %arg15: memref<9x16x16xbf16, #tpu.memory_space<vmem>>, %arg16: memref<16x1xf32, #tpu.memory_space<vmem>>, %arg17: memref<16x8xbf16, #tpu.memory_space<vmem>>, %arg18: memref<16x1xf32, #tpu.memory_space<vmem>>, %arg19: memref<64x16xbf16, #tpu.memory_space<vmem>>, %arg20: memref<16x1152xbf16, #tpu.memory_space<vmem>>, %arg21: memref<4x1152xbf16, #tpu.memory_space<vmem>>, %arg22: memref<9x32x16xbf16, #tpu.memory_space<vmem>>, %arg23: memref<32x1xf32, #tpu.memory_space<vmem>>, %arg24: memref<9x32x32xbf16, #tpu.memory_space<vmem>>, %arg25: memref<32x1xf32, #tpu.memory_space<vmem>>, %arg26: memref<32x16xbf16, #tpu.memory_space<vmem>>, %arg27: memref<32x1xf32, #tpu.memory_space<vmem>>, %arg28: memref<16x4xbf16, #tpu.memory_space<vmem>>, %arg29: memref<10x32xf32, #tpu.memory_space<vmem>>, %arg30: memref<10x1xf32, #tpu.memory_space<vmem>>, %arg31: memref<2x10xf32, #tpu.memory_space<vmem>>, %arg32: memref<2x1xf32, #tpu.memory_space<vmem>>, %arg33: memref<1x8x256xf32, #tpu.memory_space<vmem>>, %arg34: memref<1x8x64xf32, #tpu.memory_space<vmem>>, %arg35: memref<1x16x16xf32, #tpu.memory_space<vmem>>, %arg36: memref<1x32x4xf32, #tpu.memory_space<vmem>>, %arg37: memref<1x32x1xf32, #tpu.memory_space<vmem>>, %arg38: memref<1x10x1xf32, #tpu.memory_space<vmem>>, %arg39: memref<1x10x1xf32, #tpu.memory_space<vmem>>, %arg40: memref<1x2x1xf32, #tpu.memory_space<vmem>>) attributes {dimension_semantics = [#tpu.dimension_semantics<parallel>], iteration_bounds = array<i64: 2>, scalar_prefetch = 0 : i64, scratch_operands = 0 : i64, tpu.core_type = #tpu.core_type<tc>, window_params = [{transform_indices = @transform_0, window_bounds = array<i64: 1, 3, 256>}, {pipeline_mode = #tpu.pipeline_mode<synchronous>, transform_indices = @transform_1, window_bounds = array<i64: 256, 2304>}, {pipeline_mode = #tpu.pipeline_mode<synchronous>, transform_indices = @transform_2, window_bounds = array<i64: 9, 8, 3>}, {pipeline_mode = #tpu.pipeline_mode<synchronous>, transform_indices = @transform_3, window_bounds = array<i64: 8, 1>}, {pipeline_mode = #tpu.pipeline_mode<synchronous>, transform_indices = @transform_4, window_bounds = array<i64: 256, 1152>}, {pipeline_mode = #tpu.pipeline_mode<synchronous>, transform_indices = @transform_5, window_bounds = array<i64: 64, 1152>}, {pipeline_mode = #tpu.pipeline_mode<synchronous>, transform_indices = @transform_6, window_bounds = array<i64: 9, 8, 8>}, {pipeline_mode = #tpu.pipeline_mode<synchronous>, transform_indices = @transform_7, window_bounds = array<i64: 8, 1>}, {pipeline_mode = #tpu.pipeline_mode<synchronous>, transform_indices = @transform_8, window_bounds = array<i64: 9, 8, 8>}, {pipeline_mode = #tpu.pipeline_mode<synchronous>, transform_indices = @transform_9, window_bounds = array<i64: 8, 1>}, {pipeline_mode = #tpu.pipeline_mode<synchronous>, transform_indices = @transform_10, window_bounds = array<i64: 64, 1152>}, {pipeline_mode = #tpu.pipeline_mode<synchronous>, transform_indices = @transform_11, window_bounds = array<i64: 16, 1152>}, {pipeline_mode = #tpu.pipeline_mode<synchronous>, transform_indices = @transform_12, window_bounds = array<i64: 9, 16, 8>}, {pipeline_mode = #tpu.pipeline_mode<synchronous>, transform_indices = @transform_13, window_bounds = array<i64: 16, 1>}, {pipeline_mode = #tpu.pipeline_mode<synchronous>, transform_indices = @transform_14, window_bounds = array<i64: 9, 16, 16>}, {pipeline_mode = #tpu.pipeline_mode<synchronous>, transform_indices = @transform_15, window_bounds = array<i64: 16, 1>}, {pipeline_mode = #tpu.pipeline_mode<synchronous>, transform_indices = @transform_16, window_bounds = array<i64: 16, 8>}, {pipeline_mode = #tpu.pipeline_mode<synchronous>, transform_indices = @transform_17, window_bounds = array<i64: 16, 1>}, {pipeline_mode = #tpu.pipeline_mode<synchronous>, transform_indices = @transform_18, window_bounds = array<i64: 64, 16>}, {pipeline_mode = #tpu.pipeline_mode<synchronous>, transform_indices = @transform_19, window_bounds = array<i64: 16, 1152>}, {pipeline_mode = #tpu.pipeline_mode<synchronous>, transform_indices = @transform_20, window_bounds = array<i64: 4, 1152>}, {pipeline_mode = #tpu.pipeline_mode<synchronous>, transform_indices = @transform_21, window_bounds = array<i64: 9, 32, 16>}, {pipeline_mode = #tpu.pipeline_mode<synchronous>, transform_indices = @transform_22, window_bounds = array<i64: 32, 1>}, {pipeline_mode = #tpu.pipeline_mode<synchronous>, transform_indices = @transform_23, window_bounds = array<i64: 9, 32, 32>}, {pipeline_mode = #tpu.pipeline_mode<synchronous>, transform_indices = @transform_24, window_bounds = array<i64: 32, 1>}, {pipeline_mode = #tpu.pipeline_mode<synchronous>, transform_indices = @transform_25, window_bounds = array<i64: 32, 16>}, {pipeline_mode = #tpu.pipeline_mode<synchronous>, transform_indices = @transform_26, window_bounds = array<i64: 32, 1>}, {pipeline_mode = #tpu.pipeline_mode<synchronous>, transform_indices = @transform_27, window_bounds = array<i64: 16, 4>}, {pipeline_mode = #tpu.pipeline_mode<synchronous>, transform_indices = @transform_28, window_bounds = array<i64: 10, 32>}, {pipeline_mode = #tpu.pipeline_mode<synchronous>, transform_indices = @transform_29, window_bounds = array<i64: 10, 1>}, {pipeline_mode = #tpu.pipeline_mode<synchronous>, transform_indices = @transform_30, window_bounds = array<i64: 2, 10>}, {pipeline_mode = #tpu.pipeline_mode<synchronous>, transform_indices = @transform_31, window_bounds = array<i64: 2, 1>}, {transform_indices = @transform_32, window_bounds = array<i64: 1, 8, 256>}, {transform_indices = @transform_33, window_bounds = array<i64: 1, 8, 64>}, {transform_indices = @transform_34, window_bounds = array<i64: 1, 16, 16>}, {transform_indices = @transform_35, window_bounds = array<i64: 1, 32, 4>}, {transform_indices = @transform_36, window_bounds = array<i64: 1, 32, 1>}, {transform_indices = @transform_37, window_bounds = array<i64: 1, 10, 1>}, {transform_indices = @transform_38, window_bounds = array<i64: 1, 10, 1>}, {transform_indices = @transform_39, window_bounds = array<i64: 1, 2, 1>}]} {
    %c0 = arith.constant 0 : index
    %c0_0 = arith.constant 0 : index
    %c0_1 = arith.constant 0 : index
    %0 = vector.load %arg1[%c0, %c0_0, %c0_1] : memref<1x3x256xf32, #tpu.memory_space<vmem>>, vector<1x3x256xf32>
    %1 = vector.shape_cast %0 : vector<1x3x256xf32> to vector<3x256xf32>
    %2 = arith.truncf %1 : vector<3x256xf32> to vector<3x256xbf16>
    %c0_2 = arith.constant 0 : index
    %c0_3 = arith.constant 0 : index
    %3 = vector.load %arg2[%c0_2, %c0_3] : memref<256x2304xbf16, #tpu.memory_space<vmem>>, vector<256x2304xbf16>
    %cst = arith.constant dense<0.000000e+00> : vector<3x2304xf32>
    %4 = tpu.matmul %2, %3, %cst {dimension_numbers = #tpu.dot_dimension_numbers<[1], [0], [0], [1], [0, 0, 1, 1], [], []>} : vector<3x256xbf16>, vector<256x2304xbf16>, vector<3x2304xf32> -> vector<3x2304xf32>
    %5 = arith.truncf %4 : vector<3x2304xf32> to vector<3x2304xbf16>
    %c0_4 = arith.constant 0 : index
    %c0_5 = arith.constant 0 : index
    %c0_6 = arith.constant 0 : index
    %6 = vector.load %arg3[%c0_4, %c0_5, %c0_6] : memref<9x8x3xbf16, #tpu.memory_space<vmem>>, vector<1x8x3xbf16>
    %7 = vector.shape_cast %6 : vector<1x8x3xbf16> to vector<8x3xbf16>
    %8 = vector.extract_strided_slice %5 {offsets = [0, 0], sizes = [3, 256], strides = [1, 1]} : vector<3x2304xbf16> to vector<3x256xbf16>
    %cst_7 = arith.constant dense<0.000000e+00> : vector<8x256xf32>
    %9 = tpu.matmul %7, %8, %cst_7 {dimension_numbers = #tpu.dot_dimension_numbers<[1], [0], [0], [1], [0, 0, 1, 1], [], []>} : vector<8x3xbf16>, vector<3x256xbf16>, vector<8x256xf32> -> vector<8x256xf32>
    %c1 = arith.constant 1 : index
    %c0_8 = arith.constant 0 : index
    %c0_9 = arith.constant 0 : index
    %10 = vector.load %arg3[%c1, %c0_8, %c0_9] : memref<9x8x3xbf16, #tpu.memory_space<vmem>>, vector<1x8x3xbf16>
    %11 = vector.shape_cast %10 : vector<1x8x3xbf16> to vector<8x3xbf16>
    %12 = vector.extract_strided_slice %5 {offsets = [0, 256], sizes = [3, 256], strides = [1, 1]} : vector<3x2304xbf16> to vector<3x256xbf16>
    %cst_10 = arith.constant dense<0.000000e+00> : vector<8x256xf32>
    %13 = tpu.matmul %11, %12, %cst_10 {dimension_numbers = #tpu.dot_dimension_numbers<[1], [0], [0], [1], [0, 0, 1, 1], [], []>} : vector<8x3xbf16>, vector<3x256xbf16>, vector<8x256xf32> -> vector<8x256xf32>
    %14 = arith.addf %9, %13 : vector<8x256xf32>
    %c2 = arith.constant 2 : index
    %c0_11 = arith.constant 0 : index
    %c0_12 = arith.constant 0 : index
    %15 = vector.load %arg3[%c2, %c0_11, %c0_12] : memref<9x8x3xbf16, #tpu.memory_space<vmem>>, vector<1x8x3xbf16>
    %16 = vector.shape_cast %15 : vector<1x8x3xbf16> to vector<8x3xbf16>
    %17 = vector.extract_strided_slice %5 {offsets = [0, 512], sizes = [3, 256], strides = [1, 1]} : vector<3x2304xbf16> to vector<3x256xbf16>
    %cst_13 = arith.constant dense<0.000000e+00> : vector<8x256xf32>
    %18 = tpu.matmul %16, %17, %cst_13 {dimension_numbers = #tpu.dot_dimension_numbers<[1], [0], [0], [1], [0, 0, 1, 1], [], []>} : vector<8x3xbf16>, vector<3x256xbf16>, vector<8x256xf32> -> vector<8x256xf32>
    %19 = arith.addf %14, %18 : vector<8x256xf32>
    %c3 = arith.constant 3 : index
    %c0_14 = arith.constant 0 : index
    %c0_15 = arith.constant 0 : index
    %20 = vector.load %arg3[%c3, %c0_14, %c0_15] : memref<9x8x3xbf16, #tpu.memory_space<vmem>>, vector<1x8x3xbf16>
    %21 = vector.shape_cast %20 : vector<1x8x3xbf16> to vector<8x3xbf16>
    %22 = vector.extract_strided_slice %5 {offsets = [0, 768], sizes = [3, 256], strides = [1, 1]} : vector<3x2304xbf16> to vector<3x256xbf16>
    %cst_16 = arith.constant dense<0.000000e+00> : vector<8x256xf32>
    %23 = tpu.matmul %21, %22, %cst_16 {dimension_numbers = #tpu.dot_dimension_numbers<[1], [0], [0], [1], [0, 0, 1, 1], [], []>} : vector<8x3xbf16>, vector<3x256xbf16>, vector<8x256xf32> -> vector<8x256xf32>
    %24 = arith.addf %19, %23 : vector<8x256xf32>
    %c4 = arith.constant 4 : index
    %c0_17 = arith.constant 0 : index
    %c0_18 = arith.constant 0 : index
    %25 = vector.load %arg3[%c4, %c0_17, %c0_18] : memref<9x8x3xbf16, #tpu.memory_space<vmem>>, vector<1x8x3xbf16>
    %26 = vector.shape_cast %25 : vector<1x8x3xbf16> to vector<8x3xbf16>
    %27 = vector.extract_strided_slice %5 {offsets = [0, 1024], sizes = [3, 256], strides = [1, 1]} : vector<3x2304xbf16> to vector<3x256xbf16>
    %cst_19 = arith.constant dense<0.000000e+00> : vector<8x256xf32>
    %28 = tpu.matmul %26, %27, %cst_19 {dimension_numbers = #tpu.dot_dimension_numbers<[1], [0], [0], [1], [0, 0, 1, 1], [], []>} : vector<8x3xbf16>, vector<3x256xbf16>, vector<8x256xf32> -> vector<8x256xf32>
    %29 = arith.addf %24, %28 : vector<8x256xf32>
    %c5 = arith.constant 5 : index
    %c0_20 = arith.constant 0 : index
    %c0_21 = arith.constant 0 : index
    %30 = vector.load %arg3[%c5, %c0_20, %c0_21] : memref<9x8x3xbf16, #tpu.memory_space<vmem>>, vector<1x8x3xbf16>
    %31 = vector.shape_cast %30 : vector<1x8x3xbf16> to vector<8x3xbf16>
    %32 = vector.extract_strided_slice %5 {offsets = [0, 1280], sizes = [3, 256], strides = [1, 1]} : vector<3x2304xbf16> to vector<3x256xbf16>
    %cst_22 = arith.constant dense<0.000000e+00> : vector<8x256xf32>
    %33 = tpu.matmul %31, %32, %cst_22 {dimension_numbers = #tpu.dot_dimension_numbers<[1], [0], [0], [1], [0, 0, 1, 1], [], []>} : vector<8x3xbf16>, vector<3x256xbf16>, vector<8x256xf32> -> vector<8x256xf32>
    %34 = arith.addf %29, %33 : vector<8x256xf32>
    %c6 = arith.constant 6 : index
    %c0_23 = arith.constant 0 : index
    %c0_24 = arith.constant 0 : index
    %35 = vector.load %arg3[%c6, %c0_23, %c0_24] : memref<9x8x3xbf16, #tpu.memory_space<vmem>>, vector<1x8x3xbf16>
    %36 = vector.shape_cast %35 : vector<1x8x3xbf16> to vector<8x3xbf16>
    %37 = vector.extract_strided_slice %5 {offsets = [0, 1536], sizes = [3, 256], strides = [1, 1]} : vector<3x2304xbf16> to vector<3x256xbf16>
    %cst_25 = arith.constant dense<0.000000e+00> : vector<8x256xf32>
    %38 = tpu.matmul %36, %37, %cst_25 {dimension_numbers = #tpu.dot_dimension_numbers<[1], [0], [0], [1], [0, 0, 1, 1], [], []>} : vector<8x3xbf16>, vector<3x256xbf16>, vector<8x256xf32> -> vector<8x256xf32>
    %39 = arith.addf %34, %38 : vector<8x256xf32>
    %c7 = arith.constant 7 : index
    %c0_26 = arith.constant 0 : index
    %c0_27 = arith.constant 0 : index
    %40 = vector.load %arg3[%c7, %c0_26, %c0_27] : memref<9x8x3xbf16, #tpu.memory_space<vmem>>, vector<1x8x3xbf16>
    %41 = vector.shape_cast %40 : vector<1x8x3xbf16> to vector<8x3xbf16>
    %42 = vector.extract_strided_slice %5 {offsets = [0, 1792], sizes = [3, 256], strides = [1, 1]} : vector<3x2304xbf16> to vector<3x256xbf16>
    %cst_28 = arith.constant dense<0.000000e+00> : vector<8x256xf32>
    %43 = tpu.matmul %41, %42, %cst_28 {dimension_numbers = #tpu.dot_dimension_numbers<[1], [0], [0], [1], [0, 0, 1, 1], [], []>} : vector<8x3xbf16>, vector<3x256xbf16>, vector<8x256xf32> -> vector<8x256xf32>
    %44 = arith.addf %39, %43 : vector<8x256xf32>
    %c8 = arith.constant 8 : index
    %c0_29 = arith.constant 0 : index
    %c0_30 = arith.constant 0 : index
    %45 = vector.load %arg3[%c8, %c0_29, %c0_30] : memref<9x8x3xbf16, #tpu.memory_space<vmem>>, vector<1x8x3xbf16>
    %46 = vector.shape_cast %45 : vector<1x8x3xbf16> to vector<8x3xbf16>
    %47 = vector.extract_strided_slice %5 {offsets = [0, 2048], sizes = [3, 256], strides = [1, 1]} : vector<3x2304xbf16> to vector<3x256xbf16>
    %cst_31 = arith.constant dense<0.000000e+00> : vector<8x256xf32>
    %48 = tpu.matmul %46, %47, %cst_31 {dimension_numbers = #tpu.dot_dimension_numbers<[1], [0], [0], [1], [0, 0, 1, 1], [], []>} : vector<8x3xbf16>, vector<3x256xbf16>, vector<8x256xf32> -> vector<8x256xf32>
    %49 = arith.addf %44, %48 : vector<8x256xf32>
    %c0_32 = arith.constant 0 : index
    %c0_33 = arith.constant 0 : index
    %50 = vector.load %arg4[%c0_32, %c0_33] : memref<8x1xf32, #tpu.memory_space<vmem>>, vector<8x1xf32>
    %51 = vector.broadcast %50 : vector<8x1xf32> to vector<8x256xf32>
    %52 = arith.addf %49, %51 : vector<8x256xf32>
    %cst_34 = arith.constant 0.000000e+00 : f32
    %53 = vector.broadcast %cst_34 : f32 to vector<8x256xf32>
    %54 = arith.maximumf %52, %53 : vector<8x256xf32>
    %c0_35 = arith.constant 0 : index
    %c0_36 = arith.constant 0 : index
    %c0_37 = arith.constant 0 : index
    %55 = vector.load %arg33[%c0_35, %c0_36, %c0_37] : memref<1x8x256xf32, #tpu.memory_space<vmem>>, vector<1x8x256xf32>
    %56 = vector.shape_cast %55 : vector<1x8x256xf32> to vector<8x256xf32>
    %57 = vector.shape_cast %54 : vector<8x256xf32> to vector<1x8x256xf32>
    tpu.vector_store %arg33[%c0_35, %c0_36, %c0_37], %57 {strides = array<i32>} : memref<1x8x256xf32, #tpu.memory_space<vmem>>, vector<1x8x256xf32>,
    %58 = arith.truncf %54 : vector<8x256xf32> to vector<8x256xbf16>
    %c0_38 = arith.constant 0 : index
    %c0_39 = arith.constant 0 : index
    %59 = vector.load %arg5[%c0_38, %c0_39] : memref<256x1152xbf16, #tpu.memory_space<vmem>>, vector<256x1152xbf16>
    %cst_40 = arith.constant dense<0.000000e+00> : vector<8x1152xf32>
    %60 = tpu.matmul %58, %59, %cst_40 {dimension_numbers = #tpu.dot_dimension_numbers<[1], [0], [0], [1], [0, 0, 1, 1], [], []>} : vector<8x256xbf16>, vector<256x1152xbf16>, vector<8x1152xf32> -> vector<8x1152xf32>
    %61 = vector.extract_strided_slice %60 {offsets = [0, 0], sizes = [8, 64], strides = [1, 1]} : vector<8x1152xf32> to vector<8x64xf32>
    %62 = vector.extract_strided_slice %60 {offsets = [0, 128], sizes = [8, 64], strides = [1, 1]} : vector<8x1152xf32> to vector<8x64xf32>
    %63 = arith.maximumf %61, %62 : vector<8x64xf32>
    %64 = vector.extract_strided_slice %60 {offsets = [0, 256], sizes = [8, 64], strides = [1, 1]} : vector<8x1152xf32> to vector<8x64xf32>
    %65 = arith.maximumf %63, %64 : vector<8x64xf32>
    %66 = vector.extract_strided_slice %60 {offsets = [0, 384], sizes = [8, 64], strides = [1, 1]} : vector<8x1152xf32> to vector<8x64xf32>
    %67 = arith.maximumf %65, %66 : vector<8x64xf32>
    %68 = vector.extract_strided_slice %60 {offsets = [0, 512], sizes = [8, 64], strides = [1, 1]} : vector<8x1152xf32> to vector<8x64xf32>
    %69 = arith.maximumf %67, %68 : vector<8x64xf32>
    %70 = vector.extract_strided_slice %60 {offsets = [0, 640], sizes = [8, 64], strides = [1, 1]} : vector<8x1152xf32> to vector<8x64xf32>
    %71 = arith.maximumf %69, %70 : vector<8x64xf32>
    %72 = vector.extract_strided_slice %60 {offsets = [0, 768], sizes = [8, 64], strides = [1, 1]} : vector<8x1152xf32> to vector<8x64xf32>
    %73 = arith.maximumf %71, %72 : vector<8x64xf32>
    %74 = vector.extract_strided_slice %60 {offsets = [0, 896], sizes = [8, 64], strides = [1, 1]} : vector<8x1152xf32> to vector<8x64xf32>
    %75 = arith.maximumf %73, %74 : vector<8x64xf32>
    %76 = vector.extract_strided_slice %60 {offsets = [0, 1024], sizes = [8, 64], strides = [1, 1]} : vector<8x1152xf32> to vector<8x64xf32>
    %77 = arith.maximumf %75, %76 : vector<8x64xf32>
    %78 = arith.truncf %77 : vector<8x64xf32> to vector<8x64xbf16>
    %c0_41 = arith.constant 0 : index
    %c0_42 = arith.constant 0 : index
    %79 = vector.load %arg6[%c0_41, %c0_42] : memref<64x1152xbf16, #tpu.memory_space<vmem>>, vector<64x1152xbf16>
    %cst_43 = arith.constant dense<0.000000e+00> : vector<8x1152xf32>
    %80 = tpu.matmul %78, %79, %cst_43 {dimension_numbers = #tpu.dot_dimension_numbers<[1], [0], [0], [1], [0, 0, 1, 1], [], []>} : vector<8x64xbf16>, vector<64x1152xbf16>, vector<8x1152xf32> -> vector<8x1152xf32>
    %81 = arith.truncf %80 : vector<8x1152xf32> to vector<8x1152xbf16>
    %c0_44 = arith.constant 0 : index
    %c0_45 = arith.constant 0 : index
    %c0_46 = arith.constant 0 : index
    %82 = vector.load %arg7[%c0_44, %c0_45, %c0_46] : memref<9x8x8xbf16, #tpu.memory_space<vmem>>, vector<1x8x8xbf16>
    %83 = vector.shape_cast %82 : vector<1x8x8xbf16> to vector<8x8xbf16>
    %84 = vector.extract_strided_slice %81 {offsets = [0, 0], sizes = [8, 64], strides = [1, 1]} : vector<8x1152xbf16> to vector<8x64xbf16>
    %cst_47 = arith.constant dense<0.000000e+00> : vector<8x64xf32>
    %85 = tpu.matmul %83, %84, %cst_47 {dimension_numbers = #tpu.dot_dimension_numbers<[1], [0], [0], [1], [0, 0, 1, 1], [], []>} : vector<8x8xbf16>, vector<8x64xbf16>, vector<8x64xf32> -> vector<8x64xf32>
    %c1_48 = arith.constant 1 : index
    %c0_49 = arith.constant 0 : index
    %c0_50 = arith.constant 0 : index
    %86 = vector.load %arg7[%c1_48, %c0_49, %c0_50] : memref<9x8x8xbf16, #tpu.memory_space<vmem>>, vector<1x8x8xbf16>
    %87 = vector.shape_cast %86 : vector<1x8x8xbf16> to vector<8x8xbf16>
    %88 = vector.extract_strided_slice %81 {offsets = [0, 128], sizes = [8, 64], strides = [1, 1]} : vector<8x1152xbf16> to vector<8x64xbf16>
    %cst_51 = arith.constant dense<0.000000e+00> : vector<8x64xf32>
    %89 = tpu.matmul %87, %88, %cst_51 {dimension_numbers = #tpu.dot_dimension_numbers<[1], [0], [0], [1], [0, 0, 1, 1], [], []>} : vector<8x8xbf16>, vector<8x64xbf16>, vector<8x64xf32> -> vector<8x64xf32>
    %90 = arith.addf %85, %89 : vector<8x64xf32>
    %c2_52 = arith.constant 2 : index
    %c0_53 = arith.constant 0 : index
    %c0_54 = arith.constant 0 : index
    %91 = vector.load %arg7[%c2_52, %c0_53, %c0_54] : memref<9x8x8xbf16, #tpu.memory_space<vmem>>, vector<1x8x8xbf16>
    %92 = vector.shape_cast %91 : vector<1x8x8xbf16> to vector<8x8xbf16>
    %93 = vector.extract_strided_slice %81 {offsets = [0, 256], sizes = [8, 64], strides = [1, 1]} : vector<8x1152xbf16> to vector<8x64xbf16>
    %cst_55 = arith.constant dense<0.000000e+00> : vector<8x64xf32>
    %94 = tpu.matmul %92, %93, %cst_55 {dimension_numbers = #tpu.dot_dimension_numbers<[1], [0], [0], [1], [0, 0, 1, 1], [], []>} : vector<8x8xbf16>, vector<8x64xbf16>, vector<8x64xf32> -> vector<8x64xf32>
    %95 = arith.addf %90, %94 : vector<8x64xf32>
    %c3_56 = arith.constant 3 : index
    %c0_57 = arith.constant 0 : index
    %c0_58 = arith.constant 0 : index
    %96 = vector.load %arg7[%c3_56, %c0_57, %c0_58] : memref<9x8x8xbf16, #tpu.memory_space<vmem>>, vector<1x8x8xbf16>
    %97 = vector.shape_cast %96 : vector<1x8x8xbf16> to vector<8x8xbf16>
    %98 = vector.extract_strided_slice %81 {offsets = [0, 384], sizes = [8, 64], strides = [1, 1]} : vector<8x1152xbf16> to vector<8x64xbf16>
    %cst_59 = arith.constant dense<0.000000e+00> : vector<8x64xf32>
    %99 = tpu.matmul %97, %98, %cst_59 {dimension_numbers = #tpu.dot_dimension_numbers<[1], [0], [0], [1], [0, 0, 1, 1], [], []>} : vector<8x8xbf16>, vector<8x64xbf16>, vector<8x64xf32> -> vector<8x64xf32>
    %100 = arith.addf %95, %99 : vector<8x64xf32>
    %c4_60 = arith.constant 4 : index
    %c0_61 = arith.constant 0 : index
    %c0_62 = arith.constant 0 : index
    %101 = vector.load %arg7[%c4_60, %c0_61, %c0_62] : memref<9x8x8xbf16, #tpu.memory_space<vmem>>, vector<1x8x8xbf16>
    %102 = vector.shape_cast %101 : vector<1x8x8xbf16> to vector<8x8xbf16>
    %103 = vector.extract_strided_slice %81 {offsets = [0, 512], sizes = [8, 64], strides = [1, 1]} : vector<8x1152xbf16> to vector<8x64xbf16>
    %cst_63 = arith.constant dense<0.000000e+00> : vector<8x64xf32>
    %104 = tpu.matmul %102, %103, %cst_63 {dimension_numbers = #tpu.dot_dimension_numbers<[1], [0], [0], [1], [0, 0, 1, 1], [], []>} : vector<8x8xbf16>, vector<8x64xbf16>, vector<8x64xf32> -> vector<8x64xf32>
    %105 = arith.addf %100, %104 : vector<8x64xf32>
    %c5_64 = arith.constant 5 : index
    %c0_65 = arith.constant 0 : index
    %c0_66 = arith.constant 0 : index
    %106 = vector.load %arg7[%c5_64, %c0_65, %c0_66] : memref<9x8x8xbf16, #tpu.memory_space<vmem>>, vector<1x8x8xbf16>
    %107 = vector.shape_cast %106 : vector<1x8x8xbf16> to vector<8x8xbf16>
    %108 = vector.extract_strided_slice %81 {offsets = [0, 640], sizes = [8, 64], strides = [1, 1]} : vector<8x1152xbf16> to vector<8x64xbf16>
    %cst_67 = arith.constant dense<0.000000e+00> : vector<8x64xf32>
    %109 = tpu.matmul %107, %108, %cst_67 {dimension_numbers = #tpu.dot_dimension_numbers<[1], [0], [0], [1], [0, 0, 1, 1], [], []>} : vector<8x8xbf16>, vector<8x64xbf16>, vector<8x64xf32> -> vector<8x64xf32>
    %110 = arith.addf %105, %109 : vector<8x64xf32>
    %c6_68 = arith.constant 6 : index
    %c0_69 = arith.constant 0 : index
    %c0_70 = arith.constant 0 : index
    %111 = vector.load %arg7[%c6_68, %c0_69, %c0_70] : memref<9x8x8xbf16, #tpu.memory_space<vmem>>, vector<1x8x8xbf16>
    %112 = vector.shape_cast %111 : vector<1x8x8xbf16> to vector<8x8xbf16>
    %113 = vector.extract_strided_slice %81 {offsets = [0, 768], sizes = [8, 64], strides = [1, 1]} : vector<8x1152xbf16> to vector<8x64xbf16>
    %cst_71 = arith.constant dense<0.000000e+00> : vector<8x64xf32>
    %114 = tpu.matmul %112, %113, %cst_71 {dimension_numbers = #tpu.dot_dimension_numbers<[1], [0], [0], [1], [0, 0, 1, 1], [], []>} : vector<8x8xbf16>, vector<8x64xbf16>, vector<8x64xf32> -> vector<8x64xf32>
    %115 = arith.addf %110, %114 : vector<8x64xf32>
    %c7_72 = arith.constant 7 : index
    %c0_73 = arith.constant 0 : index
    %c0_74 = arith.constant 0 : index
    %116 = vector.load %arg7[%c7_72, %c0_73, %c0_74] : memref<9x8x8xbf16, #tpu.memory_space<vmem>>, vector<1x8x8xbf16>
    %117 = vector.shape_cast %116 : vector<1x8x8xbf16> to vector<8x8xbf16>
    %118 = vector.extract_strided_slice %81 {offsets = [0, 896], sizes = [8, 64], strides = [1, 1]} : vector<8x1152xbf16> to vector<8x64xbf16>
    %cst_75 = arith.constant dense<0.000000e+00> : vector<8x64xf32>
    %119 = tpu.matmul %117, %118, %cst_75 {dimension_numbers = #tpu.dot_dimension_numbers<[1], [0], [0], [1], [0, 0, 1, 1], [], []>} : vector<8x8xbf16>, vector<8x64xbf16>, vector<8x64xf32> -> vector<8x64xf32>
    %120 = arith.addf %115, %119 : vector<8x64xf32>
    %c8_76 = arith.constant 8 : index
    %c0_77 = arith.constant 0 : index
    %c0_78 = arith.constant 0 : index
    %121 = vector.load %arg7[%c8_76, %c0_77, %c0_78] : memref<9x8x8xbf16, #tpu.memory_space<vmem>>, vector<1x8x8xbf16>
    %122 = vector.shape_cast %121 : vector<1x8x8xbf16> to vector<8x8xbf16>
    %123 = vector.extract_strided_slice %81 {offsets = [0, 1024], sizes = [8, 64], strides = [1, 1]} : vector<8x1152xbf16> to vector<8x64xbf16>
    %cst_79 = arith.constant dense<0.000000e+00> : vector<8x64xf32>
    %124 = tpu.matmul %122, %123, %cst_79 {dimension_numbers = #tpu.dot_dimension_numbers<[1], [0], [0], [1], [0, 0, 1, 1], [], []>} : vector<8x8xbf16>, vector<8x64xbf16>, vector<8x64xf32> -> vector<8x64xf32>
    %125 = arith.addf %120, %124 : vector<8x64xf32>
    %c0_80 = arith.constant 0 : index
    %c0_81 = arith.constant 0 : index
    %126 = vector.load %arg8[%c0_80, %c0_81] : memref<8x1xf32, #tpu.memory_space<vmem>>, vector<8x1xf32>
    %127 = vector.broadcast %126 : vector<8x1xf32> to vector<8x64xf32>
    %128 = arith.addf %125, %127 : vector<8x64xf32>
    %cst_82 = arith.constant 0.000000e+00 : f32
    %129 = vector.broadcast %cst_82 : f32 to vector<8x64xf32>
    %130 = arith.maximumf %128, %129 : vector<8x64xf32>
    %131 = arith.truncf %130 : vector<8x64xf32> to vector<8x64xbf16>
    %c0_83 = arith.constant 0 : index
    %c0_84 = arith.constant 0 : index
    %132 = vector.load %arg6[%c0_83, %c0_84] : memref<64x1152xbf16, #tpu.memory_space<vmem>>, vector<64x1152xbf16>
    %cst_85 = arith.constant dense<0.000000e+00> : vector<8x1152xf32>
    %133 = tpu.matmul %131, %132, %cst_85 {dimension_numbers = #tpu.dot_dimension_numbers<[1], [0], [0], [1], [0, 0, 1, 1], [], []>} : vector<8x64xbf16>, vector<64x1152xbf16>, vector<8x1152xf32> -> vector<8x1152xf32>
    %134 = arith.truncf %133 : vector<8x1152xf32> to vector<8x1152xbf16>
    %c0_86 = arith.constant 0 : index
    %c0_87 = arith.constant 0 : index
    %c0_88 = arith.constant 0 : index
    %135 = vector.load %arg9[%c0_86, %c0_87, %c0_88] : memref<9x8x8xbf16, #tpu.memory_space<vmem>>, vector<1x8x8xbf16>
    %136 = vector.shape_cast %135 : vector<1x8x8xbf16> to vector<8x8xbf16>
    %137 = vector.extract_strided_slice %134 {offsets = [0, 0], sizes = [8, 64], strides = [1, 1]} : vector<8x1152xbf16> to vector<8x64xbf16>
    %cst_89 = arith.constant dense<0.000000e+00> : vector<8x64xf32>
    %138 = tpu.matmul %136, %137, %cst_89 {dimension_numbers = #tpu.dot_dimension_numbers<[1], [0], [0], [1], [0, 0, 1, 1], [], []>} : vector<8x8xbf16>, vector<8x64xbf16>, vector<8x64xf32> -> vector<8x64xf32>
    %c1_90 = arith.constant 1 : index
    %c0_91 = arith.constant 0 : index
    %c0_92 = arith.constant 0 : index
    %139 = vector.load %arg9[%c1_90, %c0_91, %c0_92] : memref<9x8x8xbf16, #tpu.memory_space<vmem>>, vector<1x8x8xbf16>
    %140 = vector.shape_cast %139 : vector<1x8x8xbf16> to vector<8x8xbf16>
    %141 = vector.extract_strided_slice %134 {offsets = [0, 128], sizes = [8, 64], strides = [1, 1]} : vector<8x1152xbf16> to vector<8x64xbf16>
    %cst_93 = arith.constant dense<0.000000e+00> : vector<8x64xf32>
    %142 = tpu.matmul %140, %141, %cst_93 {dimension_numbers = #tpu.dot_dimension_numbers<[1], [0], [0], [1], [0, 0, 1, 1], [], []>} : vector<8x8xbf16>, vector<8x64xbf16>, vector<8x64xf32> -> vector<8x64xf32>
    %143 = arith.addf %138, %142 : vector<8x64xf32>
    %c2_94 = arith.constant 2 : index
    %c0_95 = arith.constant 0 : index
    %c0_96 = arith.constant 0 : index
    %144 = vector.load %arg9[%c2_94, %c0_95, %c0_96] : memref<9x8x8xbf16, #tpu.memory_space<vmem>>, vector<1x8x8xbf16>
    %145 = vector.shape_cast %144 : vector<1x8x8xbf16> to vector<8x8xbf16>
    %146 = vector.extract_strided_slice %134 {offsets = [0, 256], sizes = [8, 64], strides = [1, 1]} : vector<8x1152xbf16> to vector<8x64xbf16>
    %cst_97 = arith.constant dense<0.000000e+00> : vector<8x64xf32>
    %147 = tpu.matmul %145, %146, %cst_97 {dimension_numbers = #tpu.dot_dimension_numbers<[1], [0], [0], [1], [0, 0, 1, 1], [], []>} : vector<8x8xbf16>, vector<8x64xbf16>, vector<8x64xf32> -> vector<8x64xf32>
    %148 = arith.addf %143, %147 : vector<8x64xf32>
    %c3_98 = arith.constant 3 : index
    %c0_99 = arith.constant 0 : index
    %c0_100 = arith.constant 0 : index
    %149 = vector.load %arg9[%c3_98, %c0_99, %c0_100] : memref<9x8x8xbf16, #tpu.memory_space<vmem>>, vector<1x8x8xbf16>
    %150 = vector.shape_cast %149 : vector<1x8x8xbf16> to vector<8x8xbf16>
    %151 = vector.extract_strided_slice %134 {offsets = [0, 384], sizes = [8, 64], strides = [1, 1]} : vector<8x1152xbf16> to vector<8x64xbf16>
    %cst_101 = arith.constant dense<0.000000e+00> : vector<8x64xf32>
    %152 = tpu.matmul %150, %151, %cst_101 {dimension_numbers = #tpu.dot_dimension_numbers<[1], [0], [0], [1], [0, 0, 1, 1], [], []>} : vector<8x8xbf16>, vector<8x64xbf16>, vector<8x64xf32> -> vector<8x64xf32>
    %153 = arith.addf %148, %152 : vector<8x64xf32>
    %c4_102 = arith.constant 4 : index
    %c0_103 = arith.constant 0 : index
    %c0_104 = arith.constant 0 : index
    %154 = vector.load %arg9[%c4_102, %c0_103, %c0_104] : memref<9x8x8xbf16, #tpu.memory_space<vmem>>, vector<1x8x8xbf16>
    %155 = vector.shape_cast %154 : vector<1x8x8xbf16> to vector<8x8xbf16>
    %156 = vector.extract_strided_slice %134 {offsets = [0, 512], sizes = [8, 64], strides = [1, 1]} : vector<8x1152xbf16> to vector<8x64xbf16>
    %cst_105 = arith.constant dense<0.000000e+00> : vector<8x64xf32>
    %157 = tpu.matmul %155, %156, %cst_105 {dimension_numbers = #tpu.dot_dimension_numbers<[1], [0], [0], [1], [0, 0, 1, 1], [], []>} : vector<8x8xbf16>, vector<8x64xbf16>, vector<8x64xf32> -> vector<8x64xf32>
    %158 = arith.addf %153, %157 : vector<8x64xf32>
    %c5_106 = arith.constant 5 : index
    %c0_107 = arith.constant 0 : index
    %c0_108 = arith.constant 0 : index
    %159 = vector.load %arg9[%c5_106, %c0_107, %c0_108] : memref<9x8x8xbf16, #tpu.memory_space<vmem>>, vector<1x8x8xbf16>
    %160 = vector.shape_cast %159 : vector<1x8x8xbf16> to vector<8x8xbf16>
    %161 = vector.extract_strided_slice %134 {offsets = [0, 640], sizes = [8, 64], strides = [1, 1]} : vector<8x1152xbf16> to vector<8x64xbf16>
    %cst_109 = arith.constant dense<0.000000e+00> : vector<8x64xf32>
    %162 = tpu.matmul %160, %161, %cst_109 {dimension_numbers = #tpu.dot_dimension_numbers<[1], [0], [0], [1], [0, 0, 1, 1], [], []>} : vector<8x8xbf16>, vector<8x64xbf16>, vector<8x64xf32> -> vector<8x64xf32>
    %163 = arith.addf %158, %162 : vector<8x64xf32>
    %c6_110 = arith.constant 6 : index
    %c0_111 = arith.constant 0 : index
    %c0_112 = arith.constant 0 : index
    %164 = vector.load %arg9[%c6_110, %c0_111, %c0_112] : memref<9x8x8xbf16, #tpu.memory_space<vmem>>, vector<1x8x8xbf16>
    %165 = vector.shape_cast %164 : vector<1x8x8xbf16> to vector<8x8xbf16>
    %166 = vector.extract_strided_slice %134 {offsets = [0, 768], sizes = [8, 64], strides = [1, 1]} : vector<8x1152xbf16> to vector<8x64xbf16>
    %cst_113 = arith.constant dense<0.000000e+00> : vector<8x64xf32>
    %167 = tpu.matmul %165, %166, %cst_113 {dimension_numbers = #tpu.dot_dimension_numbers<[1], [0], [0], [1], [0, 0, 1, 1], [], []>} : vector<8x8xbf16>, vector<8x64xbf16>, vector<8x64xf32> -> vector<8x64xf32>
    %168 = arith.addf %163, %167 : vector<8x64xf32>
    %c7_114 = arith.constant 7 : index
    %c0_115 = arith.constant 0 : index
    %c0_116 = arith.constant 0 : index
    %169 = vector.load %arg9[%c7_114, %c0_115, %c0_116] : memref<9x8x8xbf16, #tpu.memory_space<vmem>>, vector<1x8x8xbf16>
    %170 = vector.shape_cast %169 : vector<1x8x8xbf16> to vector<8x8xbf16>
    %171 = vector.extract_strided_slice %134 {offsets = [0, 896], sizes = [8, 64], strides = [1, 1]} : vector<8x1152xbf16> to vector<8x64xbf16>
    %cst_117 = arith.constant dense<0.000000e+00> : vector<8x64xf32>
    %172 = tpu.matmul %170, %171, %cst_117 {dimension_numbers = #tpu.dot_dimension_numbers<[1], [0], [0], [1], [0, 0, 1, 1], [], []>} : vector<8x8xbf16>, vector<8x64xbf16>, vector<8x64xf32> -> vector<8x64xf32>
    %173 = arith.addf %168, %172 : vector<8x64xf32>
    %c8_118 = arith.constant 8 : index
    %c0_119 = arith.constant 0 : index
    %c0_120 = arith.constant 0 : index
    %174 = vector.load %arg9[%c8_118, %c0_119, %c0_120] : memref<9x8x8xbf16, #tpu.memory_space<vmem>>, vector<1x8x8xbf16>
    %175 = vector.shape_cast %174 : vector<1x8x8xbf16> to vector<8x8xbf16>
    %176 = vector.extract_strided_slice %134 {offsets = [0, 1024], sizes = [8, 64], strides = [1, 1]} : vector<8x1152xbf16> to vector<8x64xbf16>
    %cst_121 = arith.constant dense<0.000000e+00> : vector<8x64xf32>
    %177 = tpu.matmul %175, %176, %cst_121 {dimension_numbers = #tpu.dot_dimension_numbers<[1], [0], [0], [1], [0, 0, 1, 1], [], []>} : vector<8x8xbf16>, vector<8x64xbf16>, vector<8x64xf32> -> vector<8x64xf32>
    %178 = arith.addf %173, %177 : vector<8x64xf32>
    %c0_122 = arith.constant 0 : index
    %c0_123 = arith.constant 0 : index
    %179 = vector.load %arg10[%c0_122, %c0_123] : memref<8x1xf32, #tpu.memory_space<vmem>>, vector<8x1xf32>
    %180 = vector.broadcast %179 : vector<8x1xf32> to vector<8x64xf32>
    %181 = arith.addf %178, %180 : vector<8x64xf32>
    %182 = arith.addf %181, %77 : vector<8x64xf32>
    %cst_124 = arith.constant 0.000000e+00 : f32
    %183 = vector.broadcast %cst_124 : f32 to vector<8x64xf32>
    %184 = arith.maximumf %182, %183 : vector<8x64xf32>
    %185 = arith.truncf %184 : vector<8x64xf32> to vector<8x64xbf16>
    %c0_125 = arith.constant 0 : index
    %c0_126 = arith.constant 0 : index
    %c0_127 = arith.constant 0 : index
    %186 = vector.load %arg34[%c0_125, %c0_126, %c0_127] : memref<1x8x64xf32, #tpu.memory_space<vmem>>, vector<1x8x64xf32>
    %187 = vector.shape_cast %186 : vector<1x8x64xf32> to vector<8x64xf32>
    %188 = vector.shape_cast %184 : vector<8x64xf32> to vector<1x8x64xf32>
    tpu.vector_store %arg34[%c0_125, %c0_126, %c0_127], %188 {strides = array<i32>} : memref<1x8x64xf32, #tpu.memory_space<vmem>>, vector<1x8x64xf32>,
    %c0_128 = arith.constant 0 : index
    %c0_129 = arith.constant 0 : index
    %189 = vector.load %arg11[%c0_128, %c0_129] : memref<64x1152xbf16, #tpu.memory_space<vmem>>, vector<64x1152xbf16>
    %cst_130 = arith.constant dense<0.000000e+00> : vector<8x1152xf32>
    %190 = tpu.matmul %185, %189, %cst_130 {dimension_numbers = #tpu.dot_dimension_numbers<[1], [0], [0], [1], [0, 0, 1, 1], [], []>} : vector<8x64xbf16>, vector<64x1152xbf16>, vector<8x1152xf32> -> vector<8x1152xf32>
    %191 = arith.truncf %190 : vector<8x1152xf32> to vector<8x1152xbf16>
    %c0_131 = arith.constant 0 : index
    %c0_132 = arith.constant 0 : index
    %c0_133 = arith.constant 0 : index
    %192 = vector.load %arg13[%c0_131, %c0_132, %c0_133] : memref<9x16x8xbf16, #tpu.memory_space<vmem>>, vector<1x16x8xbf16>
    %193 = vector.shape_cast %192 : vector<1x16x8xbf16> to vector<16x8xbf16>
    %194 = vector.extract_strided_slice %191 {offsets = [0, 0], sizes = [8, 16], strides = [1, 1]} : vector<8x1152xbf16> to vector<8x16xbf16>
    %cst_134 = arith.constant dense<0.000000e+00> : vector<16x16xf32>
    %195 = tpu.matmul %193, %194, %cst_134 {dimension_numbers = #tpu.dot_dimension_numbers<[1], [0], [0], [1], [0, 0, 1, 1], [], []>} : vector<16x8xbf16>, vector<8x16xbf16>, vector<16x16xf32> -> vector<16x16xf32>
    %c1_135 = arith.constant 1 : index
    %c0_136 = arith.constant 0 : index
    %c0_137 = arith.constant 0 : index
    %196 = vector.load %arg13[%c1_135, %c0_136, %c0_137] : memref<9x16x8xbf16, #tpu.memory_space<vmem>>, vector<1x16x8xbf16>
    %197 = vector.shape_cast %196 : vector<1x16x8xbf16> to vector<16x8xbf16>
    %198 = vector.extract_strided_slice %191 {offsets = [0, 128], sizes = [8, 16], strides = [1, 1]} : vector<8x1152xbf16> to vector<8x16xbf16>
    %cst_138 = arith.constant dense<0.000000e+00> : vector<16x16xf32>
    %199 = tpu.matmul %197, %198, %cst_138 {dimension_numbers = #tpu.dot_dimension_numbers<[1], [0], [0], [1], [0, 0, 1, 1], [], []>} : vector<16x8xbf16>, vector<8x16xbf16>, vector<16x16xf32> -> vector<16x16xf32>
    %200 = arith.addf %195, %199 : vector<16x16xf32>
    %c2_139 = arith.constant 2 : index
    %c0_140 = arith.constant 0 : index
    %c0_141 = arith.constant 0 : index
    %201 = vector.load %arg13[%c2_139, %c0_140, %c0_141] : memref<9x16x8xbf16, #tpu.memory_space<vmem>>, vector<1x16x8xbf16>
    %202 = vector.shape_cast %201 : vector<1x16x8xbf16> to vector<16x8xbf16>
    %203 = vector.extract_strided_slice %191 {offsets = [0, 256], sizes = [8, 16], strides = [1, 1]} : vector<8x1152xbf16> to vector<8x16xbf16>
    %cst_142 = arith.constant dense<0.000000e+00> : vector<16x16xf32>
    %204 = tpu.matmul %202, %203, %cst_142 {dimension_numbers = #tpu.dot_dimension_numbers<[1], [0], [0], [1], [0, 0, 1, 1], [], []>} : vector<16x8xbf16>, vector<8x16xbf16>, vector<16x16xf32> -> vector<16x16xf32>
    %205 = arith.addf %200, %204 : vector<16x16xf32>
    %c3_143 = arith.constant 3 : index
    %c0_144 = arith.constant 0 : index
    %c0_145 = arith.constant 0 : index
    %206 = vector.load %arg13[%c3_143, %c0_144, %c0_145] : memref<9x16x8xbf16, #tpu.memory_space<vmem>>, vector<1x16x8xbf16>
    %207 = vector.shape_cast %206 : vector<1x16x8xbf16> to vector<16x8xbf16>
    %208 = vector.extract_strided_slice %191 {offsets = [0, 384], sizes = [8, 16], strides = [1, 1]} : vector<8x1152xbf16> to vector<8x16xbf16>
    %cst_146 = arith.constant dense<0.000000e+00> : vector<16x16xf32>
    %209 = tpu.matmul %207, %208, %cst_146 {dimension_numbers = #tpu.dot_dimension_numbers<[1], [0], [0], [1], [0, 0, 1, 1], [], []>} : vector<16x8xbf16>, vector<8x16xbf16>, vector<16x16xf32> -> vector<16x16xf32>
    %210 = arith.addf %205, %209 : vector<16x16xf32>
    %c4_147 = arith.constant 4 : index
    %c0_148 = arith.constant 0 : index
    %c0_149 = arith.constant 0 : index
    %211 = vector.load %arg13[%c4_147, %c0_148, %c0_149] : memref<9x16x8xbf16, #tpu.memory_space<vmem>>, vector<1x16x8xbf16>
    %212 = vector.shape_cast %211 : vector<1x16x8xbf16> to vector<16x8xbf16>
    %213 = vector.extract_strided_slice %191 {offsets = [0, 512], sizes = [8, 16], strides = [1, 1]} : vector<8x1152xbf16> to vector<8x16xbf16>
    %cst_150 = arith.constant dense<0.000000e+00> : vector<16x16xf32>
    %214 = tpu.matmul %212, %213, %cst_150 {dimension_numbers = #tpu.dot_dimension_numbers<[1], [0], [0], [1], [0, 0, 1, 1], [], []>} : vector<16x8xbf16>, vector<8x16xbf16>, vector<16x16xf32> -> vector<16x16xf32>
    %215 = arith.addf %210, %214 : vector<16x16xf32>
    %c5_151 = arith.constant 5 : index
    %c0_152 = arith.constant 0 : index
    %c0_153 = arith.constant 0 : index
    %216 = vector.load %arg13[%c5_151, %c0_152, %c0_153] : memref<9x16x8xbf16, #tpu.memory_space<vmem>>, vector<1x16x8xbf16>
    %217 = vector.shape_cast %216 : vector<1x16x8xbf16> to vector<16x8xbf16>
    %218 = vector.extract_strided_slice %191 {offsets = [0, 640], sizes = [8, 16], strides = [1, 1]} : vector<8x1152xbf16> to vector<8x16xbf16>
    %cst_154 = arith.constant dense<0.000000e+00> : vector<16x16xf32>
    %219 = tpu.matmul %217, %218, %cst_154 {dimension_numbers = #tpu.dot_dimension_numbers<[1], [0], [0], [1], [0, 0, 1, 1], [], []>} : vector<16x8xbf16>, vector<8x16xbf16>, vector<16x16xf32> -> vector<16x16xf32>
    %220 = arith.addf %215, %219 : vector<16x16xf32>
    %c6_155 = arith.constant 6 : index
    %c0_156 = arith.constant 0 : index
    %c0_157 = arith.constant 0 : index
    %221 = vector.load %arg13[%c6_155, %c0_156, %c0_157] : memref<9x16x8xbf16, #tpu.memory_space<vmem>>, vector<1x16x8xbf16>
    %222 = vector.shape_cast %221 : vector<1x16x8xbf16> to vector<16x8xbf16>
    %223 = vector.extract_strided_slice %191 {offsets = [0, 768], sizes = [8, 16], strides = [1, 1]} : vector<8x1152xbf16> to vector<8x16xbf16>
    %cst_158 = arith.constant dense<0.000000e+00> : vector<16x16xf32>
    %224 = tpu.matmul %222, %223, %cst_158 {dimension_numbers = #tpu.dot_dimension_numbers<[1], [0], [0], [1], [0, 0, 1, 1], [], []>} : vector<16x8xbf16>, vector<8x16xbf16>, vector<16x16xf32> -> vector<16x16xf32>
    %225 = arith.addf %220, %224 : vector<16x16xf32>
    %c7_159 = arith.constant 7 : index
    %c0_160 = arith.constant 0 : index
    %c0_161 = arith.constant 0 : index
    %226 = vector.load %arg13[%c7_159, %c0_160, %c0_161] : memref<9x16x8xbf16, #tpu.memory_space<vmem>>, vector<1x16x8xbf16>
    %227 = vector.shape_cast %226 : vector<1x16x8xbf16> to vector<16x8xbf16>
    %228 = vector.extract_strided_slice %191 {offsets = [0, 896], sizes = [8, 16], strides = [1, 1]} : vector<8x1152xbf16> to vector<8x16xbf16>
    %cst_162 = arith.constant dense<0.000000e+00> : vector<16x16xf32>
    %229 = tpu.matmul %227, %228, %cst_162 {dimension_numbers = #tpu.dot_dimension_numbers<[1], [0], [0], [1], [0, 0, 1, 1], [], []>} : vector<16x8xbf16>, vector<8x16xbf16>, vector<16x16xf32> -> vector<16x16xf32>
    %230 = arith.addf %225, %229 : vector<16x16xf32>
    %c8_163 = arith.constant 8 : index
    %c0_164 = arith.constant 0 : index
    %c0_165 = arith.constant 0 : index
    %231 = vector.load %arg13[%c8_163, %c0_164, %c0_165] : memref<9x16x8xbf16, #tpu.memory_space<vmem>>, vector<1x16x8xbf16>
    %232 = vector.shape_cast %231 : vector<1x16x8xbf16> to vector<16x8xbf16>
    %233 = vector.extract_strided_slice %191 {offsets = [0, 1024], sizes = [8, 16], strides = [1, 1]} : vector<8x1152xbf16> to vector<8x16xbf16>
    %cst_166 = arith.constant dense<0.000000e+00> : vector<16x16xf32>
    %234 = tpu.matmul %232, %233, %cst_166 {dimension_numbers = #tpu.dot_dimension_numbers<[1], [0], [0], [1], [0, 0, 1, 1], [], []>} : vector<16x8xbf16>, vector<8x16xbf16>, vector<16x16xf32> -> vector<16x16xf32>
    %235 = arith.addf %230, %234 : vector<16x16xf32>
    %c0_167 = arith.constant 0 : index
    %c0_168 = arith.constant 0 : index
    %236 = vector.load %arg14[%c0_167, %c0_168] : memref<16x1xf32, #tpu.memory_space<vmem>>, vector<16x1xf32>
    %237 = vector.broadcast %236 : vector<16x1xf32> to vector<16x16xf32>
    %238 = arith.addf %235, %237 : vector<16x16xf32>
    %cst_169 = arith.constant 0.000000e+00 : f32
    %239 = vector.broadcast %cst_169 : f32 to vector<16x16xf32>
    %240 = arith.maximumf %238, %239 : vector<16x16xf32>
    %241 = arith.truncf %240 : vector<16x16xf32> to vector<16x16xbf16>
    %c0_170 = arith.constant 0 : index
    %c0_171 = arith.constant 0 : index
    %242 = vector.load %arg12[%c0_170, %c0_171] : memref<16x1152xbf16, #tpu.memory_space<vmem>>, vector<16x1152xbf16>
    %cst_172 = arith.constant dense<0.000000e+00> : vector<16x1152xf32>
    %243 = tpu.matmul %241, %242, %cst_172 {dimension_numbers = #tpu.dot_dimension_numbers<[1], [0], [0], [1], [0, 0, 1, 1], [], []>} : vector<16x16xbf16>, vector<16x1152xbf16>, vector<16x1152xf32> -> vector<16x1152xf32>
    %244 = arith.truncf %243 : vector<16x1152xf32> to vector<16x1152xbf16>
    %c0_173 = arith.constant 0 : index
    %c0_174 = arith.constant 0 : index
    %c0_175 = arith.constant 0 : index
    %245 = vector.load %arg15[%c0_173, %c0_174, %c0_175] : memref<9x16x16xbf16, #tpu.memory_space<vmem>>, vector<1x16x16xbf16>
    %246 = vector.shape_cast %245 : vector<1x16x16xbf16> to vector<16x16xbf16>
    %247 = vector.extract_strided_slice %244 {offsets = [0, 0], sizes = [16, 16], strides = [1, 1]} : vector<16x1152xbf16> to vector<16x16xbf16>
    %cst_176 = arith.constant dense<0.000000e+00> : vector<16x16xf32>
    %248 = tpu.matmul %246, %247, %cst_176 {dimension_numbers = #tpu.dot_dimension_numbers<[1], [0], [0], [1], [0, 0, 1, 1], [], []>} : vector<16x16xbf16>, vector<16x16xbf16>, vector<16x16xf32> -> vector<16x16xf32>
    %c1_177 = arith.constant 1 : index
    %c0_178 = arith.constant 0 : index
    %c0_179 = arith.constant 0 : index
    %249 = vector.load %arg15[%c1_177, %c0_178, %c0_179] : memref<9x16x16xbf16, #tpu.memory_space<vmem>>, vector<1x16x16xbf16>
    %250 = vector.shape_cast %249 : vector<1x16x16xbf16> to vector<16x16xbf16>
    %251 = vector.extract_strided_slice %244 {offsets = [0, 128], sizes = [16, 16], strides = [1, 1]} : vector<16x1152xbf16> to vector<16x16xbf16>
    %cst_180 = arith.constant dense<0.000000e+00> : vector<16x16xf32>
    %252 = tpu.matmul %250, %251, %cst_180 {dimension_numbers = #tpu.dot_dimension_numbers<[1], [0], [0], [1], [0, 0, 1, 1], [], []>} : vector<16x16xbf16>, vector<16x16xbf16>, vector<16x16xf32> -> vector<16x16xf32>
    %253 = arith.addf %248, %252 : vector<16x16xf32>
    %c2_181 = arith.constant 2 : index
    %c0_182 = arith.constant 0 : index
    %c0_183 = arith.constant 0 : index
    %254 = vector.load %arg15[%c2_181, %c0_182, %c0_183] : memref<9x16x16xbf16, #tpu.memory_space<vmem>>, vector<1x16x16xbf16>
    %255 = vector.shape_cast %254 : vector<1x16x16xbf16> to vector<16x16xbf16>
    %256 = vector.extract_strided_slice %244 {offsets = [0, 256], sizes = [16, 16], strides = [1, 1]} : vector<16x1152xbf16> to vector<16x16xbf16>
    %cst_184 = arith.constant dense<0.000000e+00> : vector<16x16xf32>
    %257 = tpu.matmul %255, %256, %cst_184 {dimension_numbers = #tpu.dot_dimension_numbers<[1], [0], [0], [1], [0, 0, 1, 1], [], []>} : vector<16x16xbf16>, vector<16x16xbf16>, vector<16x16xf32> -> vector<16x16xf32>
    %258 = arith.addf %253, %257 : vector<16x16xf32>
    %c3_185 = arith.constant 3 : index
    %c0_186 = arith.constant 0 : index
    %c0_187 = arith.constant 0 : index
    %259 = vector.load %arg15[%c3_185, %c0_186, %c0_187] : memref<9x16x16xbf16, #tpu.memory_space<vmem>>, vector<1x16x16xbf16>
    %260 = vector.shape_cast %259 : vector<1x16x16xbf16> to vector<16x16xbf16>
    %261 = vector.extract_strided_slice %244 {offsets = [0, 384], sizes = [16, 16], strides = [1, 1]} : vector<16x1152xbf16> to vector<16x16xbf16>
    %cst_188 = arith.constant dense<0.000000e+00> : vector<16x16xf32>
    %262 = tpu.matmul %260, %261, %cst_188 {dimension_numbers = #tpu.dot_dimension_numbers<[1], [0], [0], [1], [0, 0, 1, 1], [], []>} : vector<16x16xbf16>, vector<16x16xbf16>, vector<16x16xf32> -> vector<16x16xf32>
    %263 = arith.addf %258, %262 : vector<16x16xf32>
    %c4_189 = arith.constant 4 : index
    %c0_190 = arith.constant 0 : index
    %c0_191 = arith.constant 0 : index
    %264 = vector.load %arg15[%c4_189, %c0_190, %c0_191] : memref<9x16x16xbf16, #tpu.memory_space<vmem>>, vector<1x16x16xbf16>
    %265 = vector.shape_cast %264 : vector<1x16x16xbf16> to vector<16x16xbf16>
    %266 = vector.extract_strided_slice %244 {offsets = [0, 512], sizes = [16, 16], strides = [1, 1]} : vector<16x1152xbf16> to vector<16x16xbf16>
    %cst_192 = arith.constant dense<0.000000e+00> : vector<16x16xf32>
    %267 = tpu.matmul %265, %266, %cst_192 {dimension_numbers = #tpu.dot_dimension_numbers<[1], [0], [0], [1], [0, 0, 1, 1], [], []>} : vector<16x16xbf16>, vector<16x16xbf16>, vector<16x16xf32> -> vector<16x16xf32>
    %268 = arith.addf %263, %267 : vector<16x16xf32>
    %c5_193 = arith.constant 5 : index
    %c0_194 = arith.constant 0 : index
    %c0_195 = arith.constant 0 : index
    %269 = vector.load %arg15[%c5_193, %c0_194, %c0_195] : memref<9x16x16xbf16, #tpu.memory_space<vmem>>, vector<1x16x16xbf16>
    %270 = vector.shape_cast %269 : vector<1x16x16xbf16> to vector<16x16xbf16>
    %271 = vector.extract_strided_slice %244 {offsets = [0, 640], sizes = [16, 16], strides = [1, 1]} : vector<16x1152xbf16> to vector<16x16xbf16>
    %cst_196 = arith.constant dense<0.000000e+00> : vector<16x16xf32>
    %272 = tpu.matmul %270, %271, %cst_196 {dimension_numbers = #tpu.dot_dimension_numbers<[1], [0], [0], [1], [0, 0, 1, 1], [], []>} : vector<16x16xbf16>, vector<16x16xbf16>, vector<16x16xf32> -> vector<16x16xf32>
    %273 = arith.addf %268, %272 : vector<16x16xf32>
    %c6_197 = arith.constant 6 : index
    %c0_198 = arith.constant 0 : index
    %c0_199 = arith.constant 0 : index
    %274 = vector.load %arg15[%c6_197, %c0_198, %c0_199] : memref<9x16x16xbf16, #tpu.memory_space<vmem>>, vector<1x16x16xbf16>
    %275 = vector.shape_cast %274 : vector<1x16x16xbf16> to vector<16x16xbf16>
    %276 = vector.extract_strided_slice %244 {offsets = [0, 768], sizes = [16, 16], strides = [1, 1]} : vector<16x1152xbf16> to vector<16x16xbf16>
    %cst_200 = arith.constant dense<0.000000e+00> : vector<16x16xf32>
    %277 = tpu.matmul %275, %276, %cst_200 {dimension_numbers = #tpu.dot_dimension_numbers<[1], [0], [0], [1], [0, 0, 1, 1], [], []>} : vector<16x16xbf16>, vector<16x16xbf16>, vector<16x16xf32> -> vector<16x16xf32>
    %278 = arith.addf %273, %277 : vector<16x16xf32>
    %c7_201 = arith.constant 7 : index
    %c0_202 = arith.constant 0 : index
    %c0_203 = arith.constant 0 : index
    %279 = vector.load %arg15[%c7_201, %c0_202, %c0_203] : memref<9x16x16xbf16, #tpu.memory_space<vmem>>, vector<1x16x16xbf16>
    %280 = vector.shape_cast %279 : vector<1x16x16xbf16> to vector<16x16xbf16>
    %281 = vector.extract_strided_slice %244 {offsets = [0, 896], sizes = [16, 16], strides = [1, 1]} : vector<16x1152xbf16> to vector<16x16xbf16>
    %cst_204 = arith.constant dense<0.000000e+00> : vector<16x16xf32>
    %282 = tpu.matmul %280, %281, %cst_204 {dimension_numbers = #tpu.dot_dimension_numbers<[1], [0], [0], [1], [0, 0, 1, 1], [], []>} : vector<16x16xbf16>, vector<16x16xbf16>, vector<16x16xf32> -> vector<16x16xf32>
    %283 = arith.addf %278, %282 : vector<16x16xf32>
    %c8_205 = arith.constant 8 : index
    %c0_206 = arith.constant 0 : index
    %c0_207 = arith.constant 0 : index
    %284 = vector.load %arg15[%c8_205, %c0_206, %c0_207] : memref<9x16x16xbf16, #tpu.memory_space<vmem>>, vector<1x16x16xbf16>
    %285 = vector.shape_cast %284 : vector<1x16x16xbf16> to vector<16x16xbf16>
    %286 = vector.extract_strided_slice %244 {offsets = [0, 1024], sizes = [16, 16], strides = [1, 1]} : vector<16x1152xbf16> to vector<16x16xbf16>
    %cst_208 = arith.constant dense<0.000000e+00> : vector<16x16xf32>
    %287 = tpu.matmul %285, %286, %cst_208 {dimension_numbers = #tpu.dot_dimension_numbers<[1], [0], [0], [1], [0, 0, 1, 1], [], []>} : vector<16x16xbf16>, vector<16x16xbf16>, vector<16x16xf32> -> vector<16x16xf32>
    %288 = arith.addf %283, %287 : vector<16x16xf32>
    %c0_209 = arith.constant 0 : index
    %c0_210 = arith.constant 0 : index
    %289 = vector.load %arg16[%c0_209, %c0_210] : memref<16x1xf32, #tpu.memory_space<vmem>>, vector<16x1xf32>
    %290 = vector.broadcast %289 : vector<16x1xf32> to vector<16x16xf32>
    %291 = arith.addf %288, %290 : vector<16x16xf32>
    %c0_211 = arith.constant 0 : index
    %c0_212 = arith.constant 0 : index
    %292 = vector.load %arg19[%c0_211, %c0_212] : memref<64x16xbf16, #tpu.memory_space<vmem>>, vector<64x16xbf16>
    %cst_213 = arith.constant dense<0.000000e+00> : vector<8x16xf32>
    %293 = tpu.matmul %185, %292, %cst_213 {dimension_numbers = #tpu.dot_dimension_numbers<[1], [0], [0], [1], [0, 0, 1, 1], [], []>} : vector<8x64xbf16>, vector<64x16xbf16>, vector<8x16xf32> -> vector<8x16xf32>
    %294 = arith.truncf %293 : vector<8x16xf32> to vector<8x16xbf16>
    %c0_214 = arith.constant 0 : index
    %c0_215 = arith.constant 0 : index
    %295 = vector.load %arg17[%c0_214, %c0_215] : memref<16x8xbf16, #tpu.memory_space<vmem>>, vector<16x8xbf16>
    %cst_216 = arith.constant dense<0.000000e+00> : vector<16x16xf32>
    %296 = tpu.matmul %295, %294, %cst_216 {dimension_numbers = #tpu.dot_dimension_numbers<[1], [0], [0], [1], [0, 0, 1, 1], [], []>} : vector<16x8xbf16>, vector<8x16xbf16>, vector<16x16xf32> -> vector<16x16xf32>
    %c0_217 = arith.constant 0 : index
    %c0_218 = arith.constant 0 : index
    %297 = vector.load %arg18[%c0_217, %c0_218] : memref<16x1xf32, #tpu.memory_space<vmem>>, vector<16x1xf32>
    %298 = vector.broadcast %297 : vector<16x1xf32> to vector<16x16xf32>
    %299 = arith.addf %296, %298 : vector<16x16xf32>
    %300 = arith.addf %291, %299 : vector<16x16xf32>
    %cst_219 = arith.constant 0.000000e+00 : f32
    %301 = vector.broadcast %cst_219 : f32 to vector<16x16xf32>
    %302 = arith.maximumf %300, %301 : vector<16x16xf32>
    %303 = arith.truncf %302 : vector<16x16xf32> to vector<16x16xbf16>
    %c0_220 = arith.constant 0 : index
    %c0_221 = arith.constant 0 : index
    %c0_222 = arith.constant 0 : index
    %304 = vector.load %arg35[%c0_220, %c0_221, %c0_222] : memref<1x16x16xf32, #tpu.memory_space<vmem>>, vector<1x16x16xf32>
    %305 = vector.shape_cast %304 : vector<1x16x16xf32> to vector<16x16xf32>
    %306 = vector.shape_cast %302 : vector<16x16xf32> to vector<1x16x16xf32>
    tpu.vector_store %arg35[%c0_220, %c0_221, %c0_222], %306 {strides = array<i32>} : memref<1x16x16xf32, #tpu.memory_space<vmem>>, vector<1x16x16xf32>,
    %c0_223 = arith.constant 0 : index
    %c0_224 = arith.constant 0 : index
    %307 = vector.load %arg20[%c0_223, %c0_224] : memref<16x1152xbf16, #tpu.memory_space<vmem>>, vector<16x1152xbf16>
    %cst_225 = arith.constant dense<0.000000e+00> : vector<16x1152xf32>
    %308 = tpu.matmul %303, %307, %cst_225 {dimension_numbers = #tpu.dot_dimension_numbers<[1], [0], [0], [1], [0, 0, 1, 1], [], []>} : vector<16x16xbf16>, vector<16x1152xbf16>, vector<16x1152xf32> -> vector<16x1152xf32>
    %309 = arith.truncf %308 : vector<16x1152xf32> to vector<16x1152xbf16>
    %c0_226 = arith.constant 0 : index
    %c0_227 = arith.constant 0 : index
    %c0_228 = arith.constant 0 : index
    %310 = vector.load %arg22[%c0_226, %c0_227, %c0_228] : memref<9x32x16xbf16, #tpu.memory_space<vmem>>, vector<1x32x16xbf16>
    %311 = vector.shape_cast %310 : vector<1x32x16xbf16> to vector<32x16xbf16>
    %312 = vector.extract_strided_slice %309 {offsets = [0, 0], sizes = [16, 4], strides = [1, 1]} : vector<16x1152xbf16> to vector<16x4xbf16>
    %cst_229 = arith.constant dense<0.000000e+00> : vector<32x4xf32>
    %313 = tpu.matmul %311, %312, %cst_229 {dimension_numbers = #tpu.dot_dimension_numbers<[1], [0], [0], [1], [0, 0, 1, 1], [], []>} : vector<32x16xbf16>, vector<16x4xbf16>, vector<32x4xf32> -> vector<32x4xf32>
    %c1_230 = arith.constant 1 : index
    %c0_231 = arith.constant 0 : index
    %c0_232 = arith.constant 0 : index
    %314 = vector.load %arg22[%c1_230, %c0_231, %c0_232] : memref<9x32x16xbf16, #tpu.memory_space<vmem>>, vector<1x32x16xbf16>
    %315 = vector.shape_cast %314 : vector<1x32x16xbf16> to vector<32x16xbf16>
    %316 = vector.extract_strided_slice %309 {offsets = [0, 128], sizes = [16, 4], strides = [1, 1]} : vector<16x1152xbf16> to vector<16x4xbf16>
    %cst_233 = arith.constant dense<0.000000e+00> : vector<32x4xf32>
    %317 = tpu.matmul %315, %316, %cst_233 {dimension_numbers = #tpu.dot_dimension_numbers<[1], [0], [0], [1], [0, 0, 1, 1], [], []>} : vector<32x16xbf16>, vector<16x4xbf16>, vector<32x4xf32> -> vector<32x4xf32>
    %318 = arith.addf %313, %317 : vector<32x4xf32>
    %c2_234 = arith.constant 2 : index
    %c0_235 = arith.constant 0 : index
    %c0_236 = arith.constant 0 : index
    %319 = vector.load %arg22[%c2_234, %c0_235, %c0_236] : memref<9x32x16xbf16, #tpu.memory_space<vmem>>, vector<1x32x16xbf16>
    %320 = vector.shape_cast %319 : vector<1x32x16xbf16> to vector<32x16xbf16>
    %321 = vector.extract_strided_slice %309 {offsets = [0, 256], sizes = [16, 4], strides = [1, 1]} : vector<16x1152xbf16> to vector<16x4xbf16>
    %cst_237 = arith.constant dense<0.000000e+00> : vector<32x4xf32>
    %322 = tpu.matmul %320, %321, %cst_237 {dimension_numbers = #tpu.dot_dimension_numbers<[1], [0], [0], [1], [0, 0, 1, 1], [], []>} : vector<32x16xbf16>, vector<16x4xbf16>, vector<32x4xf32> -> vector<32x4xf32>
    %323 = arith.addf %318, %322 : vector<32x4xf32>
    %c3_238 = arith.constant 3 : index
    %c0_239 = arith.constant 0 : index
    %c0_240 = arith.constant 0 : index
    %324 = vector.load %arg22[%c3_238, %c0_239, %c0_240] : memref<9x32x16xbf16, #tpu.memory_space<vmem>>, vector<1x32x16xbf16>
    %325 = vector.shape_cast %324 : vector<1x32x16xbf16> to vector<32x16xbf16>
    %326 = vector.extract_strided_slice %309 {offsets = [0, 384], sizes = [16, 4], strides = [1, 1]} : vector<16x1152xbf16> to vector<16x4xbf16>
    %cst_241 = arith.constant dense<0.000000e+00> : vector<32x4xf32>
    %327 = tpu.matmul %325, %326, %cst_241 {dimension_numbers = #tpu.dot_dimension_numbers<[1], [0], [0], [1], [0, 0, 1, 1], [], []>} : vector<32x16xbf16>, vector<16x4xbf16>, vector<32x4xf32> -> vector<32x4xf32>
    %328 = arith.addf %323, %327 : vector<32x4xf32>
    %c4_242 = arith.constant 4 : index
    %c0_243 = arith.constant 0 : index
    %c0_244 = arith.constant 0 : index
    %329 = vector.load %arg22[%c4_242, %c0_243, %c0_244] : memref<9x32x16xbf16, #tpu.memory_space<vmem>>, vector<1x32x16xbf16>
    %330 = vector.shape_cast %329 : vector<1x32x16xbf16> to vector<32x16xbf16>
    %331 = vector.extract_strided_slice %309 {offsets = [0, 512], sizes = [16, 4], strides = [1, 1]} : vector<16x1152xbf16> to vector<16x4xbf16>
    %cst_245 = arith.constant dense<0.000000e+00> : vector<32x4xf32>
    %332 = tpu.matmul %330, %331, %cst_245 {dimension_numbers = #tpu.dot_dimension_numbers<[1], [0], [0], [1], [0, 0, 1, 1], [], []>} : vector<32x16xbf16>, vector<16x4xbf16>, vector<32x4xf32> -> vector<32x4xf32>
    %333 = arith.addf %328, %332 : vector<32x4xf32>
    %c5_246 = arith.constant 5 : index
    %c0_247 = arith.constant 0 : index
    %c0_248 = arith.constant 0 : index
    %334 = vector.load %arg22[%c5_246, %c0_247, %c0_248] : memref<9x32x16xbf16, #tpu.memory_space<vmem>>, vector<1x32x16xbf16>
    %335 = vector.shape_cast %334 : vector<1x32x16xbf16> to vector<32x16xbf16>
    %336 = vector.extract_strided_slice %309 {offsets = [0, 640], sizes = [16, 4], strides = [1, 1]} : vector<16x1152xbf16> to vector<16x4xbf16>
    %cst_249 = arith.constant dense<0.000000e+00> : vector<32x4xf32>
    %337 = tpu.matmul %335, %336, %cst_249 {dimension_numbers = #tpu.dot_dimension_numbers<[1], [0], [0], [1], [0, 0, 1, 1], [], []>} : vector<32x16xbf16>, vector<16x4xbf16>, vector<32x4xf32> -> vector<32x4xf32>
    %338 = arith.addf %333, %337 : vector<32x4xf32>
    %c6_250 = arith.constant 6 : index
    %c0_251 = arith.constant 0 : index
    %c0_252 = arith.constant 0 : index
    %339 = vector.load %arg22[%c6_250, %c0_251, %c0_252] : memref<9x32x16xbf16, #tpu.memory_space<vmem>>, vector<1x32x16xbf16>
    %340 = vector.shape_cast %339 : vector<1x32x16xbf16> to vector<32x16xbf16>
    %341 = vector.extract_strided_slice %309 {offsets = [0, 768], sizes = [16, 4], strides = [1, 1]} : vector<16x1152xbf16> to vector<16x4xbf16>
    %cst_253 = arith.constant dense<0.000000e+00> : vector<32x4xf32>
    %342 = tpu.matmul %340, %341, %cst_253 {dimension_numbers = #tpu.dot_dimension_numbers<[1], [0], [0], [1], [0, 0, 1, 1], [], []>} : vector<32x16xbf16>, vector<16x4xbf16>, vector<32x4xf32> -> vector<32x4xf32>
    %343 = arith.addf %338, %342 : vector<32x4xf32>
    %c7_254 = arith.constant 7 : index
    %c0_255 = arith.constant 0 : index
    %c0_256 = arith.constant 0 : index
    %344 = vector.load %arg22[%c7_254, %c0_255, %c0_256] : memref<9x32x16xbf16, #tpu.memory_space<vmem>>, vector<1x32x16xbf16>
    %345 = vector.shape_cast %344 : vector<1x32x16xbf16> to vector<32x16xbf16>
    %346 = vector.extract_strided_slice %309 {offsets = [0, 896], sizes = [16, 4], strides = [1, 1]} : vector<16x1152xbf16> to vector<16x4xbf16>
    %cst_257 = arith.constant dense<0.000000e+00> : vector<32x4xf32>
    %347 = tpu.matmul %345, %346, %cst_257 {dimension_numbers = #tpu.dot_dimension_numbers<[1], [0], [0], [1], [0, 0, 1, 1], [], []>} : vector<32x16xbf16>, vector<16x4xbf16>, vector<32x4xf32> -> vector<32x4xf32>
    %348 = arith.addf %343, %347 : vector<32x4xf32>
    %c8_258 = arith.constant 8 : index
    %c0_259 = arith.constant 0 : index
    %c0_260 = arith.constant 0 : index
    %349 = vector.load %arg22[%c8_258, %c0_259, %c0_260] : memref<9x32x16xbf16, #tpu.memory_space<vmem>>, vector<1x32x16xbf16>
    %350 = vector.shape_cast %349 : vector<1x32x16xbf16> to vector<32x16xbf16>
    %351 = vector.extract_strided_slice %309 {offsets = [0, 1024], sizes = [16, 4], strides = [1, 1]} : vector<16x1152xbf16> to vector<16x4xbf16>
    %cst_261 = arith.constant dense<0.000000e+00> : vector<32x4xf32>
    %352 = tpu.matmul %350, %351, %cst_261 {dimension_numbers = #tpu.dot_dimension_numbers<[1], [0], [0], [1], [0, 0, 1, 1], [], []>} : vector<32x16xbf16>, vector<16x4xbf16>, vector<32x4xf32> -> vector<32x4xf32>
    %353 = arith.addf %348, %352 : vector<32x4xf32>
    %c0_262 = arith.constant 0 : index
    %c0_263 = arith.constant 0 : index
    %354 = vector.load %arg23[%c0_262, %c0_263] : memref<32x1xf32, #tpu.memory_space<vmem>>, vector<32x1xf32>
    %355 = vector.broadcast %354 : vector<32x1xf32> to vector<32x4xf32>
    %356 = arith.addf %353, %355 : vector<32x4xf32>
    %cst_264 = arith.constant 0.000000e+00 : f32
    %357 = vector.broadcast %cst_264 : f32 to vector<32x4xf32>
    %358 = arith.maximumf %356, %357 : vector<32x4xf32>
    %359 = arith.truncf %358 : vector<32x4xf32> to vector<32x4xbf16>
    %c0_265 = arith.constant 0 : index
    %c0_266 = arith.constant 0 : index
    %360 = vector.load %arg21[%c0_265, %c0_266] : memref<4x1152xbf16, #tpu.memory_space<vmem>>, vector<4x1152xbf16>
    %cst_267 = arith.constant dense<0.000000e+00> : vector<32x1152xf32>
    %361 = tpu.matmul %359, %360, %cst_267 {dimension_numbers = #tpu.dot_dimension_numbers<[1], [0], [0], [1], [0, 0, 1, 1], [], []>} : vector<32x4xbf16>, vector<4x1152xbf16>, vector<32x1152xf32> -> vector<32x1152xf32>
    %362 = arith.truncf %361 : vector<32x1152xf32> to vector<32x1152xbf16>
    %c0_268 = arith.constant 0 : index
    %c0_269 = arith.constant 0 : index
    %c0_270 = arith.constant 0 : index
    %363 = vector.load %arg24[%c0_268, %c0_269, %c0_270] : memref<9x32x32xbf16, #tpu.memory_space<vmem>>, vector<1x32x32xbf16>
    %364 = vector.shape_cast %363 : vector<1x32x32xbf16> to vector<32x32xbf16>
    %365 = vector.extract_strided_slice %362 {offsets = [0, 0], sizes = [32, 4], strides = [1, 1]} : vector<32x1152xbf16> to vector<32x4xbf16>
    %cst_271 = arith.constant dense<0.000000e+00> : vector<32x4xf32>
    %366 = tpu.matmul %364, %365, %cst_271 {dimension_numbers = #tpu.dot_dimension_numbers<[1], [0], [0], [1], [0, 0, 1, 1], [], []>} : vector<32x32xbf16>, vector<32x4xbf16>, vector<32x4xf32> -> vector<32x4xf32>
    %c1_272 = arith.constant 1 : index
    %c0_273 = arith.constant 0 : index
    %c0_274 = arith.constant 0 : index
    %367 = vector.load %arg24[%c1_272, %c0_273, %c0_274] : memref<9x32x32xbf16, #tpu.memory_space<vmem>>, vector<1x32x32xbf16>
    %368 = vector.shape_cast %367 : vector<1x32x32xbf16> to vector<32x32xbf16>
    %369 = vector.extract_strided_slice %362 {offsets = [0, 128], sizes = [32, 4], strides = [1, 1]} : vector<32x1152xbf16> to vector<32x4xbf16>
    %cst_275 = arith.constant dense<0.000000e+00> : vector<32x4xf32>
    %370 = tpu.matmul %368, %369, %cst_275 {dimension_numbers = #tpu.dot_dimension_numbers<[1], [0], [0], [1], [0, 0, 1, 1], [], []>} : vector<32x32xbf16>, vector<32x4xbf16>, vector<32x4xf32> -> vector<32x4xf32>
    %371 = arith.addf %366, %370 : vector<32x4xf32>
    %c2_276 = arith.constant 2 : index
    %c0_277 = arith.constant 0 : index
    %c0_278 = arith.constant 0 : index
    %372 = vector.load %arg24[%c2_276, %c0_277, %c0_278] : memref<9x32x32xbf16, #tpu.memory_space<vmem>>, vector<1x32x32xbf16>
    %373 = vector.shape_cast %372 : vector<1x32x32xbf16> to vector<32x32xbf16>
    %374 = vector.extract_strided_slice %362 {offsets = [0, 256], sizes = [32, 4], strides = [1, 1]} : vector<32x1152xbf16> to vector<32x4xbf16>
    %cst_279 = arith.constant dense<0.000000e+00> : vector<32x4xf32>
    %375 = tpu.matmul %373, %374, %cst_279 {dimension_numbers = #tpu.dot_dimension_numbers<[1], [0], [0], [1], [0, 0, 1, 1], [], []>} : vector<32x32xbf16>, vector<32x4xbf16>, vector<32x4xf32> -> vector<32x4xf32>
    %376 = arith.addf %371, %375 : vector<32x4xf32>
    %c3_280 = arith.constant 3 : index
    %c0_281 = arith.constant 0 : index
    %c0_282 = arith.constant 0 : index
    %377 = vector.load %arg24[%c3_280, %c0_281, %c0_282] : memref<9x32x32xbf16, #tpu.memory_space<vmem>>, vector<1x32x32xbf16>
    %378 = vector.shape_cast %377 : vector<1x32x32xbf16> to vector<32x32xbf16>
    %379 = vector.extract_strided_slice %362 {offsets = [0, 384], sizes = [32, 4], strides = [1, 1]} : vector<32x1152xbf16> to vector<32x4xbf16>
    %cst_283 = arith.constant dense<0.000000e+00> : vector<32x4xf32>
    %380 = tpu.matmul %378, %379, %cst_283 {dimension_numbers = #tpu.dot_dimension_numbers<[1], [0], [0], [1], [0, 0, 1, 1], [], []>} : vector<32x32xbf16>, vector<32x4xbf16>, vector<32x4xf32> -> vector<32x4xf32>
    %381 = arith.addf %376, %380 : vector<32x4xf32>
    %c4_284 = arith.constant 4 : index
    %c0_285 = arith.constant 0 : index
    %c0_286 = arith.constant 0 : index
    %382 = vector.load %arg24[%c4_284, %c0_285, %c0_286] : memref<9x32x32xbf16, #tpu.memory_space<vmem>>, vector<1x32x32xbf16>
    %383 = vector.shape_cast %382 : vector<1x32x32xbf16> to vector<32x32xbf16>
    %384 = vector.extract_strided_slice %362 {offsets = [0, 512], sizes = [32, 4], strides = [1, 1]} : vector<32x1152xbf16> to vector<32x4xbf16>
    %cst_287 = arith.constant dense<0.000000e+00> : vector<32x4xf32>
    %385 = tpu.matmul %383, %384, %cst_287 {dimension_numbers = #tpu.dot_dimension_numbers<[1], [0], [0], [1], [0, 0, 1, 1], [], []>} : vector<32x32xbf16>, vector<32x4xbf16>, vector<32x4xf32> -> vector<32x4xf32>
    %386 = arith.addf %381, %385 : vector<32x4xf32>
    %c5_288 = arith.constant 5 : index
    %c0_289 = arith.constant 0 : index
    %c0_290 = arith.constant 0 : index
    %387 = vector.load %arg24[%c5_288, %c0_289, %c0_290] : memref<9x32x32xbf16, #tpu.memory_space<vmem>>, vector<1x32x32xbf16>
    %388 = vector.shape_cast %387 : vector<1x32x32xbf16> to vector<32x32xbf16>
    %389 = vector.extract_strided_slice %362 {offsets = [0, 640], sizes = [32, 4], strides = [1, 1]} : vector<32x1152xbf16> to vector<32x4xbf16>
    %cst_291 = arith.constant dense<0.000000e+00> : vector<32x4xf32>
    %390 = tpu.matmul %388, %389, %cst_291 {dimension_numbers = #tpu.dot_dimension_numbers<[1], [0], [0], [1], [0, 0, 1, 1], [], []>} : vector<32x32xbf16>, vector<32x4xbf16>, vector<32x4xf32> -> vector<32x4xf32>
    %391 = arith.addf %386, %390 : vector<32x4xf32>
    %c6_292 = arith.constant 6 : index
    %c0_293 = arith.constant 0 : index
    %c0_294 = arith.constant 0 : index
    %392 = vector.load %arg24[%c6_292, %c0_293, %c0_294] : memref<9x32x32xbf16, #tpu.memory_space<vmem>>, vector<1x32x32xbf16>
    %393 = vector.shape_cast %392 : vector<1x32x32xbf16> to vector<32x32xbf16>
    %394 = vector.extract_strided_slice %362 {offsets = [0, 768], sizes = [32, 4], strides = [1, 1]} : vector<32x1152xbf16> to vector<32x4xbf16>
    %cst_295 = arith.constant dense<0.000000e+00> : vector<32x4xf32>
    %395 = tpu.matmul %393, %394, %cst_295 {dimension_numbers = #tpu.dot_dimension_numbers<[1], [0], [0], [1], [0, 0, 1, 1], [], []>} : vector<32x32xbf16>, vector<32x4xbf16>, vector<32x4xf32> -> vector<32x4xf32>
    %396 = arith.addf %391, %395 : vector<32x4xf32>
    %c7_296 = arith.constant 7 : index
    %c0_297 = arith.constant 0 : index
    %c0_298 = arith.constant 0 : index
    %397 = vector.load %arg24[%c7_296, %c0_297, %c0_298] : memref<9x32x32xbf16, #tpu.memory_space<vmem>>, vector<1x32x32xbf16>
    %398 = vector.shape_cast %397 : vector<1x32x32xbf16> to vector<32x32xbf16>
    %399 = vector.extract_strided_slice %362 {offsets = [0, 896], sizes = [32, 4], strides = [1, 1]} : vector<32x1152xbf16> to vector<32x4xbf16>
    %cst_299 = arith.constant dense<0.000000e+00> : vector<32x4xf32>
    %400 = tpu.matmul %398, %399, %cst_299 {dimension_numbers = #tpu.dot_dimension_numbers<[1], [0], [0], [1], [0, 0, 1, 1], [], []>} : vector<32x32xbf16>, vector<32x4xbf16>, vector<32x4xf32> -> vector<32x4xf32>
    %401 = arith.addf %396, %400 : vector<32x4xf32>
    %c8_300 = arith.constant 8 : index
    %c0_301 = arith.constant 0 : index
    %c0_302 = arith.constant 0 : index
    %402 = vector.load %arg24[%c8_300, %c0_301, %c0_302] : memref<9x32x32xbf16, #tpu.memory_space<vmem>>, vector<1x32x32xbf16>
    %403 = vector.shape_cast %402 : vector<1x32x32xbf16> to vector<32x32xbf16>
    %404 = vector.extract_strided_slice %362 {offsets = [0, 1024], sizes = [32, 4], strides = [1, 1]} : vector<32x1152xbf16> to vector<32x4xbf16>
    %cst_303 = arith.constant dense<0.000000e+00> : vector<32x4xf32>
    %405 = tpu.matmul %403, %404, %cst_303 {dimension_numbers = #tpu.dot_dimension_numbers<[1], [0], [0], [1], [0, 0, 1, 1], [], []>} : vector<32x32xbf16>, vector<32x4xbf16>, vector<32x4xf32> -> vector<32x4xf32>
    %406 = arith.addf %401, %405 : vector<32x4xf32>
    %c0_304 = arith.constant 0 : index
    %c0_305 = arith.constant 0 : index
    %407 = vector.load %arg25[%c0_304, %c0_305] : memref<32x1xf32, #tpu.memory_space<vmem>>, vector<32x1xf32>
    %408 = vector.broadcast %407 : vector<32x1xf32> to vector<32x4xf32>
    %409 = arith.addf %406, %408 : vector<32x4xf32>
    %c0_306 = arith.constant 0 : index
    %c0_307 = arith.constant 0 : index
    %410 = vector.load %arg28[%c0_306, %c0_307] : memref<16x4xbf16, #tpu.memory_space<vmem>>, vector<16x4xbf16>
    %cst_308 = arith.constant dense<0.000000e+00> : vector<16x4xf32>
    %411 = tpu.matmul %303, %410, %cst_308 {dimension_numbers = #tpu.dot_dimension_numbers<[1], [0], [0], [1], [0, 0, 1, 1], [], []>} : vector<16x16xbf16>, vector<16x4xbf16>, vector<16x4xf32> -> vector<16x4xf32>
    %412 = arith.truncf %411 : vector<16x4xf32> to vector<16x4xbf16>
    %c0_309 = arith.constant 0 : index
    %c0_310 = arith.constant 0 : index
    %413 = vector.load %arg26[%c0_309, %c0_310] : memref<32x16xbf16, #tpu.memory_space<vmem>>, vector<32x16xbf16>
    %cst_311 = arith.constant dense<0.000000e+00> : vector<32x4xf32>
    %414 = tpu.matmul %413, %412, %cst_311 {dimension_numbers = #tpu.dot_dimension_numbers<[1], [0], [0], [1], [0, 0, 1, 1], [], []>} : vector<32x16xbf16>, vector<16x4xbf16>, vector<32x4xf32> -> vector<32x4xf32>
    %c0_312 = arith.constant 0 : index
    %c0_313 = arith.constant 0 : index
    %415 = vector.load %arg27[%c0_312, %c0_313] : memref<32x1xf32, #tpu.memory_space<vmem>>, vector<32x1xf32>
    %416 = vector.broadcast %415 : vector<32x1xf32> to vector<32x4xf32>
    %417 = arith.addf %414, %416 : vector<32x4xf32>
    %418 = arith.addf %409, %417 : vector<32x4xf32>
    %cst_314 = arith.constant 0.000000e+00 : f32
    %419 = vector.broadcast %cst_314 : f32 to vector<32x4xf32>
    %420 = arith.maximumf %418, %419 : vector<32x4xf32>
    %c0_315 = arith.constant 0 : index
    %c0_316 = arith.constant 0 : index
    %c0_317 = arith.constant 0 : index
    %421 = vector.load %arg36[%c0_315, %c0_316, %c0_317] : memref<1x32x4xf32, #tpu.memory_space<vmem>>, vector<1x32x4xf32>
    %422 = vector.shape_cast %421 : vector<1x32x4xf32> to vector<32x4xf32>
    %423 = vector.shape_cast %420 : vector<32x4xf32> to vector<1x32x4xf32>
    tpu.vector_store %arg36[%c0_315, %c0_316, %c0_317], %423 {strides = array<i32>} : memref<1x32x4xf32, #tpu.memory_space<vmem>>, vector<1x32x4xf32>,
    %cst_318 = arith.constant dense<0.000000e+00> : vector<32xf32>
    %424 = vector.multi_reduction <add>, %420, %cst_318 [1] : vector<32x4xf32> to vector<32xf32>
    %425 = vector.shape_cast %424 : vector<32xf32> to vector<32x1xf32>
    %cst_319 = arith.constant 2.500000e-01 : f32
    %426 = vector.broadcast %cst_319 : f32 to vector<32x1xf32>
    %427 = arith.mulf %425, %426 : vector<32x1xf32>
    %c0_320 = arith.constant 0 : index
    %c0_321 = arith.constant 0 : index
    %428 = vector.load %arg29[%c0_320, %c0_321] : memref<10x32xf32, #tpu.memory_space<vmem>>, vector<10x32xf32>
    %cst_322 = arith.constant dense<0.000000e+00> : vector<10x1xf32>
    %429 = tpu.matmul %428, %427, %cst_322 {dimension_numbers = #tpu.dot_dimension_numbers<[1], [0], [0], [1], [0, 0, 1, 1], [], []>} : vector<10x32xf32>, vector<32x1xf32>, vector<10x1xf32> -> vector<10x1xf32>
    %c0_323 = arith.constant 0 : index
    %c0_324 = arith.constant 0 : index
    %430 = vector.load %arg30[%c0_323, %c0_324] : memref<10x1xf32, #tpu.memory_space<vmem>>, vector<10x1xf32>
    %431 = arith.addf %429, %430 : vector<10x1xf32>
    %432 = arith.mulf %431, %431 : vector<10x1xf32>
    %433 = vector.shape_cast %432 : vector<10x1xf32> to vector<1x10x1xf32>
    %cst_325 = arith.constant dense<0.000000e+00> : vector<1xf32>
    %434 = vector.multi_reduction <add>, %433, %cst_325 [1, 2] : vector<1x10x1xf32> to vector<1xf32>
    %435 = vector.shape_cast %434 : vector<1xf32> to vector<1x1x1xf32>
    %436 = vector.extract %435[0, 0, 0] : f32 from vector<1x1x1xf32>
    %cst_326 = arith.constant 1.000000e-24 : f32
    %437 = arith.maximumf %436, %cst_326 : f32
    %438 = math.rsqrt %437 : f32
    %439 = vector.broadcast %438 : f32 to vector<10x1xf32>
    %440 = arith.mulf %431, %439 : vector<10x1xf32>
    %c0_327 = arith.constant 0 : index
    %c0_328 = arith.constant 0 : index
    %441 = vector.load %arg31[%c0_327, %c0_328] : memref<2x10xf32, #tpu.memory_space<vmem>>, vector<2x10xf32>
    %cst_329 = arith.constant dense<0.000000e+00> : vector<2x1xf32>
    %442 = tpu.matmul %441, %431, %cst_329 {dimension_numbers = #tpu.dot_dimension_numbers<[1], [0], [0], [1], [0, 0, 1, 1], [], []>} : vector<2x10xf32>, vector<10x1xf32>, vector<2x1xf32> -> vector<2x1xf32>
    %c0_330 = arith.constant 0 : index
    %c0_331 = arith.constant 0 : index
    %443 = vector.load %arg32[%c0_330, %c0_331] : memref<2x1xf32, #tpu.memory_space<vmem>>, vector<2x1xf32>
    %444 = arith.addf %442, %443 : vector<2x1xf32>
    %c0_332 = arith.constant 0 : index
    %c0_333 = arith.constant 0 : index
    %c0_334 = arith.constant 0 : index
    %445 = vector.load %arg37[%c0_332, %c0_333, %c0_334] : memref<1x32x1xf32, #tpu.memory_space<vmem>>, vector<1x32x1xf32>
    %446 = vector.shape_cast %445 : vector<1x32x1xf32> to vector<32x1xf32>
    %447 = vector.shape_cast %427 : vector<32x1xf32> to vector<1x32x1xf32>
    tpu.vector_store %arg37[%c0_332, %c0_333, %c0_334], %447 {strides = array<i32>} : memref<1x32x1xf32, #tpu.memory_space<vmem>>, vector<1x32x1xf32>,
    %c0_335 = arith.constant 0 : index
    %c0_336 = arith.constant 0 : index
    %c0_337 = arith.constant 0 : index
    %448 = vector.load %arg38[%c0_335, %c0_336, %c0_337] : memref<1x10x1xf32, #tpu.memory_space<vmem>>, vector<1x10x1xf32>
    %449 = vector.shape_cast %448 : vector<1x10x1xf32> to vector<10x1xf32>
    %450 = vector.shape_cast %431 : vector<10x1xf32> to vector<1x10x1xf32>
    tpu.vector_store %arg38[%c0_335, %c0_336, %c0_337], %450 {strides = array<i32>} : memref<1x10x1xf32, #tpu.memory_space<vmem>>, vector<1x10x1xf32>,
    %c0_338 = arith.constant 0 : index
    %c0_339 = arith.constant 0 : index
    %c0_340 = arith.constant 0 : index
    %451 = vector.load %arg39[%c0_338, %c0_339, %c0_340] : memref<1x10x1xf32, #tpu.memory_space<vmem>>, vector<1x10x1xf32>
    %452 = vector.shape_cast %451 : vector<1x10x1xf32> to vector<10x1xf32>
    %453 = vector.shape_cast %440 : vector<10x1xf32> to vector<1x10x1xf32>
    tpu.vector_store %arg39[%c0_338, %c0_339, %c0_340], %453 {strides = array<i32>} : memref<1x10x1xf32, #tpu.memory_space<vmem>>, vector<1x10x1xf32>,
    %c0_341 = arith.constant 0 : index
    %c0_342 = arith.constant 0 : index
    %c0_343 = arith.constant 0 : index
    %454 = vector.load %arg40[%c0_341, %c0_342, %c0_343] : memref<1x2x1xf32, #tpu.memory_space<vmem>>, vector<1x2x1xf32>
    %455 = vector.shape_cast %454 : vector<1x2x1xf32> to vector<2x1xf32>
    %456 = vector.shape_cast %444 : vector<2x1xf32> to vector<1x2x1xf32>
    tpu.vector_store %arg40[%c0_341, %c0_342, %c0_343], %456 {strides = array<i32>} : memref<1x2x1xf32, #tpu.memory_space<vmem>>, vector<1x2x1xf32>,
    return
  }
  func.func @transform_0(%arg0: i32) -> (i32, i32, i32) {
    %c0_i32 = arith.constant 0 : i32
    %c0_i32_0 = arith.constant 0 : i32
    %c0_i32_1 = arith.constant 0 : i32
    return %arg0, %c0_i32, %c0_i32_0 : i32, i32, i32
  }
  func.func @transform_1(%arg0: i32) -> (i32, i32) {
    %c0_i32 = arith.constant 0 : i32
    %c0_i32_0 = arith.constant 0 : i32
    %c0_i32_1 = arith.constant 0 : i32
    return %c0_i32, %c0_i32_0 : i32, i32
  }
  func.func @transform_2(%arg0: i32) -> (i32, i32, i32) {
    %c0_i32 = arith.constant 0 : i32
    %c0_i32_0 = arith.constant 0 : i32
    %c0_i32_1 = arith.constant 0 : i32
    %c0_i32_2 = arith.constant 0 : i32
    return %c0_i32, %c0_i32_0, %c0_i32_1 : i32, i32, i32
  }
  func.func @transform_3(%arg0: i32) -> (i32, i32) {
    %c0_i32 = arith.constant 0 : i32
    %c0_i32_0 = arith.constant 0 : i32
    %c0_i32_1 = arith.constant 0 : i32
    return %c0_i32, %c0_i32_0 : i32, i32
  }
  func.func @transform_4(%arg0: i32) -> (i32, i32) {
    %c0_i32 = arith.constant 0 : i32
    %c0_i32_0 = arith.constant 0 : i32
    %c0_i32_1 = arith.constant 0 : i32
    return %c0_i32, %c0_i32_0 : i32, i32
  }
  func.func @transform_5(%arg0: i32) -> (i32, i32) {
    %c0_i32 = arith.constant 0 : i32
    %c0_i32_0 = arith.constant 0 : i32
    %c0_i32_1 = arith.constant 0 : i32
    return %c0_i32, %c0_i32_0 : i32, i32
  }
  func.func @transform_6(%arg0: i32) -> (i32, i32, i32) {
    %c0_i32 = arith.constant 0 : i32
    %c0_i32_0 = arith.constant 0 : i32
    %c0_i32_1 = arith.constant 0 : i32
    %c0_i32_2 = arith.constant 0 : i32
    return %c0_i32, %c0_i32_0, %c0_i32_1 : i32, i32, i32
  }
  func.func @transform_7(%arg0: i32) -> (i32, i32) {
    %c0_i32 = arith.constant 0 : i32
    %c0_i32_0 = arith.constant 0 : i32
    %c0_i32_1 = arith.constant 0 : i32
    return %c0_i32, %c0_i32_0 : i32, i32
  }
  func.func @transform_8(%arg0: i32) -> (i32, i32, i32) {
    %c0_i32 = arith.constant 0 : i32
    %c0_i32_0 = arith.constant 0 : i32
    %c0_i32_1 = arith.constant 0 : i32
    %c0_i32_2 = arith.constant 0 : i32
    return %c0_i32, %c0_i32_0, %c0_i32_1 : i32, i32, i32
  }
  func.func @transform_9(%arg0: i32) -> (i32, i32) {
    %c0_i32 = arith.constant 0 : i32
    %c0_i32_0 = arith.constant 0 : i32
    %c0_i32_1 = arith.constant 0 : i32
    return %c0_i32, %c0_i32_0 : i32, i32
  }
  func.func @transform_10(%arg0: i32) -> (i32, i32) {
    %c0_i32 = arith.constant 0 : i32
    %c0_i32_0 = arith.constant 0 : i32
    %c0_i32_1 = arith.constant 0 : i32
    return %c0_i32, %c0_i32_0 : i32, i32
  }
  func.func @transform_11(%arg0: i32) -> (i32, i32) {
    %c0_i32 = arith.constant 0 : i32
    %c0_i32_0 = arith.constant 0 : i32
    %c0_i32_1 = arith.constant 0 : i32
    return %c0_i32, %c0_i32_0 : i32, i32
  }
  func.func @transform_12(%arg0: i32) -> (i32, i32, i32) {
    %c0_i32 = arith.constant 0 : i32
    %c0_i32_0 = arith.constant 0 : i32
    %c0_i32_1 = arith.constant 0 : i32
    %c0_i32_2 = arith.constant 0 : i32
    return %c0_i32, %c0_i32_0, %c0_i32_1 : i32, i32, i32
  }
  func.func @transform_13(%arg0: i32) -> (i32, i32) {
    %c0_i32 = arith.constant 0 : i32
    %c0_i32_0 = arith.constant 0 : i32
    %c0_i32_1 = arith.constant 0 : i32
    return %c0_i32, %c0_i32_0 : i32, i32
  }
  func.func @transform_14(%arg0: i32) -> (i32, i32, i32) {
    %c0_i32 = arith.constant 0 : i32
    %c0_i32_0 = arith.constant 0 : i32
    %c0_i32_1 = arith.constant 0 : i32
    %c0_i32_2 = arith.constant 0 : i32
    return %c0_i32, %c0_i32_0, %c0_i32_1 : i32, i32, i32
  }
  func.func @transform_15(%arg0: i32) -> (i32, i32) {
    %c0_i32 = arith.constant 0 : i32
    %c0_i32_0 = arith.constant 0 : i32
    %c0_i32_1 = arith.constant 0 : i32
    return %c0_i32, %c0_i32_0 : i32, i32
  }
  func.func @transform_16(%arg0: i32) -> (i32, i32) {
    %c0_i32 = arith.constant 0 : i32
    %c0_i32_0 = arith.constant 0 : i32
    %c0_i32_1 = arith.constant 0 : i32
    return %c0_i32, %c0_i32_0 : i32, i32
  }
  func.func @transform_17(%arg0: i32) -> (i32, i32) {
    %c0_i32 = arith.constant 0 : i32
    %c0_i32_0 = arith.constant 0 : i32
    %c0_i32_1 = arith.constant 0 : i32
    return %c0_i32, %c0_i32_0 : i32, i32
  }
  func.func @transform_18(%arg0: i32) -> (i32, i32) {
    %c0_i32 = arith.constant 0 : i32
    %c0_i32_0 = arith.constant 0 : i32
    %c0_i32_1 = arith.constant 0 : i32
    return %c0_i32, %c0_i32_0 : i32, i32
  }
  func.func @transform_19(%arg0: i32) -> (i32, i32) {
    %c0_i32 = arith.constant 0 : i32
    %c0_i32_0 = arith.constant 0 : i32
    %c0_i32_1 = arith.constant 0 : i32
    return %c0_i32, %c0_i32_0 : i32, i32
  }
  func.func @transform_20(%arg0: i32) -> (i32, i32) {
    %c0_i32 = arith.constant 0 : i32
    %c0_i32_0 = arith.constant 0 : i32
    %c0_i32_1 = arith.constant 0 : i32
    return %c0_i32, %c0_i32_0 : i32, i32
  }
  func.func @transform_21(%arg0: i32) -> (i32, i32, i32) {
    %c0_i32 = arith.constant 0 : i32
    %c0_i32_0 = arith.constant 0 : i32
    %c0_i32_1 = arith.constant 0 : i32
    %c0_i32_2 = arith.constant 0 : i32
    return %c0_i32, %c0_i32_0, %c0_i32_1 : i32, i32, i32
  }
  func.func @transform_22(%arg0: i32) -> (i32, i32) {
    %c0_i32 = arith.constant 0 : i32
    %c0_i32_0 = arith.constant 0 : i32
    %c0_i32_1 = arith.constant 0 : i32
    return %c0_i32, %c0_i32_0 : i32, i32
  }
  func.func @transform_23(%arg0: i32) -> (i32, i32, i32) {
    %c0_i32 = arith.constant 0 : i32
    %c0_i32_0 = arith.constant 0 : i32
    %c0_i32_1 = arith.constant 0 : i32
    %c0_i32_2 = arith.constant 0 : i32
    return %c0_i32, %c0_i32_0, %c0_i32_1 : i32, i32, i32
  }
  func.func @transform_24(%arg0: i32) -> (i32, i32) {
    %c0_i32 = arith.constant 0 : i32
    %c0_i32_0 = arith.constant 0 : i32
    %c0_i32_1 = arith.constant 0 : i32
    return %c0_i32, %c0_i32_0 : i32, i32
  }
  func.func @transform_25(%arg0: i32) -> (i32, i32) {
    %c0_i32 = arith.constant 0 : i32
    %c0_i32_0 = arith.constant 0 : i32
    %c0_i32_1 = arith.constant 0 : i32
    return %c0_i32, %c0_i32_0 : i32, i32
  }
  func.func @transform_26(%arg0: i32) -> (i32, i32) {
    %c0_i32 = arith.constant 0 : i32
    %c0_i32_0 = arith.constant 0 : i32
    %c0_i32_1 = arith.constant 0 : i32
    return %c0_i32, %c0_i32_0 : i32, i32
  }
  func.func @transform_27(%arg0: i32) -> (i32, i32) {
    %c0_i32 = arith.constant 0 : i32
    %c0_i32_0 = arith.constant 0 : i32
    %c0_i32_1 = arith.constant 0 : i32
    return %c0_i32, %c0_i32_0 : i32, i32
  }
  func.func @transform_28(%arg0: i32) -> (i32, i32) {
    %c0_i32 = arith.constant 0 : i32
    %c0_i32_0 = arith.constant 0 : i32
    %c0_i32_1 = arith.constant 0 : i32
    return %c0_i32, %c0_i32_0 : i32, i32
  }
  func.func @transform_29(%arg0: i32) -> (i32, i32) {
    %c0_i32 = arith.constant 0 : i32
    %c0_i32_0 = arith.constant 0 : i32
    %c0_i32_1 = arith.constant 0 : i32
    return %c0_i32, %c0_i32_0 : i32, i32
  }
  func.func @transform_30(%arg0: i32) -> (i32, i32) {
    %c0_i32 = arith.constant 0 : i32
    %c0_i32_0 = arith.constant 0 : i32
    %c0_i32_1 = arith.constant 0 : i32
    return %c0_i32, %c0_i32_0 : i32, i32
  }
  func.func @transform_31(%arg0: i32) -> (i32, i32) {
    %c0_i32 = arith.constant 0 : i32
    %c0_i32_0 = arith.constant 0 : i32
    %c0_i32_1 = arith.constant 0 : i32
    return %c0_i32, %c0_i32_0 : i32, i32
  }
  func.func @transform_32(%arg0: i32) -> (i32, i32, i32) {
    %c0_i32 = arith.constant 0 : i32
    %c0_i32_0 = arith.constant 0 : i32
    %c0_i32_1 = arith.constant 0 : i32
    return %arg0, %c0_i32, %c0_i32_0 : i32, i32, i32
  }
  func.func @transform_33(%arg0: i32) -> (i32, i32, i32) {
    %c0_i32 = arith.constant 0 : i32
    %c0_i32_0 = arith.constant 0 : i32
    %c0_i32_1 = arith.constant 0 : i32
    return %arg0, %c0_i32, %c0_i32_0 : i32, i32, i32
  }
  func.func @transform_34(%arg0: i32) -> (i32, i32, i32) {
    %c0_i32 = arith.constant 0 : i32
    %c0_i32_0 = arith.constant 0 : i32
    %c0_i32_1 = arith.constant 0 : i32
    return %arg0, %c0_i32, %c0_i32_0 : i32, i32, i32
  }
  func.func @transform_35(%arg0: i32) -> (i32, i32, i32) {
    %c0_i32 = arith.constant 0 : i32
    %c0_i32_0 = arith.constant 0 : i32
    %c0_i32_1 = arith.constant 0 : i32
    return %arg0, %c0_i32, %c0_i32_0 : i32, i32, i32
  }
  func.func @transform_36(%arg0: i32) -> (i32, i32, i32) {
    %c0_i32 = arith.constant 0 : i32
    %c0_i32_0 = arith.constant 0 : i32
    %c0_i32_1 = arith.constant 0 : i32
    return %arg0, %c0_i32, %c0_i32_0 : i32, i32, i32
  }
  func.func @transform_37(%arg0: i32) -> (i32, i32, i32) {
    %c0_i32 = arith.constant 0 : i32
    %c0_i32_0 = arith.constant 0 : i32
    %c0_i32_1 = arith.constant 0 : i32
    return %arg0, %c0_i32, %c0_i32_0 : i32, i32, i32
  }
  func.func @transform_38(%arg0: i32) -> (i32, i32, i32) {
    %c0_i32 = arith.constant 0 : i32
    %c0_i32_0 = arith.constant 0 : i32
    %c0_i32_1 = arith.constant 0 : i32
    return %arg0, %c0_i32, %c0_i32_0 : i32, i32, i32
  }
  func.func @transform_39(%arg0: i32) -> (i32, i32, i32) {
    %c0_i32 = arith.constant 0 : i32
    %c0_i32_0 = arith.constant 0 : i32
    %c0_i32_1 = arith.constant 0 : i32
    return %arg0, %c0_i32, %c0_i32_0 : i32, i32, i32
  }
}

</mosaic_0001>

<bundles_post_ra>
// kernel: forward.1
= control target key start
LH: loop header
LB: loop body
LE: loop exit
PB: predicated region body
PF: predicated region fallthrough
CT: control target
= control target key end

     0   :  { %s13687_s6 = smov 1   ;;  %s13688_s10 = smov 2   ;;  %s15229_s0 = inlined_call_operand.smem [shape: u32[40], index: -1, kind: input, shape index: {}] }
   0x1   :  { %s13742_s5 = sld [smem:[%s15229_s0]]   ;;  %s13689_s14 = smov 3  }
   0x2   :  { %s13747_s9 = sld [smem:[%s15229_s0 + %s13687_s6]]   ;;  %s13690_s18 = smov 4  }
   0x3   :  { %s13752_s13 = sld [smem:[%s15229_s0 + %s13688_s10]]   ;;  %s13691_s22 = smov 5  }
   0x4   :  { %s13757_s17 = sld [smem:[%s15229_s0 + %s13689_s14]]   ;;  %s13692_s26 = smov 6  }
   0x5   :  { %s13762_s21 = sld [smem:[%s15229_s0 + %s13690_s18]]   ;;  %s13693_s30 = smov 7  }
   0x6   :  { %s13767_s25 = sld [smem:[%s15229_s0 + %s13691_s22]]   ;;  %s13694_s4 = smov 8  }
   0x7   :  { %15254 = sst [smem:[#allocation2_spill]] %s13742_s5  ;;  %s13695_s10 = smov 9  }
   0x8   :  { %s13772_s29 = sld [smem:[%s15229_s0 + %s13692_s26]]   ;;  %s13696_s15 = smov 10  }
   0x9   :  { %s13777_s3 = sld [smem:[%s15229_s0 + %s13693_s30]]   ;;  %s13697_s20 = smov 11  }
   0xa   :  { %s13782_s8 = sld [smem:[%s15229_s0 + %s13694_s4]]   ;;  %s13698_s26 = smov 12  }
   0xb   :  { %s13787_s14 = sld [smem:[%s15229_s0 + %s13695_s10]]   ;;  %s13699_s1 = smov 13  }
   0xc   :  { %s13792_s19 = sld [smem:[%s15229_s0 + %s13696_s15]]   ;;  %s13700_s7 = smov 14  }
   0xd   :  { %s13797_s24 = sld [smem:[%s15229_s0 + %s13697_s20]]   ;;  %s13701_s15 = smov 15  }
   0xe   :  { %15255 = sst [smem:[#allocation3_spill]] %s13772_s29  ;;  %s13702_s22 = smov 16  }
   0xf   :  { %15256 = sst [smem:[#allocation4_spill]] %s13777_s3  ;;  %s13703_s28 = smov 17  }
  0x10   :  { %15257 = sst [smem:[#allocation5_spill]] %s13782_s8 }
  0x11   :  { %15258 = sst [smem:[#allocation6_spill]] %s13787_s14 }
  0x12   :  { %15259 = sst [smem:[#allocation7_spill]] %s13792_s19 }
  0x13   :  { %15260 = sst [smem:[#allocation8_spill]] %s13797_s24 }
  0x14   :  { %s13802_s30 = sld [smem:[%s15229_s0 + %s13698_s26]]  }
  0x15   :  { %s13807_s6 = sld [smem:[%s15229_s0 + %s13699_s1]]  }
  0x16   :  { %s13812_s12 = sld [smem:[%s15229_s0 + %s13700_s7]]   ;;  %s13704_s7 = smov 18  }
  0x17   :  { %s13817_s20 = sld [smem:[%s15229_s0 + %s13701_s15]]   ;;  %s13705_s15 = smov 19  }
  0x18   :  { %s13822_s27 = sld [smem:[%s15229_s0 + %s13702_s22]]   ;;  %s13706_s22 = smov 20  }
  0x19   :  { %s13827_s4 = sld [smem:[%s15229_s0 + %s13703_s28]]   ;;  %s13707_s28 = smov 21  }
  0x1a   :  { %15261 = sst [smem:[#allocation9_spill]] %s13802_s30 }
  0x1b   :  { %15262 = sst [smem:[#allocation10_spill]] %s13807_s6 }
  0x1c   :  { %15263 = sst [smem:[#allocation11_spill]] %s13812_s12 }
  0x1d   :  { %s13832_s12 = sld [smem:[%s15229_s0 + %s13704_s7]]   ;;  %s13708_s7 = smov 22  }
  0x1e   :  { %15264 = sst [smem:[#allocation12_spill]] %s13822_s27 }
  0x1f   :  { %15265 = sst [smem:[#allocation13_spill]] %s13827_s4 }
  0x20   :  { %s13837_s24 = sld [smem:[%s15229_s0 + %s13705_s15]]   ;;  %s13709_s15 = smov 23  }
  0x21   :  { %s13842_s27 = sld [smem:[%s15229_s0 + %s13706_s22]]   ;;  %s13710_s22 = smov 24  }
  0x22   :  { %s13847_s30 = sld [smem:[%s15229_s0 + %s13707_s28]]   ;;  %s13711_s28 = smov 25  }
  0x23   :  { %15266 = sst [smem:[#allocation14_spill]] %s13832_s12 }
  0x24   :  { %s13852_s12 = sld [smem:[%s15229_s0 + %s13708_s7]]   ;;  %s13712_s7 = smov 26  }
  0x25   :  { %s13872_s19 = sld [smem:[%s15229_s0 + %s13712_s7]]   ;;  %s13716_s7 = smov 30  }
  0x26   :  { %15267 = sst [smem:[#allocation15_spill]] %s13837_s24 }
  0x27   :  { %15268 = sst [smem:[#allocation16_spill]] %s13842_s27 }
  0x28   :  { %15269 = sst [smem:[#allocation17_spill]] %s13847_s30 }
  0x29   :  { %s13857_s24 = sld [smem:[%s15229_s0 + %s13709_s15]]   ;;  %s13713_s15 = smov 27  }
  0x2a   :  { %s13862_s27 = sld [smem:[%s15229_s0 + %s13710_s22]]   ;;  %s13714_s22 = smov 28  }
  0x2b   :  { %s13867_s30 = sld [smem:[%s15229_s0 + %s13711_s28]]   ;;  %s13715_s28 = smov 29  }
  0x2c   :  { %s13882_s8 = sld [smem:[%s15229_s0 + %s13714_s22]]   ;;  %s13718_s22 = smov 32  }
  0x2d   :  { %s13892_s14 = sld [smem:[%s15229_s0 + %s13716_s7]]   ;;  %s13720_s7 = smov 34  }
  0x2f   :  { %15270 = sst [smem:[#allocation18_spill]] %s13857_s24 }
  0x30   :  { %s13877_s24 = sld [smem:[%s15229_s0 + %s13713_s15]]   ;;  %s13717_s15 = smov 31  }
  0x31   :  { %15271 = sst [smem:[#allocation19_spill]] %s13867_s30 }
  0x32   :  { %15273 = sst [smem:[#allocation21_spill]] %s13882_s8 }
  0x33   :  { %s13887_s30 = sld [smem:[%s15229_s0 + %s13715_s28]]   ;;  %s13719_s28 = smov 33  }
  0x34   :  { %15275 = sst [smem:[#allocation23_spill]] %s13892_s14 }
  0x35   :  { %s13902_s8 = sld [smem:[%s15229_s0 + %s13718_s22]]   ;;  %s13722_s22 = smov 36  }
  0x36   :  { %15272 = sst [smem:[#allocation20_spill]] %s13877_s24 }
  0x37   :  { %s13897_s24 = sld [smem:[%s15229_s0 + %s13717_s15]]   ;;  %s13721_s15 = smov 35  }
  0x38   :  { %s13912_s14 = sld [smem:[%s15229_s0 + %s13720_s7]]   ;;  %s13724_s7 = smov 38  }
  0x39   :  { %15274 = sst [smem:[#allocation22_spill]] %s13887_s30 }
  0x3a   :  { %s13907_s30 = sld [smem:[%s15229_s0 + %s13719_s28]]   ;;  %s13723_s28 = smov 37  }
  0x3b   :  { %s13922_s29 = sld [smem:[%s15229_s0 + %s13722_s22]]   ;;  %s13939_s22 = smov 0  }
  0x3d   :  { %15276 = sst [smem:[#allocation24_spill]] %s13897_s24 }
  0x3e   :  { %15278 = sst [smem:[#allocation26_spill]] %s13912_s14 }
  0x3f   :  { %s13917_s24 = sld [smem:[%s15229_s0 + %s13721_s15]]   ;;  %s13725_s15 = smov 39  }
  0x40   :  { %15277 = sst [smem:[#allocation25_spill]] %s13907_s30 }
  0x41   :  { %s13927_s30 = sld [smem:[%s15229_s0 + %s13723_s28]]  }
  0x42   :  { %s13932_s14 = sld [smem:[%s15229_s0 + %s13724_s7]]  }
  0x45   :  { %15279 = sst [smem:[#allocation27_spill]] %s13917_s24 }
  0x46   :  { %s13937_s24 = sld [smem:[%s15229_s0 + %s13725_s15]]  }
  0x47 LB: > { %s15280_s6 = sld [smem:[#allocation10_spill]]  ;;  %s15281_s4 = sld [smem:[#allocation13_spill]]  ;;  %s13685_s22 = sphi %s13939_s22, %s90_s22  }
  0x48   : > { %s11144_s23 = sadd.s32 4294967295, %s13685_s22   ;;  %p11148_p0 = scmp.ge.s32.totalorder %s13685_s22, 1 }
  0x49   : > { %p1092_p1 = scmp.lt.s32.totalorder %s13685_s22, 3 }
  0x4b   : > { %p1093_p2 = pnand %p11148_p0, %p1092_p1 }
  0x4c   : > { %v12842_v0 = vld [vmem:[%s13747_s9 + $0x4] ss:$72 sps:$4 sm:$0xff] (!%p1093_p2)   ;;  %v12846_v2 = vld [vmem:[%s13747_s9] ss:$72 sps:$4 sm:$0xff] (!%p1093_p2)   ;;  %v12848_v4 = vld [vmem:[%s13747_s9 + $0x94] ss:$72 sps:$4 sm:$0xff] (!%p1093_p2)  }
  0x4d   : > { %1096 = sbr.rel (%p1093_p2) target bundleno = 4880 (0x1310), region = 148  ;;  %v12844_v1 = vld [vmem:[%s13747_s9 + $0xc] ss:$72 sps:$4 sm:$0xff] (!%p1093_p2)   ;;  %2999 = vmatprep.subr.bf16.mxu0 (!%p1093_p2), %v12842_v0  ;;  %v12847_v3 = vld [vmem:[%s13747_s9 + $0x8] ss:$72 sps:$4 sm:$0xff] (!%p1093_p2)   ;;  %p1221_p3 = scmp.lt.s32.totalorder (!%p1093_p2), %s11144_s23, 1 }
  0x4e   : > { %3040 = vmatprep.subr.bf16.mxu1 (!%p1093_p2), %v12844_v1  ;;  %3000 = vmatpush1.bf16.msra.mxu0 (!%p1093_p2), %v12846_v2  ;;  %v12850_v5 = vld [vmem:[%s13747_s9 + $0x9c] ss:$72 sps:$4 sm:$0xff] (!%p1093_p2)   ;;  %v12852_v6 = vld [vmem:[%s13747_s9 + $0x90] ss:$72 sps:$4 sm:$0xff] (!%p1093_p2)   ;;  %v12856_v9 = vld [vmem:[%s13747_s9 + $0x12c] ss:$72 sps:$4 sm:$0xff] (!%p1093_p2)  }
  0x4f   : > { %3041 = vmatpush1.bf16.msra.mxu1 (!%p1093_p2), %v12847_v3  ;;  %3001 = vmatprep.subr.bf16.mxu0 (!%p1093_p2), %v12848_v4  ;;  %v12853_v7 = vld [vmem:[%s13747_s9 + $0x98] ss:$72 sps:$4 sm:$0xff] (!%p1093_p2)   ;;  %v12854_v8 = vld [vmem:[%s13747_s9 + $0x124] ss:$72 sps:$4 sm:$0xff] (!%p1093_p2)   ;;  %v12859_v11 = vld [vmem:[%s13747_s9 + $0x128] ss:$72 sps:$4 sm:$0xff] (!%p1093_p2)  }
  0x50   : > { %3042 = vmatprep.subr.bf16.mxu1 (!%p1093_p2), %v12850_v5  ;;  %v12858_v10 = vld [vmem:[%s13747_s9 + $0x120] ss:$72 sps:$4 sm:$0xff] (!%p1093_p2)   ;;  %v12860_v12 = vld [vmem:[%s13747_s9 + $0x1b4] ss:$72 sps:$4 sm:$0xff] (!%p1093_p2)   ;;  %v12864_v14 = vld [vmem:[%s13747_s9 + $0x1b0] ss:$72 sps:$4 sm:$0xff] (!%p1093_p2)  }
  0x51   : > { %v12862_v13 = vld [vmem:[%s13747_s9 + $0x1bc] ss:$72 sps:$4 sm:$0xff] (!%p1093_p2)   ;;  %v12865_v15 = vld [vmem:[%s13747_s9 + $0x1b8] ss:$72 sps:$4 sm:$0xff] (!%p1093_p2)   ;;  %v12868_v17 = vld [vmem:[%s13747_s9 + $0x24c] ss:$72 sps:$4 sm:$0xff] (!%p1093_p2)  }
  0x52   : > { %3002 = vmatpush1.bf16.msra.mxu0 (!%p1093_p2), %v12852_v6  ;;  %v12866_v16 = vld [vmem:[%s13747_s9 + $0x244] ss:$72 sps:$4 sm:$0xff] (!%p1093_p2)   ;;  %v12870_v18 = vld [vmem:[%s13747_s9 + $0x240] ss:$72 sps:$4 sm:$0xff] (!%p1093_p2)   ;;  %v12872_v20 = vld [vmem:[%s13747_s9 + $0x2d4] ss:$72 sps:$4 sm:$0xff] (!%p1093_p2)  }
  0x53   : > { %3043 = vmatpush1.bf16.msra.mxu1 (!%p1093_p2), %v12853_v7  ;;  %3003 = vmatprep.subr.bf16.mxu0 (!%p1093_p2), %v12854_v8  ;;  %v12871_v19 = vld [vmem:[%s13747_s9 + $0x248] ss:$72 sps:$4 sm:$0xff] (!%p1093_p2)   ;;  %v12874_v21 = vld [vmem:[%s13747_s9 + $0x2dc] ss:$72 sps:$4 sm:$0xff] (!%p1093_p2)   ;;  %v12877_v23 = vld [vmem:[%s13747_s9 + $0x2d8] ss:$72 sps:$4 sm:$0xff] (!%p1093_p2)  }
  0x54   : > { %3044 = vmatprep.subr.bf16.mxu1 %v12856_v9  ;;  %v12876_v22 = vld [vmem:[%s13747_s9 + $0x2d0] ss:$72 sps:$4 sm:$0xff]   ;;  %v12878_v24 = vld [vmem:[%s13747_s9 + $0x364] ss:$72 sps:$4 sm:$0xff]   ;;  %v12882_v26 = vld [vmem:[%s13747_s9 + $0x360] ss:$72 sps:$4 sm:$0xff]  }
  0x55   : > { %v12880_v25 = vld [vmem:[%s13747_s9 + $0x36c] ss:$72 sps:$4 sm:$0xff]   ;;  %v12883_v27 = vld [vmem:[%s13747_s9 + $0x368] ss:$72 sps:$4 sm:$0xff]   ;;  %v12886_v29 = vld [vmem:[%s13747_s9 + $0x3fc] ss:$72 sps:$4 sm:$0xff]  }
  0x56   : > { %3004 = vmatpush1.bf16.msra.mxu0 %v12858_v10  ;;  %v12884_v28 = vld [vmem:[%s13747_s9 + $0x3f4] ss:$72 sps:$4 sm:$0xff]   ;;  %v12888_v30 = vld [vmem:[%s13747_s9 + $0x3f0] ss:$72 sps:$4 sm:$0xff]   ;;  %v12890_v32 = vld [vmem:[%s13747_s9 + $0x484] ss:$72 sps:$4 sm:$0xff]  }
  0x57   : > { %3045 = vmatpush1.bf16.msra.mxu1 %v12859_v11  ;;  %3005 = vmatprep.subr.bf16.mxu0 %v12860_v12  ;;  %v12889_v31 = vld [vmem:[%s13747_s9 + $0x3f8] ss:$72 sps:$4 sm:$0xff]   ;;  %v12892_v33 = vld [vmem:[%s13747_s9 + $0x48c] ss:$72 sps:$4 sm:$0xff]   ;;  %v12895_v35 = vld [vmem:[%s13747_s9 + $0x488] ss:$72 sps:$4 sm:$0xff]  }
  0x58   : > { %3046 = vmatprep.subr.bf16.mxu1 %v12862_v13  ;;  %v12894_v34 = vld [vmem:[%s13747_s9 + $0x480] ss:$72 sps:$4 sm:$0xff]   ;;  %v12896_v36 = vld [vmem:[%s13747_s9 + $0x514] ss:$72 sps:$4 sm:$0xff]   ;;  %s15282_s5 = sld [smem:[#allocation2_spill]]  ;;  %s15307_s23 = smov (!%p1221_p3, %s11144_s23), 1 }
  0x59   : > { %v12898_v37 = vld [vmem:[%s13747_s9 + $0x51c] ss:$72 sps:$4 sm:$0xff]   ;;  %v12900_v38 = vld [vmem:[%s13747_s9 + $0x510] ss:$72 sps:$4 sm:$0xff]   ;;  %s12001_s0 = sshll.u32 %s15307_s23, 3  ;;  %vm3393_vm0 = vcmask 1040384  }
  0x5a   : > { %3006 = vmatpush1.bf16.msra.mxu0 %v12864_v14  ;;  %v12901_v39 = vld [vmem:[%s13747_s9 + $0x518] ss:$72 sps:$4 sm:$0xff]   ;;  %v12902_v40 = vld [vmem:[%s13747_s9 + $0x5a4] ss:$72 sps:$4 sm:$0xff]   ;;  %v12907_v43 = vld [vmem:[%s13747_s9 + $0x5a8] ss:$72 sps:$4 sm:$0xff]  }
  0x5b   : > { %3047 = vmatpush1.bf16.msra.mxu1 %v12865_v15  ;;  %3007 = vmatprep.subr.bf16.mxu0 %v12866_v16  ;;  %v12904_v41 = vld [vmem:[%s13747_s9 + $0x5ac] ss:$72 sps:$4 sm:$0xff]   ;;  %v12906_v42 = vld [vmem:[%s13747_s9 + $0x5a0] ss:$72 sps:$4 sm:$0xff]   ;;  %v12910_v45 = vld [vmem:[%s13747_s9 + $0x63c] ss:$72 sps:$4 sm:$0xff]  }
  0x5c   : > { %3048 = vmatprep.subr.bf16.mxu1 %v12868_v17  ;;  %v12908_v44 = vld [vmem:[%s13747_s9 + $0x634] ss:$72 sps:$4 sm:$0xff]   ;;  %v12912_v47 = vld [vmem:[%s13747_s9 + $0x630] ss:$72 sps:$4 sm:$0xff]   ;;  %v12914_v50 = vld [vmem:[%s13747_s9 + $0x6c4] ss:$72 sps:$4 sm:$0xff]  }
  0x5d   : > { %v12913_v49 = vld [vmem:[%s13747_s9 + $0x638] ss:$72 sps:$4 sm:$0xff]   ;;  %v12916_v51 = vld [vmem:[%s13747_s9 + $0x6cc] ss:$72 sps:$4 sm:$0xff]   ;;  %v12919_v54 = vld [vmem:[%s13747_s9 + $0x6c8] ss:$72 sps:$4 sm:$0xff]  }
  0x5e   : > { %3008 = vmatpush1.bf16.msra.mxu0 %v12870_v18  ;;  %s1225_s26 = scalar_lea.vmem %s15282_s5, %s12001_s0  ;;  %v12918_v53 = vld [vmem:[%s13747_s9 + $0x6c0] ss:$72 sps:$4 sm:$0xff]   ;;  %v12920_v55 = vld [vmem:[%s13747_s9 + $0x754] ss:$72 sps:$4 sm:$0xff]   ;;  %v12924_v57 = vld [vmem:[%s13747_s9 + $0x750] ss:$72 sps:$4 sm:$0xff]  }
  0x5f   : > { %3049 = vmatpush1.bf16.msra.mxu1 %v12871_v19  ;;  %3009 = vmatprep.subr.bf16.mxu0 %v12872_v20  ;;  %v1265_v46 = vld [vmem:[%s1225_s26] sm:$0x77]  ;;  %v12928_v60 = vld [vmem:[%s13747_s9 + $0x7ec] ss:$72 sps:$4 sm:$0xff]   ;;  %v12931_v62 = vld [vmem:[%s13747_s9 + $0x7e8] ss:$72 sps:$4 sm:$0xff]  }
  0x60   : > { %3050 = vmatprep.subr.bf16.mxu1 %v12874_v21  ;;  %v1267_v48 = vcombine.high %v1265_v46, %v1265_v46  ;;  %v12922_v56 = vld [vmem:[%s13747_s9 + $0x75c] ss:$72 sps:$4 sm:$0xff]   ;;  %v12925_v58 = vld [vmem:[%s13747_s9 + $0x758] ss:$72 sps:$4 sm:$0xff]   ;;  %v14027_v5 = vpack.c.bf16 %v1265_v46, %v1265_v46  ;;  %v12962_v9 = vld [vmem:[%s13747_s9 + $0xac] ss:$72 sps:$4 sm:$0xff]  }
  0x61   : > { %v12926_v59 = vld [vmem:[%s13747_s9 + $0x7e4] ss:$72 sps:$4 sm:$0xff]   ;;  %v12930_v61 = vld [vmem:[%s13747_s9 + $0x7e0] ss:$72 sps:$4 sm:$0xff]   ;;  %v12932_v63 = vld [vmem:[%s13747_s9 + $0x874] ss:$72 sps:$4 sm:$0xff]  }
  0x62   : > { %3010 = vmatpush1.bf16.msra.mxu0 %v12876_v22  ;;  %v14007_v52 = vpack.c.bf16 %v1267_v48, %v1267_v48  ;;  %v12934_v0 = vld [vmem:[%s13747_s9 + $0x87c] ss:$72 sps:$4 sm:$0xff]   ;;  %v12936_v1 = vld [vmem:[%s13747_s9 + $0x870] ss:$72 sps:$4 sm:$0xff]   ;;  %v12942_v10 = vld [vmem:[%s13747_s9 + $0xa0] ss:$72 sps:$4 sm:$0xff]  }
  0x63   : > { %3051 = vmatpush1.bf16.msra.mxu1 %v12877_v23  ;;  %3011 = vmatprep.subr.bf16.mxu0 %v12878_v24  ;;  %v12937_v2 = vld [vmem:[%s13747_s9 + $0x878] ss:$72 sps:$4 sm:$0xff]   ;;  %v12941_v3 = vld [vmem:[%s13747_s9 + $0x14] ss:$72 sps:$4 sm:$0xff]   ;;  %v12944_v8 = vld [vmem:[%s13747_s9 + $0xa4] ss:$72 sps:$4 sm:$0xff]  }
  0x64   : > { %3052 = vmatprep.subr.bf16.mxu1 %v12880_v25  ;;  %3031 = vmatprep.mubr.bf16.mxu0 %v14007_v52  ;;  %v12956_v4 = vld [vmem:[%s13747_s9 + $0x1c] ss:$72 sps:$4 sm:$0xff]   ;;  %v12939_v6 = vld [vmem:[%s13747_s9 + $0x10] ss:$72 sps:$4 sm:$0xff]   ;;  %v12974_v17 = vld [vmem:[%s13747_s9 + $0x1cc] ss:$72 sps:$4 sm:$0xff]  }
  0x65   : > { %3072 = vmatprep.mubr.bf16.mxu1 %v14007_v52  ;;  %v12954_v7 = vld [vmem:[%s13747_s9 + $0x18] ss:$72 sps:$4 sm:$0xff]   ;;  %v12960_v11 = vld [vmem:[%s13747_s9 + $0xa8] ss:$72 sps:$4 sm:$0xff]   ;;  %v12947_v12 = vld [vmem:[%s13747_s9 + $0x134] ss:$72 sps:$4 sm:$0xff]  }
  0x66   : > { %3012 = vmatpush1.bf16.msra.mxu0 %v12882_v26  ;;  %v12968_v13 = vld [vmem:[%s13747_s9 + $0x13c] ss:$72 sps:$4 sm:$0xff]   ;;  %v12945_v14 = vld [vmem:[%s13747_s9 + $0x130] ss:$72 sps:$4 sm:$0xff]   ;;  %v12948_v18 = vld [vmem:[%s13747_s9 + $0x1c0] ss:$72 sps:$4 sm:$0xff]  }
  0x67   : > { %3053 = vmatpush1.bf16.msra.mxu1 %v12883_v27  ;;  %3013 = vmatprep.subr.bf16.mxu0 %v12884_v28  ;;  %v12966_v15 = vld [vmem:[%s13747_s9 + $0x138] ss:$72 sps:$4 sm:$0xff]   ;;  %v12950_v16 = vld [vmem:[%s13747_s9 + $0x1c4] ss:$72 sps:$4 sm:$0xff]   ;;  %v12972_v19 = vld [vmem:[%s13747_s9 + $0x1c8] ss:$72 sps:$4 sm:$0xff]  }
  0x68   : > { %3054 = vmatprep.subr.bf16.mxu1 %v12886_v29  ;;  %v12953_v20 = vld [vmem:[%s13747_s9 + $0x254] ss:$72 sps:$4 sm:$0xff]   ;;  %v12951_v22 = vld [vmem:[%s13747_s9 + $0x250] ss:$72 sps:$4 sm:$0xff]   ;;  %v12959_v24 = vld [vmem:[%s13747_s9 + $0x2e4] ss:$72 sps:$4 sm:$0xff]  }
  0x69   : > { %v12980_v21 = vld [vmem:[%s13747_s9 + $0x25c] ss:$72 sps:$4 sm:$0xff]   ;;  %v12978_v23 = vld [vmem:[%s13747_s9 + $0x258] ss:$72 sps:$4 sm:$0xff]   ;;  %v12986_v25 = vld [vmem:[%s13747_s9 + $0x2ec] ss:$72 sps:$4 sm:$0xff]  }
  0x6a   : > { %3014 = vmatpush1.bf16.msra.mxu0 %v12888_v30  ;;  %v12957_v26 = vld [vmem:[%s13747_s9 + $0x2e0] ss:$72 sps:$4 sm:$0xff]   ;;  %v12965_v28 = vld [vmem:[%s13747_s9 + $0x374] ss:$72 sps:$4 sm:$0xff]   ;;  %v12963_v30 = vld [vmem:[%s13747_s9 + $0x370] ss:$72 sps:$4 sm:$0xff]  }
  0x6b   : > { %3055 = vmatpush1.bf16.msra.mxu1 %v12889_v31  ;;  %3015 = vmatprep.subr.bf16.mxu0 %v12890_v32  ;;  %v12984_v27 = vld [vmem:[%s13747_s9 + $0x2e8] ss:$72 sps:$4 sm:$0xff]   ;;  %v12992_v29 = vld [vmem:[%s13747_s9 + $0x37c] ss:$72 sps:$4 sm:$0xff]   ;;  %v12990_v31 = vld [vmem:[%s13747_s9 + $0x378] ss:$72 sps:$4 sm:$0xff]  }
  0x6c   : > { %3056 = vmatprep.subr.bf16.mxu1 %v12892_v33  ;;  %v12971_v32 = vld [vmem:[%s13747_s9 + $0x404] ss:$72 sps:$4 sm:$0xff]   ;;  %v12987_v46 = vld [vmem:[%s13747_s9 + $0x5b0] ss:$72 sps:$4 sm:$0xff]   ;;  %vm3394_vm1 = vcmask 1041408   ;;  %vm3389_vm2 = vcmask 23552  }
  0x6d   : > { %v12998_v33 = vld [vmem:[%s13747_s9 + $0x40c] ss:$72 sps:$4 sm:$0xff]   ;;  %s15283_s3 = sld [smem:[#allocation4_spill]]  ;;  %s14401_s28 = sshll.u32 %s15307_s23, 4  ;;  %vm5219_vm3 = vcmask 523264   ;;  %vm13729_vm4 = vmmov 0  }
  0x6e   : > { %3016 = vmatpush1.bf16.msra.mxu0 %v12894_v34  ;;  %v12969_v34 = vld [vmem:[%s13747_s9 + $0x400] ss:$72 sps:$4 sm:$0xff]   ;;  %v12995_v48 = vld [vmem:[%s13747_s9 + $0x644] ss:$72 sps:$4 sm:$0xff]   ;;  %s1230_s1 = scalar_lea.vmem %s13902_s8, %s14401_s28  ;;  %s15284_s2 = sld [smem:[#allocation3_spill]]  ;;  %vm5443_vm5 = vcmask 1043456  }
  0x6f   : > { %3057 = vmatpush1.bf16.msra.mxu1 %v12895_v35  ;;  %3017 = vmatprep.subr.bf16.mxu0 %v12896_v36  ;;  %v12996_v35 = vld [vmem:[%s13747_s9 + $0x408] ss:$72 sps:$4 sm:$0xff]   ;;  %v12977_v36 = vld [vmem:[%s13747_s9 + $0x494] ss:$72 sps:$4 sm:$0xff]   ;;  %vm5439_vm6 = vcmask 64512   ;;  %s15285_s7 = sld [smem:[#allocation6_spill]] }
  0x70   : > { %3058 = vmatprep.subr.bf16.mxu1 %v12898_v37  ;;  %v13004_v37 = vld [vmem:[%s13747_s9 + $0x49c] ss:$72 sps:$4 sm:$0xff]   ;;  %s15286_s10 = sld [smem:[#allocation5_spill]]  ;;  %s15287_s11 = sld [smem:[#allocation7_spill]]  ;;  %vm7571_vm7 = vcmask 130048   ;;  %vm9457_vm8 = vcmask 31744  }
  0x71   : > { %s15288_s15 = sld [smem:[#allocation25_spill]]  ;;  %s15291_s26 = sld [smem:[#allocation14_spill]]  ;;  %vm9789_vm9 = vcmask 261120   ;;  %vm10714_vm10 = vcmask 7168   ;;  %vm10716_vm11 = vcmask 1024   ;;  %vm13732_vm12 = vmmov 1  }
  0x72   : > { %3018 = vmatpush1.bf16.msra.mxu0 %v12900_v38  ;;  %v12975_v38 = vld [vmem:[%s13747_s9 + $0x490] ss:$72 sps:$4 sm:$0xff]   ;;  %s15289_s18 = sld [smem:[#allocation9_spill]]  ;;  %vm12662_vm13 = vmpackc.low %vm3394_vm1, %vm13732_vm12  ;;  %vm10737_vm14 = vcmask 80896  }
  0x73   : > { %3059 = vmatpush1.bf16.msra.mxu1 %v12901_v39  ;;  %3019 = vmatprep.subr.bf16.mxu0 %v12902_v40  ;;  %v13002_v39 = vld [vmem:[%s13747_s9 + $0x498] ss:$72 sps:$4 sm:$0xff]   ;;  %v12983_v40 = vld [vmem:[%s13747_s9 + $0x524] ss:$72 sps:$4 sm:$0xff]  }
  0x74   : > { %3060 = vmatprep.subr.bf16.mxu1 %v12904_v41  ;;  %v13010_v41 = vld [vmem:[%s13747_s9 + $0x52c] ss:$72 sps:$4 sm:$0xff]  }
  0x76   : > { %3020 = vmatpush1.bf16.msra.mxu0 %v12906_v42  ;;  %v12981_v42 = vld [vmem:[%s13747_s9 + $0x520] ss:$72 sps:$4 sm:$0xff]  }
  0x77   : > { %3061 = vmatpush1.bf16.msra.mxu1 %v12907_v43  ;;  %3021 = vmatprep.subr.bf16.mxu0 %v12908_v44  ;;  %v13008_v43 = vld [vmem:[%s13747_s9 + $0x528] ss:$72 sps:$4 sm:$0xff]   ;;  %v12989_v44 = vld [vmem:[%s13747_s9 + $0x5b4] ss:$72 sps:$4 sm:$0xff]   ;;  %s1234_s16 = scalar_lea.vmem %s15288_s15, %s12001_s0  ;;  %s15290_s0 = sld [smem:[#allocation8_spill]] }
  0x78   : > { %3062 = vmatprep.subr.bf16.mxu1 %v12910_v45  ;;  %v13016_v45 = vld [vmem:[%s13747_s9 + $0x5bc] ss:$72 sps:$4 sm:$0xff]   ;;  %s15294_s15 = sld [smem:[#allocation15_spill]] }
  0x7a   : > { %3022 = vmatpush1.bf16.msra.mxu0 %v12912_v47  ;;  %v13014_v47 = vld [vmem:[%s13747_s9 + $0x5b8] ss:$72 sps:$4 sm:$0xff]  }
  0x7b   : > { %3063 = vmatpush1.bf16.msra.mxu1 %v12913_v49  ;;  %3023 = vmatprep.subr.bf16.mxu0 %v12914_v50  ;;  %v13022_v49 = vld [vmem:[%s13747_s9 + $0x64c] ss:$72 sps:$4 sm:$0xff]   ;;  %v12993_v50 = vld [vmem:[%s13747_s9 + $0x640] ss:$72 sps:$4 sm:$0xff]  }
  0x7c   : > { %3064 = vmatprep.subr.bf16.mxu1 %v12916_v51  ;;  %v13020_v51 = vld [vmem:[%s13747_s9 + $0x648] ss:$72 sps:$4 sm:$0xff]  }
  0x7e   : > { %3024 = vmatpush1.bf16.msra.mxu0 %v12918_v53  ;;  %v13001_v53 = vld [vmem:[%s13747_s9 + $0x6d4] ss:$72 sps:$4 sm:$0xff]  }
  0x7f   : > { %3065 = vmatpush1.bf16.msra.mxu1 %v12919_v54  ;;  %3025 = vmatprep.subr.bf16.mxu0 %v12920_v55  ;;  %v13028_v54 = vld [vmem:[%s13747_s9 + $0x6dc] ss:$72 sps:$4 sm:$0xff]   ;;  %v12999_v55 = vld [vmem:[%s13747_s9 + $0x6d0] ss:$72 sps:$4 sm:$0xff]  }
  0x80   : > { %3066 = vmatprep.subr.bf16.mxu1 %v12922_v56  ;;  %v13026_v56 = vld [vmem:[%s13747_s9 + $0x6d8] ss:$72 sps:$4 sm:$0xff]  }
  0x82   : > { %3026 = vmatpush1.bf16.msra.mxu0 %v12924_v57  ;;  %v13007_v57 = vld [vmem:[%s13747_s9 + $0x764] ss:$72 sps:$4 sm:$0xff]  }
  0x83   : > { %3067 = vmatpush1.bf16.msra.mxu1 %v12925_v58  ;;  %3027 = vmatprep.subr.bf16.mxu0 %v12926_v59  ;;  %v13034_v58 = vld [vmem:[%s13747_s9 + $0x76c] ss:$72 sps:$4 sm:$0xff]   ;;  %v13005_v59 = vld [vmem:[%s13747_s9 + $0x760] ss:$72 sps:$4 sm:$0xff]  }
  0x84   : > { %3068 = vmatprep.subr.bf16.mxu1 %v12928_v60  ;;  %v13032_v60 = vld [vmem:[%s13747_s9 + $0x768] ss:$72 sps:$4 sm:$0xff]  }
  0x86   : > { %3028 = vmatpush1.bf16.msra.mxu0 %v12930_v61  ;;  %v13013_v61 = vld [vmem:[%s13747_s9 + $0x7f4] ss:$72 sps:$4 sm:$0xff]  }
  0x87   : > { %3069 = vmatpush1.bf16.msra.mxu1 %v12931_v62  ;;  %3029 = vmatprep.subr.bf16.mxu0 %v12932_v63  ;;  %v13040_v62 = vld [vmem:[%s13747_s9 + $0x7fc] ss:$72 sps:$4 sm:$0xff]   ;;  %v13011_v63 = vld [vmem:[%s13747_s9 + $0x7f0] ss:$72 sps:$4 sm:$0xff]  }
  0x88   : > { %3070 = vmatprep.subr.bf16.mxu1 %v12934_v0  ;;  %v13038_v0 = vld [vmem:[%s13747_s9 + $0x7f8] ss:$72 sps:$4 sm:$0xff]  }
  0x8a   : > { %3030 = vmatpush1.bf16.msra.mxu0 %v12936_v1  ;;  %v13019_v1 = vld [vmem:[%s13747_s9 + $0x884] ss:$72 sps:$4 sm:$0xff]  }
  0x8b   : > { %3071 = vmatpush1.bf16.msra.mxu1 %v12937_v2  ;;  %3081 = vmatprep.subr.bf16.mxu0 %v12941_v3  ;;  %v13046_v2 = vld [vmem:[%s13747_s9 + $0x88c] ss:$72 sps:$4 sm:$0xff]   ;;  %v13017_v3 = vld [vmem:[%s13747_s9 + $0x880] ss:$72 sps:$4 sm:$0xff]  }
  0x8c   : > { %3122 = vmatprep.subr.bf16.mxu1 %v12956_v4  ;;  %v13044_v4 = vld [vmem:[%s13747_s9 + $0x888] ss:$72 sps:$4 sm:$0xff]  }
  0x8d   : > { %3032 = vmatmul.mubr.bf16.vlgmr.msra.gmra.mrb[0].mxu0 %v14027_v5 }
  0x8e   : > { %3073 = vmatmul.mubr.bf16.vlgmr.msra.gmra.mrb[0].mxu1 %v14027_v5  ;;  %3082 = vmatpush1.bf16.msra.mxu0 %v12939_v6  ;;  %v13025_v6 = vld [vmem:[%s13747_s9 + $0x24] ss:$72 sps:$4 sm:$0xff]  }
  0x8f   : > { %3123 = vmatpush1.bf16.msra.mxu1 %v12954_v7  ;;  %3083 = vmatprep.subr.bf16.mxu0 %v12944_v8  ;;  %v13052_v7 = vld [vmem:[%s13747_s9 + $0x2c] ss:$72 sps:$4 sm:$0xff]   ;;  %v13023_v8 = vld [vmem:[%s13747_s9 + $0x20] ss:$72 sps:$4 sm:$0xff]  }
  0x90   : > { %3124 = vmatprep.subr.bf16.mxu1 %v12962_v9  ;;  %3113 = vmatprep.mubr.bf16.mxu0 %v14007_v52  ;;  %v13050_v9 = vld [vmem:[%s13747_s9 + $0x28] ss:$72 sps:$4 sm:$0xff]  }
  0x91   : > { %3154 = vmatprep.mubr.bf16.mxu1 %v14007_v52 }
  0x92   : > { %3084 = vmatpush1.bf16.msra.mxu0 %v12942_v10  ;;  %v13031_v10 = vld [vmem:[%s13747_s9 + $0xb4] ss:$72 sps:$4 sm:$0xff]  }
  0x93   : > { %3125 = vmatpush1.bf16.msra.mxu1 %v12960_v11  ;;  %3085 = vmatprep.subr.bf16.mxu0 %v12947_v12  ;;  %v13058_v11 = vld [vmem:[%s13747_s9 + $0xbc] ss:$72 sps:$4 sm:$0xff]   ;;  %v13029_v12 = vld [vmem:[%s13747_s9 + $0xb0] ss:$72 sps:$4 sm:$0xff]  }
  0x94   : > { %3126 = vmatprep.subr.bf16.mxu1 %v12968_v13  ;;  %v13056_v13 = vld [vmem:[%s13747_s9 + $0xb8] ss:$72 sps:$4 sm:$0xff]  }
  0x96   : > { %3086 = vmatpush1.bf16.msra.mxu0 %v12945_v14  ;;  %v13037_v14 = vld [vmem:[%s13747_s9 + $0x144] ss:$72 sps:$4 sm:$0xff]  }
  0x97   : > { %3127 = vmatpush1.bf16.msra.mxu1 %v12966_v15  ;;  %3087 = vmatprep.subr.bf16.mxu0 %v12950_v16  ;;  %v13064_v15 = vld [vmem:[%s13747_s9 + $0x14c] ss:$72 sps:$4 sm:$0xff]   ;;  %v13035_v16 = vld [vmem:[%s13747_s9 + $0x140] ss:$72 sps:$4 sm:$0xff]  }
  0x98   : > { %3128 = vmatprep.subr.bf16.mxu1 %v12974_v17  ;;  %v13062_v17 = vld [vmem:[%s13747_s9 + $0x148] ss:$72 sps:$4 sm:$0xff]  }
  0x9a   : > { %3088 = vmatpush1.bf16.msra.mxu0 %v12948_v18  ;;  %v13043_v18 = vld [vmem:[%s13747_s9 + $0x1d4] ss:$72 sps:$4 sm:$0xff]  }
  0x9b   : > { %3129 = vmatpush1.bf16.msra.mxu1 %v12972_v19  ;;  %3089 = vmatprep.subr.bf16.mxu0 %v12953_v20  ;;  %v13070_v19 = vld [vmem:[%s13747_s9 + $0x1dc] ss:$72 sps:$4 sm:$0xff]   ;;  %v13041_v20 = vld [vmem:[%s13747_s9 + $0x1d0] ss:$72 sps:$4 sm:$0xff]  }
  0x9c   : > { %3130 = vmatprep.subr.bf16.mxu1 %v12980_v21  ;;  %v13068_v21 = vld [vmem:[%s13747_s9 + $0x1d8] ss:$72 sps:$4 sm:$0xff]  }
  0x9e   : > { %3090 = vmatpush1.bf16.msra.mxu0 %v12951_v22  ;;  %v13049_v22 = vld [vmem:[%s13747_s9 + $0x264] ss:$72 sps:$4 sm:$0xff]  }
  0x9f   : > { %3131 = vmatpush1.bf16.msra.mxu1 %v12978_v23  ;;  %3091 = vmatprep.subr.bf16.mxu0 %v12959_v24  ;;  %v13076_v23 = vld [vmem:[%s13747_s9 + $0x26c] ss:$72 sps:$4 sm:$0xff]   ;;  %v13047_v24 = vld [vmem:[%s13747_s9 + $0x260] ss:$72 sps:$4 sm:$0xff]  }
  0xa0   : > { %3132 = vmatprep.subr.bf16.mxu1 %v12986_v25  ;;  %v13074_v25 = vld [vmem:[%s13747_s9 + $0x268] ss:$72 sps:$4 sm:$0xff]  }
  0xa2   : > { %3092 = vmatpush1.bf16.msra.mxu0 %v12957_v26  ;;  %v13055_v26 = vld [vmem:[%s13747_s9 + $0x2f4] ss:$72 sps:$4 sm:$0xff]  }
  0xa3   : > { %3133 = vmatpush1.bf16.msra.mxu1 %v12984_v27  ;;  %3093 = vmatprep.subr.bf16.mxu0 %v12965_v28  ;;  %v13082_v27 = vld [vmem:[%s13747_s9 + $0x2fc] ss:$72 sps:$4 sm:$0xff]   ;;  %v13053_v28 = vld [vmem:[%s13747_s9 + $0x2f0] ss:$72 sps:$4 sm:$0xff]  }
  0xa4   : > { %3134 = vmatprep.subr.bf16.mxu1 %v12992_v29  ;;  %v13080_v29 = vld [vmem:[%s13747_s9 + $0x2f8] ss:$72 sps:$4 sm:$0xff]  }
  0xa6   : > { %3094 = vmatpush1.bf16.msra.mxu0 %v12963_v30  ;;  %v13061_v30 = vld [vmem:[%s13747_s9 + $0x384] ss:$72 sps:$4 sm:$0xff]  }
  0xa7   : > { %3135 = vmatpush1.bf16.msra.mxu1 %v12990_v31  ;;  %3095 = vmatprep.subr.bf16.mxu0 %v12971_v32  ;;  %v13088_v31 = vld [vmem:[%s13747_s9 + $0x38c] ss:$72 sps:$4 sm:$0xff]   ;;  %v13059_v32 = vld [vmem:[%s13747_s9 + $0x380] ss:$72 sps:$4 sm:$0xff]  }
  0xa8   : > { %3136 = vmatprep.subr.bf16.mxu1 %v12998_v33  ;;  %v13086_v33 = vld [vmem:[%s13747_s9 + $0x388] ss:$72 sps:$4 sm:$0xff]  }
  0xaa   : > { %3096 = vmatpush1.bf16.msra.mxu0 %v12969_v34  ;;  %v13067_v34 = vld [vmem:[%s13747_s9 + $0x414] ss:$72 sps:$4 sm:$0xff]  }
  0xab   : > { %3137 = vmatpush1.bf16.msra.mxu1 %v12996_v35  ;;  %3097 = vmatprep.subr.bf16.mxu0 %v12977_v36  ;;  %v13094_v35 = vld [vmem:[%s13747_s9 + $0x41c] ss:$72 sps:$4 sm:$0xff]   ;;  %v13065_v36 = vld [vmem:[%s13747_s9 + $0x410] ss:$72 sps:$4 sm:$0xff]  }
  0xac   : > { %3138 = vmatprep.subr.bf16.mxu1 %v13004_v37  ;;  %v13092_v37 = vld [vmem:[%s13747_s9 + $0x418] ss:$72 sps:$4 sm:$0xff]  }
  0xae   : > { %3098 = vmatpush1.bf16.msra.mxu0 %v12975_v38  ;;  %v13073_v38 = vld [vmem:[%s13747_s9 + $0x4a4] ss:$72 sps:$4 sm:$0xff]  }
  0xaf   : > { %3139 = vmatpush1.bf16.msra.mxu1 %v13002_v39  ;;  %3099 = vmatprep.subr.bf16.mxu0 %v12983_v40  ;;  %v13100_v39 = vld [vmem:[%s13747_s9 + $0x4ac] ss:$72 sps:$4 sm:$0xff]   ;;  %v13071_v40 = vld [vmem:[%s13747_s9 + $0x4a0] ss:$72 sps:$4 sm:$0xff]  }
  0xb0   : > { %3140 = vmatprep.subr.bf16.mxu1 %v13010_v41  ;;  %v13098_v41 = vld [vmem:[%s13747_s9 + $0x4a8] ss:$72 sps:$4 sm:$0xff]  }
  0xb2   : > { %3100 = vmatpush1.bf16.msra.mxu0 %v12981_v42  ;;  %v13079_v42 = vld [vmem:[%s13747_s9 + $0x534] ss:$72 sps:$4 sm:$0xff]  }
  0xb3   : > { %3141 = vmatpush1.bf16.msra.mxu1 %v13008_v43  ;;  %3101 = vmatprep.subr.bf16.mxu0 %v12989_v44  ;;  %v13106_v43 = vld [vmem:[%s13747_s9 + $0x53c] ss:$72 sps:$4 sm:$0xff]   ;;  %v13726_v44 = vmov 0  }
  0xb4   : > { %3142 = vmatprep.subr.bf16.mxu1 %v13016_v45  ;;  %12840 = vset.pattern.permute.xlu0 %v13726_v44  ;;  %v13077_v45 = vld [vmem:[%s13747_s9 + $0x530] ss:$72 sps:$4 sm:$0xff]  }
  0xb5   : > { %12841 = vset.pattern.permute.xlu1 %v13726_v44 }
  0xb6   : > { %3102 = vmatpush1.bf16.msra.mxu0 %v12987_v46  ;;  %v13104_v46 = vld [vmem:[%s13747_s9 + $0x538] ss:$72 sps:$4 sm:$0xff]  }
  0xb7   : > { %3143 = vmatpush1.bf16.msra.mxu1 %v13014_v47  ;;  %3103 = vmatprep.subr.bf16.mxu0 %v12995_v48  ;;  %v13085_v47 = vld [vmem:[%s13747_s9 + $0x5c4] ss:$72 sps:$4 sm:$0xff]  }
  0xb8   : > { %3144 = vmatprep.subr.bf16.mxu1 %v13022_v49  ;;  %v13112_v48 = vld [vmem:[%s13747_s9 + $0x5cc] ss:$72 sps:$4 sm:$0xff]   ;;  %v13083_v49 = vld [vmem:[%s13747_s9 + $0x5c0] ss:$72 sps:$4 sm:$0xff]  }
  0xba   : > { %3104 = vmatpush1.bf16.msra.mxu0 %v12993_v50  ;;  %v13110_v50 = vld [vmem:[%s13747_s9 + $0x5c8] ss:$72 sps:$4 sm:$0xff]  }
  0xbb   : > { %3145 = vmatpush1.bf16.msra.mxu1 %v13020_v51  ;;  %3105 = vmatprep.subr.bf16.mxu0 %v13001_v53  ;;  %v13091_v51 = vld [vmem:[%s13747_s9 + $0x654] ss:$72 sps:$4 sm:$0xff]  }
  0xbc   : > { %3146 = vmatprep.subr.bf16.mxu1 %v13028_v54  ;;  %v13118_v53 = vld [vmem:[%s13747_s9 + $0x65c] ss:$72 sps:$4 sm:$0xff]   ;;  %v13089_v54 = vld [vmem:[%s13747_s9 + $0x650] ss:$72 sps:$4 sm:$0xff]  }
  0xbe   : > { %3106 = vmatpush1.bf16.msra.mxu0 %v12999_v55  ;;  %v13116_v55 = vld [vmem:[%s13747_s9 + $0x658] ss:$72 sps:$4 sm:$0xff]  }
  0xbf   : > { %3147 = vmatpush1.bf16.msra.mxu1 %v13026_v56  ;;  %3107 = vmatprep.subr.bf16.mxu0 %v13007_v57  ;;  %v13097_v56 = vld [vmem:[%s13747_s9 + $0x6e4] ss:$72 sps:$4 sm:$0xff]  }
  0xc0   : > { %3148 = vmatprep.subr.bf16.mxu1 %v13034_v58  ;;  %v13124_v57 = vld [vmem:[%s13747_s9 + $0x6ec] ss:$72 sps:$4 sm:$0xff]   ;;  %v13095_v58 = vld [vmem:[%s13747_s9 + $0x6e0] ss:$72 sps:$4 sm:$0xff]  }
  0xc2   : > { %3108 = vmatpush1.bf16.msra.mxu0 %v13005_v59  ;;  %v13122_v59 = vld [vmem:[%s13747_s9 + $0x6e8] ss:$72 sps:$4 sm:$0xff]  }
  0xc3   : > { %3149 = vmatpush1.bf16.msra.mxu1 %v13032_v60  ;;  %3109 = vmatprep.subr.bf16.mxu0 %v13013_v61  ;;  %v13103_v60 = vld [vmem:[%s13747_s9 + $0x774] ss:$72 sps:$4 sm:$0xff]  }
  0xc4   : > { %3150 = vmatprep.subr.bf16.mxu1 %v13040_v62  ;;  %v13130_v61 = vld [vmem:[%s13747_s9 + $0x77c] ss:$72 sps:$4 sm:$0xff]   ;;  %v13101_v62 = vld [vmem:[%s13747_s9 + $0x770] ss:$72 sps:$4 sm:$0xff]  }
  0xc6   : > { %3110 = vmatpush1.bf16.msra.mxu0 %v13011_v63  ;;  %v13128_v63 = vld [vmem:[%s13747_s9 + $0x778] ss:$72 sps:$4 sm:$0xff]  }
  0xc7   : > { %3151 = vmatpush1.bf16.msra.mxu1 %v13038_v0  ;;  %3111 = vmatprep.subr.bf16.mxu0 %v13019_v1  ;;  %v13109_v0 = vld [vmem:[%s13747_s9 + $0x804] ss:$72 sps:$4 sm:$0xff]  }
  0xc8   : > { %3152 = vmatprep.subr.bf16.mxu1 %v13046_v2  ;;  %v13136_v1 = vld [vmem:[%s13747_s9 + $0x80c] ss:$72 sps:$4 sm:$0xff]   ;;  %v13107_v2 = vld [vmem:[%s13747_s9 + $0x800] ss:$72 sps:$4 sm:$0xff]  }
  0xca   : > { %3112 = vmatpush1.bf16.msra.mxu0 %v13017_v3  ;;  %v13134_v3 = vld [vmem:[%s13747_s9 + $0x808] ss:$72 sps:$4 sm:$0xff]  }
  0xcb   : > { %3153 = vmatpush1.bf16.msra.mxu1 %v13044_v4  ;;  %3163 = vmatprep.subr.bf16.mxu0 %v13025_v6  ;;  %v13115_v4 = vld [vmem:[%s13747_s9 + $0x894] ss:$72 sps:$4 sm:$0xff]  }
  0xcc   : > { %3204 = vmatprep.subr.bf16.mxu1 %v13052_v7  ;;  %v13142_v6 = vld [vmem:[%s13747_s9 + $0x89c] ss:$72 sps:$4 sm:$0xff]   ;;  %v13113_v7 = vld [vmem:[%s13747_s9 + $0x890] ss:$72 sps:$4 sm:$0xff]  }
  0xcd   : > { %3114 = vmatmul.mubr.bf16.vlgmr.msra.gmra.mrb[4].mxu0 %v14027_v5 }
  0xce   : > { %3155 = vmatmul.mubr.bf16.vlgmr.msra.gmra.mrb[4].mxu1 %v14027_v5  ;;  %3164 = vmatpush1.bf16.msra.mxu0 %v13023_v8  ;;  %v13140_v8 = vld [vmem:[%s13747_s9 + $0x898] ss:$72 sps:$4 sm:$0xff]  }
  0xcf   : > { %3205 = vmatpush1.bf16.msra.mxu1 %v13050_v9  ;;  %3165 = vmatprep.subr.bf16.mxu0 %v13031_v10  ;;  %v13121_v9 = vld [vmem:[%s13747_s9 + $0x34] ss:$72 sps:$4 sm:$0xff]  }
  0xd0   : > { %3206 = vmatprep.subr.bf16.mxu1 %v13058_v11  ;;  %3195 = vmatprep.mubr.bf16.mxu0 %v14007_v52  ;;  %v13148_v10 = vld [vmem:[%s13747_s9 + $0x3c] ss:$72 sps:$4 sm:$0xff]   ;;  %v13119_v11 = vld [vmem:[%s13747_s9 + $0x30] ss:$72 sps:$4 sm:$0xff]  }
  0xd1   : > { %3236 = vmatprep.mubr.bf16.mxu1 %v14007_v52 }
  0xd2   : > { %3166 = vmatpush1.bf16.msra.mxu0 %v13029_v12  ;;  %v13127_v12 = vld [vmem:[%s13747_s9 + $0xc4] ss:$72 sps:$4 sm:$0xff]  }
  0xd3   : > { %3207 = vmatpush1.bf16.msra.mxu1 %v13056_v13  ;;  %3167 = vmatprep.subr.bf16.mxu0 %v13037_v14  ;;  %v13146_v13 = vld [vmem:[%s13747_s9 + $0x38] ss:$72 sps:$4 sm:$0xff]   ;;  %v13154_v14 = vld [vmem:[%s13747_s9 + $0xcc] ss:$72 sps:$4 sm:$0xff]  }
  0xd4   : > { %3208 = vmatprep.subr.bf16.mxu1 %v13064_v15  ;;  %v13125_v15 = vld [vmem:[%s13747_s9 + $0xc0] ss:$72 sps:$4 sm:$0xff]  }
  0xd6   : > { %3168 = vmatpush1.bf16.msra.mxu0 %v13035_v16  ;;  %v13152_v16 = vld [vmem:[%s13747_s9 + $0xc8] ss:$72 sps:$4 sm:$0xff]  }
  0xd7   : > { %3209 = vmatpush1.bf16.msra.mxu1 %v13062_v17  ;;  %3169 = vmatprep.subr.bf16.mxu0 %v13043_v18  ;;  %v13133_v17 = vld [vmem:[%s13747_s9 + $0x154] ss:$72 sps:$4 sm:$0xff]  }
  0xd8   : > { %3210 = vmatprep.subr.bf16.mxu1 %v13070_v19  ;;  %v13160_v18 = vld [vmem:[%s13747_s9 + $0x15c] ss:$72 sps:$4 sm:$0xff]   ;;  %v13131_v19 = vld [vmem:[%s13747_s9 + $0x150] ss:$72 sps:$4 sm:$0xff]  }
  0xda   : > { %3170 = vmatpush1.bf16.msra.mxu0 %v13041_v20  ;;  %v13158_v20 = vld [vmem:[%s13747_s9 + $0x158] ss:$72 sps:$4 sm:$0xff]  }
  0xdb   : > { %3211 = vmatpush1.bf16.msra.mxu1 %v13068_v21  ;;  %3171 = vmatprep.subr.bf16.mxu0 %v13049_v22  ;;  %v13139_v21 = vld [vmem:[%s13747_s9 + $0x1e4] ss:$72 sps:$4 sm:$0xff]  }
  0xdc   : > { %3212 = vmatprep.subr.bf16.mxu1 %v13076_v23  ;;  %v13166_v22 = vld [vmem:[%s13747_s9 + $0x1ec] ss:$72 sps:$4 sm:$0xff]   ;;  %v13137_v23 = vld [vmem:[%s13747_s9 + $0x1e0] ss:$72 sps:$4 sm:$0xff]  }
  0xde   : > { %3172 = vmatpush1.bf16.msra.mxu0 %v13047_v24  ;;  %v13164_v24 = vld [vmem:[%s13747_s9 + $0x1e8] ss:$72 sps:$4 sm:$0xff]  }
  0xdf   : > { %3213 = vmatpush1.bf16.msra.mxu1 %v13074_v25  ;;  %3173 = vmatprep.subr.bf16.mxu0 %v13055_v26  ;;  %v13145_v25 = vld [vmem:[%s13747_s9 + $0x274] ss:$72 sps:$4 sm:$0xff]  }
  0xe0   : > { %3214 = vmatprep.subr.bf16.mxu1 %v13082_v27  ;;  %v13172_v26 = vld [vmem:[%s13747_s9 + $0x27c] ss:$72 sps:$4 sm:$0xff]   ;;  %v13143_v27 = vld [vmem:[%s13747_s9 + $0x270] ss:$72 sps:$4 sm:$0xff]  }
  0xe2   : > { %3174 = vmatpush1.bf16.msra.mxu0 %v13053_v28  ;;  %v13170_v28 = vld [vmem:[%s13747_s9 + $0x278] ss:$72 sps:$4 sm:$0xff]  }
  0xe3   : > { %3215 = vmatpush1.bf16.msra.mxu1 %v13080_v29  ;;  %3175 = vmatprep.subr.bf16.mxu0 %v13061_v30  ;;  %v13151_v29 = vld [vmem:[%s13747_s9 + $0x304] ss:$72 sps:$4 sm:$0xff]  }
  0xe4   : > { %3216 = vmatprep.subr.bf16.mxu1 %v13088_v31  ;;  %v13178_v30 = vld [vmem:[%s13747_s9 + $0x30c] ss:$72 sps:$4 sm:$0xff]   ;;  %v13149_v31 = vld [vmem:[%s13747_s9 + $0x300] ss:$72 sps:$4 sm:$0xff]  }
  0xe6   : > { %3176 = vmatpush1.bf16.msra.mxu0 %v13059_v32  ;;  %v13176_v32 = vld [vmem:[%s13747_s9 + $0x308] ss:$72 sps:$4 sm:$0xff]  }
  0xe7   : > { %3217 = vmatpush1.bf16.msra.mxu1 %v13086_v33  ;;  %3177 = vmatprep.subr.bf16.mxu0 %v13067_v34  ;;  %v13157_v33 = vld [vmem:[%s13747_s9 + $0x394] ss:$72 sps:$4 sm:$0xff]  }
  0xe8   : > { %3218 = vmatprep.subr.bf16.mxu1 %v13094_v35  ;;  %v13184_v34 = vld [vmem:[%s13747_s9 + $0x39c] ss:$72 sps:$4 sm:$0xff]   ;;  %v13155_v35 = vld [vmem:[%s13747_s9 + $0x390] ss:$72 sps:$4 sm:$0xff]  }
  0xea   : > { %3178 = vmatpush1.bf16.msra.mxu0 %v13065_v36  ;;  %v13182_v36 = vld [vmem:[%s13747_s9 + $0x398] ss:$72 sps:$4 sm:$0xff]  }
  0xeb   : > { %3219 = vmatpush1.bf16.msra.mxu1 %v13092_v37  ;;  %3179 = vmatprep.subr.bf16.mxu0 %v13073_v38  ;;  %v13163_v37 = vld [vmem:[%s13747_s9 + $0x424] ss:$72 sps:$4 sm:$0xff]  }
  0xec   : > { %3220 = vmatprep.subr.bf16.mxu1 %v13100_v39  ;;  %v13190_v38 = vld [vmem:[%s13747_s9 + $0x42c] ss:$72 sps:$4 sm:$0xff]   ;;  %v13161_v39 = vld [vmem:[%s13747_s9 + $0x420] ss:$72 sps:$4 sm:$0xff]  }
  0xee   : > { %3180 = vmatpush1.bf16.msra.mxu0 %v13071_v40  ;;  %v13169_v40 = vld [vmem:[%s13747_s9 + $0x4b4] ss:$72 sps:$4 sm:$0xff]  }
  0xef   : > { %3221 = vmatpush1.bf16.msra.mxu1 %v13098_v41  ;;  %3181 = vmatprep.subr.bf16.mxu0 %v13079_v42  ;;  %v13188_v41 = vld [vmem:[%s13747_s9 + $0x428] ss:$72 sps:$4 sm:$0xff]   ;;  %v13196_v42 = vld [vmem:[%s13747_s9 + $0x4bc] ss:$72 sps:$4 sm:$0xff]  }
  0xf0   : > { %3222 = vmatprep.subr.bf16.mxu1 %v13106_v43  ;;  %v13167_v43 = vld [vmem:[%s13747_s9 + $0x4b0] ss:$72 sps:$4 sm:$0xff]  }
  0xf2   : > { %3182 = vmatpush1.bf16.msra.mxu0 %v13077_v45  ;;  %v13194_v45 = vld [vmem:[%s13747_s9 + $0x4b8] ss:$72 sps:$4 sm:$0xff]  }
  0xf3   : > { %3223 = vmatpush1.bf16.msra.mxu1 %v13104_v46  ;;  %3183 = vmatprep.subr.bf16.mxu0 %v13085_v47  ;;  %v13175_v46 = vld [vmem:[%s13747_s9 + $0x544] ss:$72 sps:$4 sm:$0xff]  }
  0xf4   : > { %3224 = vmatprep.subr.bf16.mxu1 %v13112_v48  ;;  %v13202_v47 = vld [vmem:[%s13747_s9 + $0x54c] ss:$72 sps:$4 sm:$0xff]   ;;  %v13173_v48 = vld [vmem:[%s13747_s9 + $0x540] ss:$72 sps:$4 sm:$0xff]  }
  0xf6   : > { %3184 = vmatpush1.bf16.msra.mxu0 %v13083_v49  ;;  %v13200_v49 = vld [vmem:[%s13747_s9 + $0x548] ss:$72 sps:$4 sm:$0xff]  }
  0xf7   : > { %3225 = vmatpush1.bf16.msra.mxu1 %v13110_v50  ;;  %3185 = vmatprep.subr.bf16.mxu0 %v13091_v51  ;;  %v13181_v50 = vld [vmem:[%s13747_s9 + $0x5d4] ss:$72 sps:$4 sm:$0xff]  }
  0xf8   : > { %3226 = vmatprep.subr.bf16.mxu1 %v13118_v53  ;;  %v13208_v51 = vld [vmem:[%s13747_s9 + $0x5dc] ss:$72 sps:$4 sm:$0xff]   ;;  %v13179_v53 = vld [vmem:[%s13747_s9 + $0x5d0] ss:$72 sps:$4 sm:$0xff]  }
  0xfa   : > { %3186 = vmatpush1.bf16.msra.mxu0 %v13089_v54  ;;  %v13206_v54 = vld [vmem:[%s13747_s9 + $0x5d8] ss:$72 sps:$4 sm:$0xff]  }
  0xfb   : > { %3227 = vmatpush1.bf16.msra.mxu1 %v13116_v55  ;;  %3187 = vmatprep.subr.bf16.mxu0 %v13097_v56  ;;  %v13187_v55 = vld [vmem:[%s13747_s9 + $0x664] ss:$72 sps:$4 sm:$0xff]  }
  0xfc   : > { %3228 = vmatprep.subr.bf16.mxu1 %v13124_v57  ;;  %v13214_v56 = vld [vmem:[%s13747_s9 + $0x66c] ss:$72 sps:$4 sm:$0xff]   ;;  %v13185_v57 = vld [vmem:[%s13747_s9 + $0x660] ss:$72 sps:$4 sm:$0xff]  }
  0xfe   : > { %3188 = vmatpush1.bf16.msra.mxu0 %v13095_v58  ;;  %v13212_v58 = vld [vmem:[%s13747_s9 + $0x668] ss:$72 sps:$4 sm:$0xff]  }
  0xff   : > { %3229 = vmatpush1.bf16.msra.mxu1 %v13122_v59  ;;  %3189 = vmatprep.subr.bf16.mxu0 %v13103_v60  ;;  %v13193_v59 = vld [vmem:[%s13747_s9 + $0x6f4] ss:$72 sps:$4 sm:$0xff]  }
 0x100   : > { %3230 = vmatprep.subr.bf16.mxu1 %v13130_v61  ;;  %v13220_v60 = vld [vmem:[%s13747_s9 + $0x6fc] ss:$72 sps:$4 sm:$0xff]   ;;  %v13191_v61 = vld [vmem:[%s13747_s9 + $0x6f0] ss:$72 sps:$4 sm:$0xff]  }
 0x102   : > { %3190 = vmatpush1.bf16.msra.mxu0 %v13101_v62  ;;  %v13218_v62 = vld [vmem:[%s13747_s9 + $0x6f8] ss:$72 sps:$4 sm:$0xff]  }
 0x103   : > { %3231 = vmatpush1.bf16.msra.mxu1 %v13128_v63  ;;  %3191 = vmatprep.subr.bf16.mxu0 %v13109_v0  ;;  %v13199_v63 = vld [vmem:[%s13747_s9 + $0x784] ss:$72 sps:$4 sm:$0xff]  }
 0x104   : > { %3232 = vmatprep.subr.bf16.mxu1 %v13136_v1  ;;  %v13226_v0 = vld [vmem:[%s13747_s9 + $0x78c] ss:$72 sps:$4 sm:$0xff]   ;;  %v13197_v1 = vld [vmem:[%s13747_s9 + $0x780] ss:$72 sps:$4 sm:$0xff]  }
 0x106   : > { %3192 = vmatpush1.bf16.msra.mxu0 %v13107_v2  ;;  %v13224_v2 = vld [vmem:[%s13747_s9 + $0x788] ss:$72 sps:$4 sm:$0xff]  }
 0x107   : > { %3233 = vmatpush1.bf16.msra.mxu1 %v13134_v3  ;;  %3193 = vmatprep.subr.bf16.mxu0 %v13115_v4  ;;  %v13205_v3 = vld [vmem:[%s13747_s9 + $0x814] ss:$72 sps:$4 sm:$0xff]  }
 0x108   : > { %3234 = vmatprep.subr.bf16.mxu1 %v13142_v6  ;;  %v13232_v4 = vld [vmem:[%s13747_s9 + $0x81c] ss:$72 sps:$4 sm:$0xff]   ;;  %v13203_v6 = vld [vmem:[%s13747_s9 + $0x810] ss:$72 sps:$4 sm:$0xff]  }
 0x10a   : > { %3194 = vmatpush1.bf16.msra.mxu0 %v13113_v7  ;;  %v13230_v7 = vld [vmem:[%s13747_s9 + $0x818] ss:$72 sps:$4 sm:$0xff]  }
 0x10b   : > { %3235 = vmatpush1.bf16.msra.mxu1 %v13140_v8  ;;  %3245 = vmatprep.subr.bf16.mxu0 %v13121_v9  ;;  %v13211_v8 = vld [vmem:[%s13747_s9 + $0x8a4] ss:$72 sps:$4 sm:$0xff]  }
 0x10c   : > { %3286 = vmatprep.subr.bf16.mxu1 %v13148_v10  ;;  %v13238_v9 = vld [vmem:[%s13747_s9 + $0x8ac] ss:$72 sps:$4 sm:$0xff]   ;;  %v13209_v10 = vld [vmem:[%s13747_s9 + $0x8a0] ss:$72 sps:$4 sm:$0xff]  }
 0x10d   : > { %3196 = vmatmul.mubr.bf16.vlgmr.msra.gmra.mrb[8].mxu0 %v14027_v5 }
 0x10e   : > { %3237 = vmatmul.mubr.bf16.vlgmr.msra.gmra.mrb[8].mxu1 %v14027_v5  ;;  %3246 = vmatpush1.bf16.msra.mxu0 %v13119_v11  ;;  %v13236_v11 = vld [vmem:[%s13747_s9 + $0x8a8] ss:$72 sps:$4 sm:$0xff]  }
 0x10f   : > { %3287 = vmatpush1.bf16.msra.mxu1 %v13146_v13  ;;  %3247 = vmatprep.subr.bf16.mxu0 %v13127_v12  ;;  %v13217_v12 = vld [vmem:[%s13747_s9 + $0x44] ss:$72 sps:$4 sm:$0xff]   ;;  %v13215_v13 = vld [vmem:[%s13747_s9 + $0x40] ss:$72 sps:$4 sm:$0xff]  }
 0x110   : > { %3288 = vmatprep.subr.bf16.mxu1 %v13154_v14  ;;  %3277 = vmatprep.mubr.bf16.mxu0 %v14007_v52  ;;  %v13223_v14 = vld [vmem:[%s13747_s9 + $0xd4] ss:$72 sps:$4 sm:$0xff]  }
 0x111   : > { %3318 = vmatprep.mubr.bf16.mxu1 %v14007_v52 }
 0x112   : > { %3248 = vmatpush1.bf16.msra.mxu0 %v13125_v15  ;;  %v13221_v15 = vld [vmem:[%s13747_s9 + $0xd0] ss:$72 sps:$4 sm:$0xff]  }
 0x113   : > { %3289 = vmatpush1.bf16.msra.mxu1 %v13152_v16  ;;  %3249 = vmatprep.subr.bf16.mxu0 %v13133_v17  ;;  %v13229_v16 = vld [vmem:[%s13747_s9 + $0x164] ss:$72 sps:$4 sm:$0xff]   ;;  %v13227_v17 = vld [vmem:[%s13747_s9 + $0x160] ss:$72 sps:$4 sm:$0xff]  }
 0x114   : > { %3290 = vmatprep.subr.bf16.mxu1 %v13160_v18  ;;  %v13235_v18 = vld [vmem:[%s13747_s9 + $0x1f4] ss:$72 sps:$4 sm:$0xff]  }
 0x116   : > { %3250 = vmatpush1.bf16.msra.mxu0 %v13131_v19  ;;  %v13233_v19 = vld [vmem:[%s13747_s9 + $0x1f0] ss:$72 sps:$4 sm:$0xff]  }
 0x117   : > { %3291 = vmatpush1.bf16.msra.mxu1 %v13158_v20  ;;  %3251 = vmatprep.subr.bf16.mxu0 %v13139_v21  ;;  %v13241_v20 = vld [vmem:[%s13747_s9 + $0x284] ss:$72 sps:$4 sm:$0xff]   ;;  %v13727_v21 = vmov 65535  }
 0x118   : > { %3292 = vmatprep.subr.bf16.mxu1 %v13166_v22  ;;  %v3395_v22 = vsel %vm3393_vm0, 4294967295, %v13727_v21 }
 0x11a   : > { %3252 = vmatpush1.bf16.msra.mxu0 %v13137_v23  ;;  %v13239_v23 = vld [vmem:[%s13747_s9 + $0x280] ss:$72 sps:$4 sm:$0xff]  }
 0x11b   : > { %3293 = vmatpush1.bf16.msra.mxu1 %v13164_v24  ;;  %3253 = vmatprep.subr.bf16.mxu0 %v13145_v25  ;;  %v14248_v24 = vsel %vm3394_vm1, %v3395_v22, 0  ;;  %v13242_v25 = vld [vmem:[%s13747_s9 + $0x310] ss:$72 sps:$4 sm:$0xff]  }
 0x11c   : > { %3294 = vmatprep.subr.bf16.mxu1 %v13172_v26  ;;  %v13247_v26 = vld [vmem:[%s13747_s9 + $0x3a4] ss:$72 sps:$4 sm:$0xff]  }
 0x11e   : > { %3254 = vmatpush1.bf16.msra.mxu0 %v13143_v27 }
 0x11f   : > { %3295 = vmatpush1.bf16.msra.mxu1 %v13170_v28  ;;  %3255 = vmatprep.subr.bf16.mxu0 %v13151_v29  ;;  %v13245_v29 = vld [vmem:[%s13747_s9 + $0x3a0] ss:$72 sps:$4 sm:$0xff]  }
 0x120   : > { %3296 = vmatprep.subr.bf16.mxu1 %v13178_v30 }
 0x122   : > { %3256 = vmatpush1.bf16.msra.mxu0 %v13149_v31 }
 0x123   : > { %3297 = vmatpush1.bf16.msra.mxu1 %v13176_v32  ;;  %3257 = vmatprep.subr.bf16.mxu0 %v13157_v33  ;;  %v13250_v33 = vld [vmem:[%s13747_s9 + $0x434] ss:$72 sps:$4 sm:$0xff]  }
 0x124   : > { %3298 = vmatprep.subr.bf16.mxu1 %v13184_v34 }
 0x126   : > { %3258 = vmatpush1.bf16.msra.mxu0 %v13155_v35 }
 0x127   : > { %3299 = vmatpush1.bf16.msra.mxu1 %v13182_v36  ;;  %3259 = vmatprep.subr.bf16.mxu0 %v13163_v37 }
 0x128   : > { %3300 = vmatprep.subr.bf16.mxu1 %v13190_v38 }
 0x12a   : > { %3260 = vmatpush1.bf16.msra.mxu0 %v13161_v39 }
 0x12b   : > { %3301 = vmatpush1.bf16.msra.mxu1 %v13188_v41  ;;  %3261 = vmatprep.subr.bf16.mxu0 %v13169_v40 }
 0x12c   : > { %3302 = vmatprep.subr.bf16.mxu1 %v13196_v42  ;;  %v13248_v42 = vld [vmem:[%s13747_s9 + $0x430] ss:$72 sps:$4 sm:$0xff]  }
 0x12e   : > { %3262 = vmatpush1.bf16.msra.mxu0 %v13167_v43 }
 0x12f   : > { %3303 = vmatpush1.bf16.msra.mxu1 %v13194_v45  ;;  %3263 = vmatprep.subr.bf16.mxu0 %v13175_v46  ;;  %v11453_v46 = vld [vmem:[%s13752_s13 + $0x4] sm:$0xf] }
 0x130   : > { %3304 = vmatprep.subr.bf16.mxu1 %v13202_v47  ;;  %v13253_v47 = vld [vmem:[%s13747_s9 + $0x4c4] ss:$72 sps:$4 sm:$0xff]  }
 0x132   : > { %3264 = vmatpush1.bf16.msra.mxu0 %v13173_v48  ;;  %v13251_v48 = vld [vmem:[%s13747_s9 + $0x4c0] ss:$72 sps:$4 sm:$0xff]  }
 0x133   : > { %3305 = vmatpush1.bf16.msra.mxu1 %v13200_v49  ;;  %3265 = vmatprep.subr.bf16.mxu0 %v13181_v50  ;;  %v13256_v50 = vld [vmem:[%s13747_s9 + $0x554] ss:$72 sps:$4 sm:$0xff]  }
 0x134   : > { %3306 = vmatprep.subr.bf16.mxu1 %v13208_v51  ;;  %v13254_v51 = vld [vmem:[%s13747_s9 + $0x550] ss:$72 sps:$4 sm:$0xff]  }
 0x136   : > { %3266 = vmatpush1.bf16.msra.mxu0 %v13179_v53  ;;  %v13259_v53 = vld [vmem:[%s13747_s9 + $0x5e4] ss:$72 sps:$4 sm:$0xff]  }
 0x137   : > { %3307 = vmatpush1.bf16.msra.mxu1 %v13206_v54  ;;  %3267 = vmatprep.subr.bf16.mxu0 %v13187_v55  ;;  %v3386_v54 = vld [vmem:[%s13752_s13] sm:$0xf] }
 0x138   : > { %3308 = vmatprep.subr.bf16.mxu1 %v13214_v56  ;;  %v13257_v55 = vld [vmem:[%s13747_s9 + $0x5e0] ss:$72 sps:$4 sm:$0xff]   ;;  %v13262_v56 = vld [vmem:[%s13747_s9 + $0x674] ss:$72 sps:$4 sm:$0xff]  }
 0x13a   : > { %3268 = vmatpush1.bf16.msra.mxu0 %v13185_v57  ;;  %v13260_v57 = vld [vmem:[%s13747_s9 + $0x670] ss:$72 sps:$4 sm:$0xff]  }
 0x13b   : > { %3309 = vmatpush1.bf16.msra.mxu1 %v13212_v58  ;;  %3269 = vmatprep.subr.bf16.mxu0 %v13193_v59  ;;  %v13265_v58 = vld [vmem:[%s13747_s9 + $0x704] ss:$72 sps:$4 sm:$0xff]   ;;  %v13263_v59 = vld [vmem:[%s13747_s9 + $0x700] ss:$72 sps:$4 sm:$0xff]  }
 0x13c   : > { %3310 = vmatprep.subr.bf16.mxu1 %v13220_v60  ;;  %v13268_v60 = vld [vmem:[%s13747_s9 + $0x794] ss:$72 sps:$4 sm:$0xff]  }
 0x13e   : > { %3270 = vmatpush1.bf16.msra.mxu0 %v13191_v61  ;;  %v13266_v61 = vld [vmem:[%s13747_s9 + $0x790] ss:$72 sps:$4 sm:$0xff]  }
 0x13f   : > { %3311 = vmatpush1.bf16.msra.mxu1 %v13218_v62  ;;  %3271 = vmatprep.subr.bf16.mxu0 %v13199_v63  ;;  %v13271_v62 = vld [vmem:[%s13747_s9 + $0x824] ss:$72 sps:$4 sm:$0xff]   ;;  %v13269_v63 = vld [vmem:[%s13747_s9 + $0x820] ss:$72 sps:$4 sm:$0xff]  }
 0x140   : > { %3312 = vmatprep.subr.bf16.mxu1 %v13226_v0  ;;  %v13274_v0 = vld [vmem:[%s13747_s9 + $0x8b4] ss:$72 sps:$4 sm:$0xff]  }
 0x142   : > { %3272 = vmatpush1.bf16.msra.mxu0 %v13197_v1  ;;  %v13272_v1 = vld [vmem:[%s13747_s9 + $0x8b0] ss:$72 sps:$4 sm:$0xff]  }
 0x143   : > { %3313 = vmatpush1.bf16.msra.mxu1 %v13224_v2  ;;  %3273 = vmatprep.subr.bf16.mxu0 %v13205_v3 }
 0x144   : > { %3314 = vmatprep.subr.bf16.mxu1 %v13232_v4 }
 0x146   : > { %3274 = vmatpush1.bf16.msra.mxu0 %v13203_v6 }
 0x147   : > { %3315 = vmatpush1.bf16.msra.mxu1 %v13230_v7  ;;  %3275 = vmatprep.subr.bf16.mxu0 %v13211_v8 }
 0x148   : > { %3316 = vmatprep.subr.bf16.mxu1 %v13238_v9 }
 0x14a   : > { %3276 = vmatpush1.bf16.msra.mxu0 %v13209_v10 }
 0x14b   : > { %3317 = vmatpush1.bf16.msra.mxu1 %v13236_v11  ;;  %3327 = vmatprep.subr.bf16.mxu0 %v13217_v12 }
 0x14d   : > { %3278 = vmatmul.mubr.bf16.vlgmr.msra.gmra.mrb[12].mxu0 %v14027_v5 }
 0x14e   : > { %3319 = vmatmul.mubr.bf16.vlgmr.msra.gmra.mrb[12].mxu1 %v14027_v5  ;;  %3328 = vmatpush1.bf16.msra.mxu0 %v13215_v13 }
 0x14f   : > { %3435 = vmatprep.mubr.bf16.mxu1 %v13726_v44  ;;  %3329 = vmatprep.subr.bf16.mxu0 %v13223_v14 }
 0x150   : > { %3359 = vmatprep.mubr.bf16.mxu0 %v14007_v52  ;;  %v13244_v52 = vld [vmem:[%s13747_s9 + $0x314] ss:$72 sps:$4 sm:$0xff]  }
 0x152   : > { %3330 = vmatpush1.bf16.msra.mxu0 %v13221_v15 }
 0x153   : > { %3331 = vmatprep.subr.bf16.mxu0 %v13229_v16 }
 0x156   : > { %3332 = vmatpush1.bf16.msra.mxu0 %v13227_v17 }
 0x157   : > { %3333 = vmatprep.subr.bf16.mxu0 %v13235_v18  ;;  %v11456_v18 = vld [vmem:[%s13752_s13 + $0x8] sm:$0xf] }
 0x15a   : > { %3334 = vmatpush1.bf16.msra.mxu0 %v13233_v19  ;;  %v11458_v19 = vld [vmem:[%s13752_s13 + $0xc] sm:$0xf] }
 0x15b   : > { %3335 = vmatprep.subr.bf16.mxu0 %v13241_v20 }
 0x15e   : > { %3336 = vmatpush1.bf16.msra.mxu0 %v13239_v23 }
 0x15f   : > { %3337 = vmatprep.subr.bf16.mxu0 %v13244_v52 }
 0x160   : > { %v3033_v27 = vpop.f32.mrb[0].mxu0 }
 0x161   : > { %v3074_v28 = vpop.f32.mrb[0].mxu1  ;;  %v3035_v31 = vpop.f32.mrb[1].mxu0  ;;  %v3368_v43 = vpack.c.bf16 %v3033_v27, %v3033_v27 }
 0x162   : > { %v3370_v30 = vpack.c.bf16 %v3074_v28, %v3074_v28  ;;  %v3076_v32 = vpop.f32.mrb[1].mxu1  ;;  %v3369_v34 = vpack.c.bf16 %v3035_v31, %v3035_v31  ;;  %v3037_v36 = vpop.f32.mrb[2].mxu0  ;;  %3338 = vmatpush1.bf16.msra.mxu0 %v13242_v25 }
 0x163   : > { %v3371_v35 = vpack.c.bf16 %v3076_v32, %v3076_v32  ;;  %v3078_v37 = vpop.f32.mrb[2].mxu1  ;;  %v3038_v39 = vpop.f32.mrb[3].mxu0  ;;  %3339 = vmatprep.subr.bf16.mxu0 %v13247_v26  ;;  %v3448_v49 = vand.u32 %v14248_v24, %v3368_v43  ;;  %v11460_v36 = vld [vmem:[%s13752_s13 + $0x10] sm:$0xf]  ;;  %v9377_v43 = vld [vmem:[%s13852_s12 + $0x8] sm:$0xff] }
 0x164   : > { %v3398_v38 = vand.u32 %v14248_v24, %v3370_v30  ;;  %v3079_v40 = vpop.f32.mrb[3].mxu1  ;;  %v3451_v45 = vand.u32 %v14248_v24, %v3369_v34  ;;  %v3872_v37 = vld [vmem:[%s13757_s17] sm:$0xff]  ;;  %v11462_v39 = vld [vmem:[%s13752_s13 + $0x14] sm:$0xf] }
 0x165   : > { %v3401_v41 = vand.u32 %v14248_v24, %v3371_v35  ;;  %3875 = vperm.xlu0 %12840, %v3872_v37   ;;  %v7499_v40 = vld [vmem:[%s15280_s6 + $0x8] sm:$0xff] }
 0x166   : > { %3340 = vmatpush1.bf16.msra.mxu0 %v13245_v29 }
 0x167   : > { %3403 = vmatprep.subr.bf16.mxu1 %v3401_v41  ;;  %3341 = vmatprep.subr.bf16.mxu0 %v13250_v33  ;;  %v8279_v41 = vld [vmem:[%s13817_s20 + $0x8] sm:$0xff] }
 0x168   : > { %3404 = vmatpush1.bf16.msra.mxu1 %v3398_v38  ;;  %v5876_v38 = vld [vmem:[%s15283_s3] sm:$0xff]  ;;  %s15302_s3 = sld [smem:[#allocation21_spill]] }
 0x169   : > { %3453 = vmatprep.subr.bf16.mxu1 %v3451_v45  ;;  %5879 = vperm.xlu0 %12840, %v5876_v38   ;;  %v9379_v45 = vld [vmem:[%s13852_s12 + $0x18] sm:$0xff] }
 0x16a   : > { %3342 = vmatpush1.bf16.msra.mxu0 %v13248_v42  ;;  %v8368_v42 = vld [vmem:[%s15281_s4 + $0x8] sm:$0xff] }
 0x16b   : > { %11454 = vmatmul.mubr.msk.bf16.vlgmr.msra.gmra.mrb[16].mxu1 %vm3389_vm2, %v11453_v46  ;;  %3343 = vmatprep.subr.bf16.mxu0 %v13253_v47  ;;  %v10429_v46 = vld [vmem:[%s13862_s27 + $0x8] sm:$0xff] }
 0x16c   : > { %3454 = vmatpush1.bf16.msra.mxu1 %v3448_v49  ;;  %3485 = vmatprep.mubr.bf16.mxu1 %v13726_v44  ;;  %v10511_v47 = vld [vmem:[%s13872_s19 + $0x8] sm:$0xff]  ;;  %v10513_v49 = vld [vmem:[%s13872_s19 + $0x18] sm:$0xff] }
 0x16d   : > { %7507 = vperm.xlu0 %12840, %v7499_v40  }
 0x16e   : > { %3344 = vmatpush1.bf16.msra.mxu0 %v13251_v48  ;;  %v10431_v48 = vld [vmem:[%s13862_s27 + $0x18] sm:$0xff] }
 0x16f   : > { %3345 = vmatprep.subr.bf16.mxu0 %v13256_v50 }
 0x171   : > { %8287 = vperm.xlu0 %12840, %v8279_v41  }
 0x172   : > { %3346 = vmatpush1.bf16.msra.mxu0 %v13254_v51 }
 0x173   : > { %11455 = vmatmul.mubr.msk.bf16.vlgmr.msra.gmra.mrb[20].mxu1 %vm3389_vm2, %v3386_v54  ;;  %3347 = vmatprep.subr.bf16.mxu0 %v13259_v53 }
 0x174   : > { %3537 = vmatprep.mubr.bf16.mxu1 %v13726_v44 }
 0x175   : > { %8376 = vperm.xlu0 %12840, %v8368_v42   ;;  %v13287_v42 = vld [vmem:[%s13762_s21 + $0x90] ss:$36 sps:$4 sm:$0xff]  }
 0x176   : > { %3348 = vmatpush1.bf16.msra.mxu0 %v13257_v55 }
 0x177   : > { %3349 = vmatprep.subr.bf16.mxu0 %v13262_v56 }
 0x179   : > { %9387 = vperm.xlu0 %12840, %v9377_v43   ;;  %v13289_v43 = vld [vmem:[%s13762_s21 + $0x94] ss:$36 sps:$4 sm:$0xff]  }
 0x17a   : > { %3350 = vmatpush1.bf16.msra.mxu0 %v13260_v57 }
 0x17b   : > { %3351 = vmatprep.subr.bf16.mxu0 %v13265_v58 }
 0x17d   : > { %9397 = vperm.xlu0 %12840, %v9379_v45  }
 0x17e   : > { %3352 = vmatpush1.bf16.msra.mxu0 %v13263_v59 }
 0x17f   : > { %3353 = vmatprep.subr.bf16.mxu0 %v13268_v60 }
 0x181   : > { %10439 = vperm.xlu0 %12840, %v10429_v46   ;;  %v13290_v46 = vld [vmem:[%s13762_s21 + $0x98] ss:$36 sps:$4 sm:$0xff]  }
 0x182   : > { %3354 = vmatpush1.bf16.msra.mxu0 %v13266_v61 }
 0x183   : > { %3355 = vmatprep.subr.bf16.mxu0 %v13271_v62 }
 0x185   : > { %10521 = vperm.xlu0 %12840, %v10511_v47   ;;  %v13292_v47 = vld [vmem:[%s13762_s21 + $0x9c] ss:$36 sps:$4 sm:$0xff]  }
 0x186   : > { %3356 = vmatpush1.bf16.msra.mxu0 %v13269_v63 }
 0x187   : > { %3357 = vmatprep.subr.bf16.mxu0 %v13274_v0 }
 0x189   : > { %10449 = vperm.xlu0 %12840, %v10431_v48   ;;  %v13295_v48 = vld [vmem:[%s13762_s21 + $0xdc] ss:$36 sps:$4 sm:$0xff]  }
 0x18a   : > { %3358 = vmatpush1.bf16.msra.mxu0 %v13272_v1 }
 0x18d   : > { %3360 = vmatmul.mubr.bf16.vlgmr.msra.gmra.mrb[16].mxu0 %v14027_v5  ;;  %10531 = vperm.xlu0 %12840, %v10513_v49   ;;  %v13293_v49 = vld [vmem:[%s13762_s21 + $0xd8] ss:$36 sps:$4 sm:$0xff]  }
 0x18e   : > { %3861 = vmatprep.mubr.bf16.mxu0 %v13726_v44 }
 0x1a0   : > { %v3115_v2 = vpop.f32.mrb[4].mxu0 }
 0x1a1   : > { %v3156_v3 = vpop.f32.mrb[4].mxu1  ;;  %v3372_v4 = vpack.c.bf16 %v3115_v2, %v3115_v2  ;;  %v3117_v6 = vpop.f32.mrb[5].mxu0 }
 0x1a2   : > { %v3158_v7 = vpop.f32.mrb[5].mxu1  ;;  %v3373_v8 = vpack.c.bf16 %v3117_v6, %v3117_v6  ;;  %v3119_v9 = vpop.f32.mrb[6].mxu0  ;;  %v3374_v14 = vpack.c.bf16 %v3156_v3, %v3156_v3  ;;  %v11464_v3 = vld [vmem:[%s13752_s13 + $0x18] sm:$0xf] }
 0x1a3   : > { %v3375_v10 = vpack.c.bf16 %v3158_v7, %v3158_v7  ;;  %v3160_v11 = vpop.f32.mrb[6].mxu1  ;;  %v3500_v12 = vand.u32 %v14248_v24, %v3372_v4  ;;  %v3120_v13 = vpop.f32.mrb[7].mxu0  ;;  %v11466_v4 = vld [vmem:[%s13752_s13 + $0x1c] sm:$0xf] }
 0x1a4   : > { %v3161_v15 = vpop.f32.mrb[7].mxu1  ;;  %v3503_v5 = vand.u32 %v14248_v24, %v3373_v8  ;;  %v3554_v17 = vand.u32 %v14248_v24, %v3374_v14 }
 0x1a5   : > { %v3557_v16 = vand.u32 %v14248_v24, %v3375_v10  ;;  %v13275_v15 = vld [vmem:[%s13762_s21] ss:$36 sps:$4 sm:$0xff]  }
 0x1a6   : > { %3505 = vmatprep.subr.bf16.mxu1 %v3503_v5  ;;  %v13277_v5 = vld [vmem:[%s13762_s21 + $0x4] ss:$36 sps:$4 sm:$0xff]  }
 0x1a7   : > { %3506 = vmatpush1.bf16.msra.mxu1 %v3500_v12 }
 0x1a8   : > { %3559 = vmatprep.subr.bf16.mxu1 %v3557_v16 }
 0x1aa   : > { %11457 = vmatmul.mubr.msk.bf16.vlgmr.msra.gmra.mrb[24].mxu1 %vm3389_vm2, %v11456_v18 }
 0x1ab   : > { %3560 = vmatpush1.bf16.msra.mxu1 %v3554_v17  ;;  %3591 = vmatprep.mubr.bf16.mxu1 %v13726_v44 }
 0x1b2   : > { %11459 = vmatmul.mubr.msk.bf16.vlgmr.msra.gmra.mrb[28].mxu1 %vm3389_vm2, %v11458_v19 }
 0x1b3   : > { %3645 = vmatprep.mubr.bf16.mxu1 %v13726_v44 }
 0x1e0   : > { %v3197_v20 = vpop.f32.mrb[8].mxu0 }
 0x1e1   : > { %v3238_v21 = vpop.f32.mrb[8].mxu1  ;;  %v3376_v22 = vpack.c.bf16 %v3197_v20, %v3197_v20  ;;  %v3199_v23 = vpop.f32.mrb[9].mxu0 }
 0x1e2   : > { %v3240_v52 = vpop.f32.mrb[9].mxu1  ;;  %v3377_v25 = vpack.c.bf16 %v3199_v23, %v3199_v23  ;;  %v3201_v26 = vpop.f32.mrb[10].mxu0  ;;  %v3378_v31 = vpack.c.bf16 %v3238_v21, %v3238_v21 }
 0x1e3   : > { %v3379_v27 = vpack.c.bf16 %v3240_v52, %v3240_v52  ;;  %v3242_v28 = vpop.f32.mrb[10].mxu1  ;;  %v3608_v29 = vand.u32 %v14248_v24, %v3376_v22  ;;  %v3202_v30 = vpop.f32.mrb[11].mxu0  ;;  %v13280_v52 = vld [vmem:[%s13762_s21 + $0xc] ss:$36 sps:$4 sm:$0xff]   ;;  %v11468_v26 = vld [vmem:[%s13752_s13 + $0x20] sm:$0xf] }
 0x1e4   : > { %v3243_v32 = vpop.f32.mrb[11].mxu1  ;;  %v3611_v33 = vand.u32 %v14248_v24, %v3377_v25  ;;  %v3662_v35 = vand.u32 %v14248_v24, %v3378_v31 }
 0x1e5   : > { %v3665_v34 = vand.u32 %v14248_v24, %v3379_v27  ;;  %v13278_v27 = vld [vmem:[%s13762_s21 + $0x8] ss:$36 sps:$4 sm:$0xff]  }
 0x1e6   : > { %3613 = vmatprep.subr.bf16.mxu1 %v3611_v33  ;;  %v13281_v33 = vld [vmem:[%s13762_s21 + $0x48] ss:$36 sps:$4 sm:$0xff]  }
 0x1e7   : > { %3614 = vmatpush1.bf16.msra.mxu1 %v3608_v29 }
 0x1e8   : > { %3667 = vmatprep.subr.bf16.mxu1 %v3665_v34  ;;  %v13283_v34 = vld [vmem:[%s13762_s21 + $0x4c] ss:$36 sps:$4 sm:$0xff]  }
 0x1ea   : > { %11461 = vmatmul.mubr.msk.bf16.vlgmr.msra.gmra.mrb[32].mxu1 %vm3389_vm2, %v11460_v36  ;;  %v13286_v36 = vld [vmem:[%s13762_s21 + $0x54] ss:$36 sps:$4 sm:$0xff]  }
 0x1eb   : > { %3668 = vmatpush1.bf16.msra.mxu1 %v3662_v35  ;;  %3699 = vmatprep.mubr.bf16.mxu1 %v13726_v44  ;;  %v13284_v35 = vld [vmem:[%s13762_s21 + $0x50] ss:$36 sps:$4 sm:$0xff]  }
 0x1f2   : > { %11463 = vmatmul.mubr.msk.bf16.vlgmr.msra.gmra.mrb[36].mxu1 %vm3389_vm2, %v11462_v39 }
 0x1f3   : > { %3753 = vmatprep.mubr.bf16.mxu1 %v13726_v44 }
 0x220   : > { %v3279_v50 = vpop.f32.mrb[12].mxu0 }
 0x221   : > { %v3320_v51 = vpop.f32.mrb[12].mxu1  ;;  %v3380_v53 = vpack.c.bf16 %v3279_v50, %v3279_v50  ;;  %v3281_v54 = vpop.f32.mrb[13].mxu0  ;;  %v13298_v50 = vld [vmem:[%s13762_s21 + $0xe4] ss:$36 sps:$4 sm:$0xff]  }
 0x222   : > { %v3322_v55 = vpop.f32.mrb[13].mxu1  ;;  %v3381_v56 = vpack.c.bf16 %v3281_v54, %v3281_v54  ;;  %v3283_v57 = vpop.f32.mrb[14].mxu0  ;;  %v3382_v62 = vpack.c.bf16 %v3320_v51, %v3320_v51  ;;  %v13296_v51 = vld [vmem:[%s13762_s21 + $0xe0] ss:$36 sps:$4 sm:$0xff]   ;;  %v13304_v54 = vld [vmem:[%s13762_s21 + $0x12c] ss:$36 sps:$4 sm:$0xff]  }
 0x223   : > { %v3383_v58 = vpack.c.bf16 %v3322_v55, %v3322_v55  ;;  %v3324_v59 = vpop.f32.mrb[14].mxu1  ;;  %v3716_v60 = vand.u32 %v14248_v24, %v3380_v53  ;;  %v3284_v61 = vpop.f32.mrb[15].mxu0  ;;  %v13301_v53 = vld [vmem:[%s13762_s21 + $0x124] ss:$36 sps:$4 sm:$0xff]   ;;  %v13307_v57 = vld [vmem:[%s13762_s21 + $0x16c] ss:$36 sps:$4 sm:$0xff]  }
 0x224   : > { %v3325_v63 = vpop.f32.mrb[15].mxu1  ;;  %v3719_v0 = vand.u32 %v14248_v24, %v3381_v56  ;;  %v3770_v2 = vand.u32 %v14248_v24, %v3382_v62  ;;  %v13299_v55 = vld [vmem:[%s13762_s21 + $0x120] ss:$36 sps:$4 sm:$0xff]   ;;  %v13302_v56 = vld [vmem:[%s13762_s21 + $0x128] ss:$36 sps:$4 sm:$0xff]  }
 0x225   : > { %v3773_v1 = vand.u32 %v14248_v24, %v3383_v58  ;;  %v13310_v58 = vld [vmem:[%s13762_s21 + $0x174] ss:$36 sps:$4 sm:$0xff]   ;;  %v13305_v59 = vld [vmem:[%s13762_s21 + $0x168] ss:$36 sps:$4 sm:$0xff]   ;;  %v13316_v62 = vld [vmem:[%s13762_s21 + $0x1bc] ss:$36 sps:$4 sm:$0xff]  }
 0x226   : > { %3721 = vmatprep.subr.bf16.mxu1 %v3719_v0  ;;  %v13313_v61 = vld [vmem:[%s13762_s21 + $0x1b4] ss:$36 sps:$4 sm:$0xff]  }
 0x227   : > { %3722 = vmatpush1.bf16.msra.mxu1 %v3716_v60  ;;  %v13308_v60 = vld [vmem:[%s13762_s21 + $0x170] ss:$36 sps:$4 sm:$0xff]   ;;  %v13314_v0 = vld [vmem:[%s13762_s21 + $0x1b8] ss:$36 sps:$4 sm:$0xff]  }
 0x228   : > { %3775 = vmatprep.subr.bf16.mxu1 %v3773_v1  ;;  %v13311_v63 = vld [vmem:[%s13762_s21 + $0x1b0] ss:$36 sps:$4 sm:$0xff]   ;;  %v13319_v1 = vld [vmem:[%s13762_s21 + $0x1fc] ss:$36 sps:$4 sm:$0xff]  }
 0x22a   : > { %11465 = vmatmul.mubr.msk.bf16.vlgmr.msra.gmra.mrb[40].mxu1 %vm3389_vm2, %v11464_v3  ;;  %v13317_v3 = vld [vmem:[%s13762_s21 + $0x1f8] ss:$36 sps:$4 sm:$0xff]  }
 0x22b   : > { %3776 = vmatpush1.bf16.msra.mxu1 %v3770_v2  ;;  %3807 = vmatprep.mubr.bf16.mxu1 %v13726_v44  ;;  %v13322_v2 = vld [vmem:[%s13762_s21 + $0x204] ss:$36 sps:$4 sm:$0xff]  }
 0x22c   : > { %4782 = vmatprep.subr.bf16.mxu1 %v13277_v5  ;;  %v13335_v5 = vld [vmem:[%s13762_s21 + $0x2d0] ss:$36 sps:$4 sm:$0xff]  }
 0x232   : > { %11467 = vmatmul.mubr.msk.bf16.vlgmr.msra.gmra.mrb[44].mxu1 %vm3389_vm2, %v11466_v4  ;;  %v13320_v4 = vld [vmem:[%s13762_s21 + $0x200] ss:$36 sps:$4 sm:$0xff]  }
 0x233   : > { %4783 = vmatpush1.bf16.msra.mxu1 %v13275_v15  ;;  %v13340_v15 = vld [vmem:[%s13762_s21 + $0x2dc] ss:$36 sps:$4 sm:$0xff]  }
 0x234   : > { %4784 = vmatprep.subr.bf16.mxu1 %v13283_v34  ;;  %v13359_v34 = vld [vmem:[%s13762_s21 + $0x3f0] ss:$36 sps:$4 sm:$0xff]  }
 0x237   : > { %4785 = vmatpush1.bf16.msra.mxu1 %v13281_v33 }
 0x238   : > { %4786 = vmatprep.subr.bf16.mxu1 %v13289_v43  ;;  %v13368_v43 = vld [vmem:[%s13762_s21 + $0x440] ss:$36 sps:$4 sm:$0xff]  }
 0x23b   : > { %4787 = vmatpush1.bf16.msra.mxu1 %v13287_v42  ;;  %v13365_v42 = vld [vmem:[%s13762_s21 + $0x438] ss:$36 sps:$4 sm:$0xff]  }
 0x23c   : > { %4788 = vmatprep.subr.bf16.mxu1 %v13295_v48 }
 0x23e   : > { %v3437_v6 = vpop.f32.mrb[16].mxu1 }
 0x23f   : > { %v3439_v7 = vpop.f32.mrb[17].mxu1  ;;  %4789 = vmatpush1.bf16.msra.mxu1 %v13293_v49 }
 0x240   : > { %v3441_v8 = vpop.f32.mrb[18].mxu1  ;;  %4790 = vmatprep.subr.bf16.mxu1 %v13301_v53 }
 0x241   : > { %v3442_v9 = vpop.f32.mrb[19].mxu1  ;;  %v13323_v8 = vld [vmem:[%s13762_s21 + $0x240] ss:$36 sps:$4 sm:$0xff]  }
 0x242   : > { %v13326_v9 = vld [vmem:[%s13762_s21 + $0x248] ss:$36 sps:$4 sm:$0xff]  }
 0x243   : > { %4791 = vmatpush1.bf16.msra.mxu1 %v13299_v55 }
 0x244   : > { %4792 = vmatprep.subr.bf16.mxu1 %v13307_v57 }
 0x246   : > { %v3487_v10 = vpop.f32.mrb[20].mxu1 }
 0x247   : > { %v3488_v11 = vadd.f32 %v3487_v10, %v3437_v6  ;;  %v3489_v12 = vpop.f32.mrb[21].mxu1  ;;  %4793 = vmatpush1.bf16.msra.mxu1 %v13305_v59  ;;  %v13325_v6 = vld [vmem:[%s13762_s21 + $0x244] ss:$36 sps:$4 sm:$0xff]   ;;  %v13331_v10 = vld [vmem:[%s13762_s21 + $0x28c] ss:$36 sps:$4 sm:$0xff]  }
 0x248   : > { %v3490_v13 = vadd.f32 %v3489_v12, %v3439_v7  ;;  %v3491_v14 = vpop.f32.mrb[22].mxu1  ;;  %4794 = vmatprep.subr.bf16.mxu1 %v13313_v61  ;;  %v13328_v7 = vld [vmem:[%s13762_s21 + $0x24c] ss:$36 sps:$4 sm:$0xff]  }
 0x249   : > { %v3492_v16 = vpop.f32.mrb[23].mxu1  ;;  %v13329_v12 = vld [vmem:[%s13762_s21 + $0x288] ss:$36 sps:$4 sm:$0xff]   ;;  %v13337_v14 = vld [vmem:[%s13762_s21 + $0x2d4] ss:$36 sps:$4 sm:$0xff]  }
 0x24a   : > { %v13338_v16 = vld [vmem:[%s13762_s21 + $0x2d8] ss:$36 sps:$4 sm:$0xff]  }
 0x24b   : > { %4795 = vmatpush1.bf16.msra.mxu1 %v13311_v63 }
 0x24c   : > { %4796 = vmatprep.subr.bf16.mxu1 %v13319_v1 }
 0x24f   : > { %4797 = vmatpush1.bf16.msra.mxu1 %v13317_v3  ;;  %v3876_v3 = vpop.permute.xlu0 %3875 }
 0x250   : > { %4798 = vmatprep.subr.bf16.mxu1 %v13325_v6 }
 0x253   : > { %4799 = vmatpush1.bf16.msra.mxu1 %v13323_v8 }
 0x254   : > { %4800 = vmatprep.subr.bf16.mxu1 %v13331_v10 }
 0x257   : > { %4801 = vmatpush1.bf16.msra.mxu1 %v13329_v12 }
 0x258   : > { %4802 = vmatprep.subr.bf16.mxu1 %v13337_v14  ;;  %v13374_v14 = vld [vmem:[%s13762_s21 + $0x18] ss:$36 sps:$4 sm:$0xff]  }
 0x25b   : > { %4803 = vmatpush1.bf16.msra.mxu1 %v13335_v5  ;;  %v13379_v5 = vld [vmem:[%s13762_s21 + $0x5c] ss:$36 sps:$4 sm:$0xff]  }
 0x260   : > { %v3361_v17 = vpop.f32.mrb[16].mxu0 }
 0x261   : > { %v3384_v18 = vpack.c.bf16 %v3361_v17, %v3361_v17  ;;  %v3363_v19 = vpop.f32.mrb[17].mxu0  ;;  %v13343_v17 = vld [vmem:[%s13762_s21 + $0x31c] ss:$36 sps:$4 sm:$0xff]  }
 0x262   : > { %v3385_v20 = vpack.c.bf16 %v3363_v19, %v3363_v19  ;;  %v3365_v21 = vpop.f32.mrb[18].mxu0  ;;  %v13341_v19 = vld [vmem:[%s13762_s21 + $0x318] ss:$36 sps:$4 sm:$0xff]   ;;  %4804 = vmatprep.subr.bf16.mxu1 %v13343_v17 }
 0x263   : > { %v3366_v22 = vpop.f32.mrb[19].mxu0  ;;  %v3824_v25 = vand.u32 %v14248_v24, %v3384_v18  ;;  %v13346_v18 = vld [vmem:[%s13762_s21 + $0x324] ss:$36 sps:$4 sm:$0xff]   ;;  %4805 = vmatpush1.bf16.msra.mxu1 %v13341_v19  ;;  %v13377_v17 = vld [vmem:[%s13762_s21 + $0x58] ss:$36 sps:$4 sm:$0xff]  }
 0x264   : > { %v3827_v23 = vand.u32 %v14248_v24, %v3385_v20  ;;  %v13344_v20 = vld [vmem:[%s13762_s21 + $0x320] ss:$36 sps:$4 sm:$0xff]   ;;  %v13352_v22 = vld [vmem:[%s13762_s21 + $0x36c] ss:$36 sps:$4 sm:$0xff]  }
 0x265   : > { %v13349_v21 = vld [vmem:[%s13762_s21 + $0x364] ss:$36 sps:$4 sm:$0xff]  }
 0x266   : > { %3829 = vmatprep.subr.bf16.mxu0 %v3827_v23  ;;  %v13347_v23 = vld [vmem:[%s13762_s21 + $0x360] ss:$36 sps:$4 sm:$0xff]   ;;  %4806 = vmatprep.subr.bf16.mxu1 %v13349_v21 }
 0x267   : > { %3830 = vmatpush1.bf16.msra.mxu0 %v3824_v25  ;;  %v13355_v25 = vld [vmem:[%s13762_s21 + $0x3ac] ss:$36 sps:$4 sm:$0xff]   ;;  %4807 = vmatpush1.bf16.msra.mxu1 %v13347_v23  ;;  %v13385_v19 = vld [vmem:[%s13762_s21 + $0xa4] ss:$36 sps:$4 sm:$0xff]  }
 0x268   : > { %4823 = vmatprep.subr.bf16.mxu0 %v13280_v52  ;;  %v13350_v52 = vld [vmem:[%s13762_s21 + $0x368] ss:$36 sps:$4 sm:$0xff]   ;;  %4808 = vmatprep.subr.bf16.mxu1 %v13355_v25  ;;  %v13383_v21 = vld [vmem:[%s13762_s21 + $0xa0] ss:$36 sps:$4 sm:$0xff]  }
 0x269   : > { %v13391_v23 = vld [vmem:[%s13762_s21 + $0xec] ss:$36 sps:$4 sm:$0xff]  }
 0x26a   : > { %11469 = vmatmul.mubr.msk.bf16.vlgmr.msra.gmra.mrb[20].mxu0 %vm3389_vm2, %v11468_v26  ;;  %v13358_v26 = vld [vmem:[%s13762_s21 + $0x3b4] ss:$36 sps:$4 sm:$0xff]   ;;  %v13389_v25 = vld [vmem:[%s13762_s21 + $0xe8] ss:$36 sps:$4 sm:$0xff]  }
 0x26b   : > { %4824 = vmatpush1.bf16.msra.mxu0 %v13278_v27  ;;  %v13353_v27 = vld [vmem:[%s13762_s21 + $0x3a8] ss:$36 sps:$4 sm:$0xff]  }
 0x26c   : > { %4825 = vmatprep.subr.bf16.mxu0 %v13286_v36  ;;  %4809 = vmatpush1.bf16.msra.mxu1 %v13353_v27  ;;  %v13397_v27 = vld [vmem:[%s13762_s21 + $0x134] ss:$36 sps:$4 sm:$0xff]  }
 0x26f   : > { %4826 = vmatpush1.bf16.msra.mxu0 %v13284_v35 }
 0x270   : > { %4827 = vmatprep.subr.bf16.mxu0 %v13292_v47 }
 0x273   : > { %4828 = vmatpush1.bf16.msra.mxu0 %v13290_v46  ;;  %v13376_v46 = vld [vmem:[%s13762_s21 + $0x1c] ss:$36 sps:$4 sm:$0xff]  }
 0x274   : > { %4829 = vmatprep.subr.bf16.mxu0 %v13298_v50 }
 0x277   : > { %4830 = vmatpush1.bf16.msra.mxu0 %v13296_v51 }
 0x278   : > { %4831 = vmatprep.subr.bf16.mxu0 %v13304_v54 }
 0x27b   : > { %4832 = vmatpush1.bf16.msra.mxu0 %v13302_v56 }
 0x27c   : > { %4833 = vmatprep.subr.bf16.mxu0 %v13310_v58 }
 0x27d   : > { %v3539_v28 = vpop.f32.mrb[24].mxu1 }
 0x27e   : > { %v3546_v29 = vadd.f32 %v3539_v28, %v3488_v11  ;;  %v3541_v30 = vpop.f32.mrb[25].mxu1  ;;  %v13334_v11 = vld [vmem:[%s13762_s21 + $0x294] ss:$36 sps:$4 sm:$0xff]  }
 0x27f   : > { %v3547_v31 = vadd.f32 %v3541_v30, %v3490_v13  ;;  %v3543_v32 = vpop.f32.mrb[26].mxu1  ;;  %4834 = vmatpush1.bf16.msra.mxu0 %v13308_v60  ;;  %v13332_v13 = vld [vmem:[%s13762_s21 + $0x290] ss:$36 sps:$4 sm:$0xff]  }
 0x280   : > { %v3544_v24 = vpop.f32.mrb[27].mxu1  ;;  %4835 = vmatprep.subr.bf16.mxu0 %v13316_v62  ;;  %v13356_v28 = vld [vmem:[%s13762_s21 + $0x3b0] ss:$36 sps:$4 sm:$0xff]  }
 0x281   : > { %v13361_v30 = vld [vmem:[%s13762_s21 + $0x3f4] ss:$36 sps:$4 sm:$0xff]  }
 0x282   : > { %v13362_v24 = vld [vmem:[%s13762_s21 + $0x3f8] ss:$36 sps:$4 sm:$0xff]   ;;  %4810 = vmatprep.subr.bf16.mxu1 %v13361_v30 }
 0x283   : > { %4836 = vmatpush1.bf16.msra.mxu0 %v13314_v0  ;;  %4811 = vmatpush1.bf16.msra.mxu1 %v13359_v34  ;;  %v13398_v30 = vld [vmem:[%s13762_s21 + $0x138] ss:$36 sps:$4 sm:$0xff]   ;;  %v13404_v34 = vld [vmem:[%s13762_s21 + $0x180] ss:$36 sps:$4 sm:$0xff]  }
 0x284   : > { %4837 = vmatprep.subr.bf16.mxu0 %v13322_v2 }
 0x285   : > { %v3593_v37 = vpop.f32.mrb[28].mxu1 }
 0x286   : > { %v14336_v38 = vadd.f32 %v3593_v37, %v3546_v29  ;;  %v3595_v39 = vpop.f32.mrb[29].mxu1 }
 0x287   : > { %v14338_v40 = vadd.f32 %v3595_v39, %v3547_v31  ;;  %v3597_v41 = vpop.f32.mrb[30].mxu1  ;;  %4838 = vmatpush1.bf16.msra.mxu0 %v13320_v4  ;;  %v13364_v31 = vld [vmem:[%s13762_s21 + $0x3fc] ss:$36 sps:$4 sm:$0xff]  }
 0x288   : > { %v3598_v45 = vpop.f32.mrb[31].mxu1  ;;  %4839 = vmatprep.subr.bf16.mxu0 %v13328_v7  ;;  %v13367_v39 = vld [vmem:[%s13762_s21 + $0x43c] ss:$36 sps:$4 sm:$0xff]   ;;  %v13370_v41 = vld [vmem:[%s13762_s21 + $0x444] ss:$36 sps:$4 sm:$0xff]  }
 0x289   : > { %4812 = vmatprep.subr.bf16.mxu1 %v13367_v39  ;;  %v13373_v45 = vld [vmem:[%s13762_s21 + $0x14] ss:$36 sps:$4 sm:$0xff]   ;;  %v13415_v39 = vld [vmem:[%s13762_s21 + $0x20c] ss:$36 sps:$4 sm:$0xff]  }
 0x28a   : > { %4813 = vmatpush1.bf16.msra.mxu1 %v13365_v42  ;;  %v13413_v42 = vld [vmem:[%s13762_s21 + $0x208] ss:$36 sps:$4 sm:$0xff]  }
 0x28b   : > { %4840 = vmatpush1.bf16.msra.mxu0 %v13326_v9  ;;  %4864 = vmatprep.subr.bf16.mxu1 %v13373_v45  ;;  %v13424_v45 = vld [vmem:[%s13762_s21 + $0x25c] ss:$36 sps:$4 sm:$0xff]  }
 0x28c   : > { %4841 = vmatprep.subr.bf16.mxu0 %v13334_v11 }
 0x28f   : > { %4842 = vmatpush1.bf16.msra.mxu0 %v13332_v13  ;;  %v13371_v13 = vld [vmem:[%s13762_s21 + $0x10] ss:$36 sps:$4 sm:$0xff]  }
 0x290   : > { %4843 = vmatprep.subr.bf16.mxu0 %v13340_v15 }
 0x293   : > { %4844 = vmatpush1.bf16.msra.mxu0 %v13338_v16  ;;  %v13382_v16 = vld [vmem:[%s13762_s21 + $0x64] ss:$36 sps:$4 sm:$0xff]  }
 0x294   : > { %4845 = vmatprep.subr.bf16.mxu0 %v13346_v18  ;;  %v13380_v18 = vld [vmem:[%s13762_s21 + $0x60] ss:$36 sps:$4 sm:$0xff]  }
 0x297   : > { %4846 = vmatpush1.bf16.msra.mxu0 %v13344_v20  ;;  %v13388_v20 = vld [vmem:[%s13762_s21 + $0xac] ss:$36 sps:$4 sm:$0xff]  }
 0x298   : > { %4847 = vmatprep.subr.bf16.mxu0 %v13352_v22  ;;  %v13386_v22 = vld [vmem:[%s13762_s21 + $0xa8] ss:$36 sps:$4 sm:$0xff]  }
 0x29b   : > { %4848 = vmatpush1.bf16.msra.mxu0 %v13350_v52  ;;  %v13394_v52 = vld [vmem:[%s13762_s21 + $0xf4] ss:$36 sps:$4 sm:$0xff]  }
 0x29c   : > { %4849 = vmatprep.subr.bf16.mxu0 %v13358_v26  ;;  %v13392_v26 = vld [vmem:[%s13762_s21 + $0xf0] ss:$36 sps:$4 sm:$0xff]  }
 0x29f   : > { %4850 = vmatpush1.bf16.msra.mxu0 %v13356_v28  ;;  %v13400_v28 = vld [vmem:[%s13762_s21 + $0x13c] ss:$36 sps:$4 sm:$0xff]  }
 0x2a0   : > { %4851 = vmatprep.subr.bf16.mxu0 %v13364_v31  ;;  %v13403_v31 = vld [vmem:[%s13762_s21 + $0x17c] ss:$36 sps:$4 sm:$0xff]  }
 0x2a3   : > { %4852 = vmatpush1.bf16.msra.mxu0 %v13362_v24  ;;  %v13409_v24 = vld [vmem:[%s13762_s21 + $0x1c4] ss:$36 sps:$4 sm:$0xff]  }
 0x2a4   : > { %4853 = vmatprep.subr.bf16.mxu0 %v13370_v41  ;;  %v13418_v41 = vld [vmem:[%s13762_s21 + $0x214] ss:$36 sps:$4 sm:$0xff]  }
 0x2a7   : > { %4854 = vmatpush1.bf16.msra.mxu0 %v13368_v43  ;;  %v13416_v43 = vld [vmem:[%s13762_s21 + $0x210] ss:$36 sps:$4 sm:$0xff]  }
 0x2a8   : > { %4905 = vmatprep.subr.bf16.mxu0 %v13376_v46  ;;  %v13419_v46 = vld [vmem:[%s13762_s21 + $0x250] ss:$36 sps:$4 sm:$0xff]  }
 0x2bd   : > { %v3647_v29 = vpop.f32.mrb[32].mxu1 }
 0x2be   : > { %v3654_v32 = vadd.f32 %v3647_v29, %v14336_v38  ;;  %v3649_v33 = vpop.f32.mrb[33].mxu1  ;;  %v13395_v29 = vld [vmem:[%s13762_s21 + $0x130] ss:$36 sps:$4 sm:$0xff]  }
 0x2bf   : > { %v3655_v35 = vadd.f32 %v3649_v33, %v14338_v40  ;;  %v3651_v36 = vpop.f32.mrb[34].mxu1  ;;  %v13401_v33 = vld [vmem:[%s13762_s21 + $0x178] ss:$36 sps:$4 sm:$0xff]  }
 0x2c0   : > { %v3652_v37 = vpop.f32.mrb[35].mxu1  ;;  %v13407_v36 = vld [vmem:[%s13762_s21 + $0x1c0] ss:$36 sps:$4 sm:$0xff]  }
 0x2c1   : > { %v13410_v37 = vld [vmem:[%s13762_s21 + $0x1c8] ss:$36 sps:$4 sm:$0xff]  }
 0x2c5   : > { %v3701_v38 = vpop.f32.mrb[36].mxu1 }
 0x2c6   : > { %v3708_v40 = vadd.f32 %v3701_v38, %v3654_v32  ;;  %v3703_v47 = vpop.f32.mrb[37].mxu1  ;;  %v13406_v32 = vld [vmem:[%s13762_s21 + $0x184] ss:$36 sps:$4 sm:$0xff]   ;;  %v13421_v38 = vld [vmem:[%s13762_s21 + $0x254] ss:$36 sps:$4 sm:$0xff]  }
 0x2c7   : > { %v3709_v48 = vadd.f32 %v3703_v47, %v3655_v35  ;;  %v3705_v49 = vpop.f32.mrb[38].mxu1  ;;  %v13412_v35 = vld [vmem:[%s13762_s21 + $0x1cc] ss:$36 sps:$4 sm:$0xff]   ;;  %v13427_v47 = vld [vmem:[%s13762_s21 + $0x29c] ss:$36 sps:$4 sm:$0xff]  }
 0x2c8   : > { %v3706_v50 = vpop.f32.mrb[39].mxu1  ;;  %v13425_v49 = vld [vmem:[%s13762_s21 + $0x298] ss:$36 sps:$4 sm:$0xff]  }
 0x2c9   : > { %v13428_v50 = vld [vmem:[%s13762_s21 + $0x2a0] ss:$36 sps:$4 sm:$0xff]  }
 0x2fd   : > { %v3755_v51 = vpop.f32.mrb[40].mxu1 }
 0x2fe   : > { %v3762_v53 = vadd.f32 %v3755_v51, %v3708_v40  ;;  %v3757_v54 = vpop.f32.mrb[41].mxu1  ;;  %v13422_v40 = vld [vmem:[%s13762_s21 + $0x258] ss:$36 sps:$4 sm:$0xff]   ;;  %v13433_v51 = vld [vmem:[%s13762_s21 + $0x2e4] ss:$36 sps:$4 sm:$0xff]  }
 0x2ff   : > { %v3763_v55 = vadd.f32 %v3757_v54, %v3709_v48  ;;  %v3759_v56 = vpop.f32.mrb[42].mxu1  ;;  %v13430_v48 = vld [vmem:[%s13762_s21 + $0x2a4] ss:$36 sps:$4 sm:$0xff]  }
 0x300   : > { %v3760_v57 = vpop.f32.mrb[43].mxu1  ;;  %v13431_v54 = vld [vmem:[%s13762_s21 + $0x2e0] ss:$36 sps:$4 sm:$0xff]   ;;  %v13439_v56 = vld [vmem:[%s13762_s21 + $0x32c] ss:$36 sps:$4 sm:$0xff]  }
 0x301   : > { %v13442_v57 = vld [vmem:[%s13762_s21 + $0x334] ss:$36 sps:$4 sm:$0xff]  }
 0x305   : > { %v3809_v58 = vpop.f32.mrb[44].mxu1 }
 0x306   : > { %v3816_v59 = vadd.f32 %v3809_v58, %v3762_v53  ;;  %v3811_v60 = vpop.f32.mrb[45].mxu1  ;;  %v13436_v53 = vld [vmem:[%s13762_s21 + $0x2ec] ss:$36 sps:$4 sm:$0xff]  }
 0x307   : > { %v3817_v61 = vadd.f32 %v3811_v60, %v3763_v55  ;;  %v3813_v62 = vpop.f32.mrb[46].mxu1  ;;  %v13434_v55 = vld [vmem:[%s13762_s21 + $0x2e8] ss:$36 sps:$4 sm:$0xff]   ;;  %v13445_v60 = vld [vmem:[%s13762_s21 + $0x374] ss:$36 sps:$4 sm:$0xff]  }
 0x308   : > { %v3814_v63 = vpop.f32.mrb[47].mxu1  ;;  %v13437_v58 = vld [vmem:[%s13762_s21 + $0x328] ss:$36 sps:$4 sm:$0xff]   ;;  %v13443_v62 = vld [vmem:[%s13762_s21 + $0x370] ss:$36 sps:$4 sm:$0xff]  }
 0x309   : > { %v13446_v63 = vld [vmem:[%s13762_s21 + $0x378] ss:$36 sps:$4 sm:$0xff]  }
 0x33d   : > { %v3863_v0 = vpop.f32.mrb[20].mxu0 }
 0x33e   : > { %v3870_v1 = vadd.f32 %v3863_v0, %v3816_v59  ;;  %v3865_v2 = vpop.f32.mrb[21].mxu0  ;;  %v13440_v59 = vld [vmem:[%s13762_s21 + $0x330] ss:$36 sps:$4 sm:$0xff]   ;;  %v13451_v0 = vld [vmem:[%s13762_s21 + $0x3bc] ss:$36 sps:$4 sm:$0xff]  }
 0x33f   : > { %v3871_v4 = vadd.f32 %v3865_v2, %v3817_v61  ;;  %v3867_v6 = vpop.f32.mrb[22].mxu0  ;;  %v13448_v61 = vld [vmem:[%s13762_s21 + $0x37c] ss:$36 sps:$4 sm:$0xff]  }
 0x340   : > { %v3878_v7 = vadd.f32 %v3876_v3, %v3870_v1  ;;  %v3868_v8 = vpop.f32.mrb[23].mxu0  ;;  %v13454_v1 = vld [vmem:[%s13762_s21 + $0x3c4] ss:$36 sps:$4 sm:$0xff]   ;;  %v13449_v2 = vld [vmem:[%s13762_s21 + $0x3b8] ss:$36 sps:$4 sm:$0xff]  }
 0x341   : > { %v3879_v9 = vadd.f32 %v3876_v3, %v3871_v4  ;;  %v13452_v3 = vld [vmem:[%s13762_s21 + $0x3c0] ss:$36 sps:$4 sm:$0xff]   ;;  %v13460_v6 = vld [vmem:[%s13762_s21 + $0x40c] ss:$36 sps:$4 sm:$0xff]  }
 0x342   : > { %v3880_v10 = vmax.f32 %v3878_v7, 0.0  ;;  %v13457_v4 = vld [vmem:[%s13762_s21 + $0x404] ss:$36 sps:$4 sm:$0xff]  }
 0x343   : > { %v3881_v11 = vmax.f32 %v3879_v9, 0.0  ;;  %v13455_v7 = vld [vmem:[%s13762_s21 + $0x400] ss:$36 sps:$4 sm:$0xff]   ;;  %v13458_v8 = vld [vmem:[%s13762_s21 + $0x408] ss:$36 sps:$4 sm:$0xff]  }
 0x344   : > { %3882 = vst [vmem:[%s1230_s1] sm:$0xff] %v3880_v10  ;;  %v14409_v15 = vpack.c.bf16 %v3880_v10, %v3880_v10  ;;  %v13463_v9 = vld [vmem:[%s13762_s21 + $0x44c] ss:$36 sps:$4 sm:$0xff]   ;;  %v13466_v10 = vld [vmem:[%s13762_s21 + $0x454] ss:$36 sps:$4 sm:$0xff]  }
 0x345   : > { %3883 = vst [vmem:[%s1230_s1 + $0x8] sm:$0xff] %v3881_v11  ;;  %v14405_v12 = vpack.c.bf16 %v3881_v11, %v3881_v11  ;;  %v13461_v11 = vld [vmem:[%s13762_s21 + $0x448] ss:$36 sps:$4 sm:$0xff]   ;;  %s15292_s1 = sld [smem:[#allocation11_spill]] }
 0x347   : > { %4814 = vmatprep.mubr.bf16.mxu1 %v14405_v12  ;;  %4855 = vmatprep.mubr.bf16.mxu0 %v14405_v12 }
 0x348   : > { %4815 = vmatmul.mubr.bf16.vlgmr.msra.gmra.mrb[48].mxu1 %v14409_v15  ;;  %4856 = vmatmul.mubr.bf16.vlgmr.msra.gmra.mrb[24].mxu0 %v14409_v15 }
 0x349   : > { %4865 = vmatpush1.bf16.msra.mxu1 %v13371_v13  ;;  %4906 = vmatpush1.bf16.msra.mxu0 %v13374_v14  ;;  %v13464_v13 = vld [vmem:[%s13762_s21 + $0x450] ss:$36 sps:$4 sm:$0xff]   ;;  %v13467_v14 = vld [vmem:[%s13762_s21 + $0x260] ss:$36 sps:$4 sm:$0xff]  }
 0x34a   : > { %4896 = vmatprep.mubr.bf16.mxu1 %v14405_v12  ;;  %4937 = vmatprep.mubr.bf16.mxu0 %v14405_v12 }
 0x34b   : > { %4866 = vmatprep.subr.bf16.mxu1 %v13379_v5  ;;  %4907 = vmatprep.subr.bf16.mxu0 %v13382_v16  ;;  %v13468_v5 = vld [vmem:[%s13762_s21 + $0x20] ss:$36 sps:$4 sm:$0xff]   ;;  %v13469_v16 = vld [vmem:[%s13762_s21 + $0x2a8] ss:$36 sps:$4 sm:$0xff]  }
 0x34d   : > { %4867 = vmatpush1.bf16.msra.mxu1 %v13377_v17  ;;  %4908 = vmatpush1.bf16.msra.mxu0 %v13380_v18  ;;  %v13470_v17 = vld [vmem:[%s13762_s21 + $0x68] ss:$36 sps:$4 sm:$0xff]   ;;  %v13471_v18 = vld [vmem:[%s13762_s21 + $0x2f0] ss:$36 sps:$4 sm:$0xff]  }
 0x34e   : > { %4868 = vmatprep.subr.bf16.mxu1 %v13385_v19  ;;  %4909 = vmatprep.subr.bf16.mxu0 %v13388_v20  ;;  %v13472_v19 = vld [vmem:[%s13762_s21 + $0xb0] ss:$36 sps:$4 sm:$0xff]   ;;  %v13473_v20 = vld [vmem:[%s13762_s21 + $0x338] ss:$36 sps:$4 sm:$0xff]  }
 0x351   : > { %4869 = vmatpush1.bf16.msra.mxu1 %v13383_v21  ;;  %4910 = vmatpush1.bf16.msra.mxu0 %v13386_v22  ;;  %v13474_v21 = vld [vmem:[%s13762_s21 + $0xf8] ss:$36 sps:$4 sm:$0xff]   ;;  %v13475_v22 = vld [vmem:[%s13762_s21 + $0x380] ss:$36 sps:$4 sm:$0xff]  }
 0x352   : > { %4870 = vmatprep.subr.bf16.mxu1 %v13391_v23  ;;  %4911 = vmatprep.subr.bf16.mxu0 %v13394_v52  ;;  %v13477_v23 = vld [vmem:[%s13762_s21 + $0x3c8] ss:$36 sps:$4 sm:$0xff]  }
 0x353   : > { %v13478_v52 = vld [vmem:[%s13762_s21 + $0x188] ss:$36 sps:$4 sm:$0xff]  }
 0x355   : > { %4871 = vmatpush1.bf16.msra.mxu1 %v13389_v25  ;;  %4912 = vmatpush1.bf16.msra.mxu0 %v13392_v26  ;;  %v13479_v25 = vld [vmem:[%s13762_s21 + $0x410] ss:$36 sps:$4 sm:$0xff]  }
 0x356   : > { %4872 = vmatprep.subr.bf16.mxu1 %v13397_v27  ;;  %4913 = vmatprep.subr.bf16.mxu0 %v13400_v28  ;;  %v13480_v26 = vld [vmem:[%s13762_s21 + $0x1d0] ss:$36 sps:$4 sm:$0xff]   ;;  %v13481_v27 = vld [vmem:[%s13762_s21 + $0x458] ss:$36 sps:$4 sm:$0xff]  }
 0x357   : > { %v13482_v28 = vld [vmem:[%s13762_s21 + $0x218] ss:$36 sps:$4 sm:$0xff]  }
 0x359   : > { %4873 = vmatpush1.bf16.msra.mxu1 %v13395_v29  ;;  %4914 = vmatpush1.bf16.msra.mxu0 %v13398_v30  ;;  %v14500_v29 = vld [vmem:[%s13767_s25] ss:$36 sps:$4 sm:$0xff]  }
 0x35a   : > { %4874 = vmatprep.subr.bf16.mxu1 %v13403_v31  ;;  %4915 = vmatprep.subr.bf16.mxu0 %v13406_v32  ;;  %v14503_v30 = vld [vmem:[%s13767_s25 + $0x4] ss:$36 sps:$4 sm:$0xff]   ;;  %v14506_v31 = vld [vmem:[%s13767_s25 + $0x18] ss:$36 sps:$4 sm:$0xff]  }
 0x35b   : > { %v14509_v32 = vld [vmem:[%s13767_s25 + $0x1c] ss:$36 sps:$4 sm:$0xff]  }
 0x35d   : > { %4875 = vmatpush1.bf16.msra.mxu1 %v13401_v33  ;;  %4916 = vmatpush1.bf16.msra.mxu0 %v13404_v34  ;;  %v14512_v33 = vld [vmem:[%s13767_s25 + $0x4c] ss:$36 sps:$4 sm:$0xff]   ;;  %v14516_v34 = vld [vmem:[%s13767_s25 + $0x64] ss:$36 sps:$4 sm:$0xff]  }
 0x35e   : > { %4876 = vmatprep.subr.bf16.mxu1 %v13409_v24  ;;  %4917 = vmatprep.subr.bf16.mxu0 %v13412_v35  ;;  %v14526_v24 = vld [vmem:[%s13767_s25 + $0x60] ss:$36 sps:$4 sm:$0xff]   ;;  %v14529_v35 = vld [vmem:[%s13767_s25 + $0x94] ss:$36 sps:$4 sm:$0xff]  }
 0x361   : > { %4877 = vmatpush1.bf16.msra.mxu1 %v13407_v36  ;;  %4918 = vmatpush1.bf16.msra.mxu0 %v13410_v37  ;;  %v14534_v36 = vld [vmem:[%s13767_s25 + $0x90] ss:$36 sps:$4 sm:$0xff]  }
 0x362   : > { %4878 = vmatprep.subr.bf16.mxu1 %v13415_v39  ;;  %4919 = vmatprep.subr.bf16.mxu0 %v13418_v41  ;;  %v14540_v37 = vld [vmem:[%s13767_s25 + $0xac] ss:$36 sps:$4 sm:$0xff]   ;;  %v14548_v41 = vld [vmem:[%s13767_s25 + $0xdc] ss:$36 sps:$4 sm:$0xff]  }
 0x363   : > { %v14543_v39 = vld [vmem:[%s13767_s25 + $0xa8] ss:$36 sps:$4 sm:$0xff]  }
 0x365   : > { %4879 = vmatpush1.bf16.msra.mxu1 %v13413_v42  ;;  %4920 = vmatpush1.bf16.msra.mxu0 %v13416_v43  ;;  %v14551_v42 = vld [vmem:[%s13767_s25 + $0xd8] ss:$36 sps:$4 sm:$0xff]  }
 0x366   : > { %4880 = vmatprep.subr.bf16.mxu1 %v13421_v38  ;;  %4921 = vmatprep.subr.bf16.mxu0 %v13424_v45  ;;  %v14554_v43 = vld [vmem:[%s13767_s25 + $0xf4] ss:$36 sps:$4 sm:$0xff]   ;;  %v14564_v45 = vld [vmem:[%s13767_s25 + $0xc] ss:$36 sps:$4 sm:$0xff]  }
 0x367   : > { %v14558_v38 = vld [vmem:[%s13767_s25 + $0xf0] ss:$36 sps:$4 sm:$0xff]  }
 0x369   : > { %4881 = vmatpush1.bf16.msra.mxu1 %v13419_v46  ;;  %4922 = vmatpush1.bf16.msra.mxu0 %v13422_v40 }
 0x36a   : > { %4882 = vmatprep.subr.bf16.mxu1 %v13427_v47  ;;  %4923 = vmatprep.subr.bf16.mxu0 %v13430_v48 }
 0x36d   : > { %4883 = vmatpush1.bf16.msra.mxu1 %v13425_v49  ;;  %4924 = vmatpush1.bf16.msra.mxu0 %v13428_v50 }
 0x36e   : > { %4884 = vmatprep.subr.bf16.mxu1 %v13433_v51  ;;  %4925 = vmatprep.subr.bf16.mxu0 %v13436_v53 }
 0x371   : > { %4885 = vmatpush1.bf16.msra.mxu1 %v13431_v54  ;;  %4926 = vmatpush1.bf16.msra.mxu0 %v13434_v55 }
 0x372   : > { %4886 = vmatprep.subr.bf16.mxu1 %v13439_v56  ;;  %4927 = vmatprep.subr.bf16.mxu0 %v13442_v57  ;;  %v13728_v57 = vmov 0.0  }
 0x375   : > { %4887 = vmatpush1.bf16.msra.mxu1 %v13437_v58  ;;  %4928 = vmatpush1.bf16.msra.mxu0 %v13440_v59 }
 0x376   : > { %4888 = vmatprep.subr.bf16.mxu1 %v13445_v60  ;;  %4929 = vmatprep.subr.bf16.mxu0 %v13448_v61 }
 0x379   : > { %4889 = vmatpush1.bf16.msra.mxu1 %v13443_v62  ;;  %4930 = vmatpush1.bf16.msra.mxu0 %v13446_v63 }
 0x37a   : > { %4890 = vmatprep.subr.bf16.mxu1 %v13451_v0  ;;  %4931 = vmatprep.subr.bf16.mxu0 %v13454_v1 }
 0x37d   : > { %4891 = vmatpush1.bf16.msra.mxu1 %v13449_v2  ;;  %4932 = vmatpush1.bf16.msra.mxu0 %v13452_v3 }
 0x37e   : > { %4892 = vmatprep.subr.bf16.mxu1 %v13457_v4  ;;  %4933 = vmatprep.subr.bf16.mxu0 %v13460_v6 }
 0x381   : > { %4893 = vmatpush1.bf16.msra.mxu1 %v13455_v7  ;;  %4934 = vmatpush1.bf16.msra.mxu0 %v13458_v8 }
 0x382   : > { %4894 = vmatprep.subr.bf16.mxu1 %v13463_v9  ;;  %4935 = vmatprep.subr.bf16.mxu0 %v13466_v10 }
 0x385   : > { %4895 = vmatpush1.bf16.msra.mxu1 %v13461_v11  ;;  %4936 = vmatpush1.bf16.msra.mxu0 %v13464_v13 }
 0x386   : > { %12008 = vmatprep.subr.bf16.mxu1 %v13467_v14  ;;  %5346 = vmatprep.subr.bf16.mxu0 %v14509_v32  ;;  %v14571_v14 = vld [vmem:[%s13767_s25 + $0x8] ss:$36 sps:$4 sm:$0xff]  }
 0x388   : > { %4897 = vmatmul.mubr.bf16.vlgmr.msra.gmra.mrb[52].mxu1 %v14409_v15  ;;  %4938 = vmatmul.mubr.bf16.vlgmr.msra.gmra.mrb[28].mxu0 %v14409_v15 }
 0x389   : > { %12009 = vmatpush3.bf16.msra.mxu1 %v13468_v5  ;;  %4978 = vmatprep.mubr.bf16.mxu1 %v14405_v12  ;;  %v13476_v12 = vld [vmem:[%s13762_s21 + $0x140] ss:$36 sps:$4 sm:$0xff]  }
 0x38a   : > { %12010 = vmatprep.subr.bf16.mxu1 %v13469_v16  ;;  %5378 = vmatprep.mubr.bf16.mxu0 %v13726_v44  ;;  %v14576_v16 = vld [vmem:[%s13767_s25 + $0x54] ss:$36 sps:$4 sm:$0xff]  }
 0x38b   : > { %5347 = vmatpush1.bf16.msra.mxu0 %v14506_v31 }
 0x38c   : > { %5348 = vmatprep.subr.bf16.mxu0 %v14516_v34 }
 0x38d   : > { %12011 = vmatpush3.bf16.msra.mxu1 %v13470_v17  ;;  %v14582_v17 = vld [vmem:[%s13767_s25 + $0x50] ss:$36 sps:$4 sm:$0xff]  }
 0x38e   : > { %12012 = vmatprep.subr.bf16.mxu1 %v13471_v18  ;;  %v14587_v18 = vld [vmem:[%s13767_s25 + $0x9c] ss:$36 sps:$4 sm:$0xff]  }
 0x38f   : > { %5349 = vmatpush1.bf16.msra.mxu0 %v14526_v24 }
 0x390   : > { %5350 = vmatprep.subr.bf16.mxu0 %v14540_v37 }
 0x391   : > { %12013 = vmatpush3.bf16.msra.mxu1 %v13472_v19  ;;  %v14593_v19 = vld [vmem:[%s13767_s25 + $0x98] ss:$36 sps:$4 sm:$0xff]  }
 0x392   : > { %12014 = vmatprep.subr.bf16.mxu1 %v13473_v20  ;;  %v14597_v20 = vld [vmem:[%s13767_s25 + $0xe4] ss:$36 sps:$4 sm:$0xff]  }
 0x393   : > { %5351 = vmatpush1.bf16.msra.mxu0 %v14543_v39 }
 0x394   : > { %5352 = vmatprep.subr.bf16.mxu0 %v14554_v43 }
 0x395   : > { %12015 = vmatpush3.bf16.msra.mxu1 %v13474_v21  ;;  %v14601_v21 = vld [vmem:[%s13767_s25 + $0xe0] ss:$36 sps:$4 sm:$0xff]  }
 0x396   : > { %12016 = vmatprep.subr.bf16.mxu1 %v13475_v22  ;;  %v14605_v22 = vld [vmem:[%s13767_s25 + $0x14] ss:$36 sps:$4 sm:$0xff]  }
 0x397   : > { %5353 = vmatpush1.bf16.msra.mxu0 %v14558_v38 }
 0x398   : > { %12220 = vmatprep.subr.bf16.mxu0 %v13728_v57 }
 0x399   : > { %12017 = vmatpush3.bf16.msra.mxu1 %v13476_v12  ;;  %v14609_v12 = vld [vmem:[%s13767_s25 + $0x10] ss:$36 sps:$4 sm:$0xff]  }
 0x39a   : > { %12018 = vmatprep.subr.bf16.mxu1 %v13477_v23  ;;  %v14613_v23 = vld [vmem:[%s13767_s25 + $0x5c] ss:$36 sps:$4 sm:$0xff]  }
 0x39d   : > { %12019 = vmatpush3.bf16.msra.mxu1 %v13478_v52  ;;  %v14618_v52 = vld [vmem:[%s13767_s25 + $0x58] ss:$36 sps:$4 sm:$0xff]  }
 0x39e   : > { %12020 = vmatprep.subr.bf16.mxu1 %v13479_v25  ;;  %v14623_v25 = vld [vmem:[%s13767_s25 + $0xa4] ss:$36 sps:$4 sm:$0xff]  }
 0x3a1   : > { %12021 = vmatpush3.bf16.msra.mxu1 %v13480_v26  ;;  %v14627_v26 = vld [vmem:[%s13767_s25 + $0xa0] ss:$36 sps:$4 sm:$0xff]  }
 0x3a2   : > { %12022 = vmatprep.subr.bf16.mxu1 %v13481_v27  ;;  %v14631_v27 = vld [vmem:[%s13767_s25 + $0xec] ss:$36 sps:$4 sm:$0xff]  }
 0x3a5   : > { %12023 = vmatpush3.bf16.msra.mxu1 %v13482_v28  ;;  %v14635_v28 = vld [vmem:[%s13767_s25 + $0xe8] ss:$36 sps:$4 sm:$0xff]  }
 0x3a6   : > { %5223 = vmatprep.subr.bf16.mxu1 %v14503_v30 }
 0x3a8   : > { %4979 = vmatmul.mubr.bf16.vlgmr.msra.gmra.mrb[56].mxu1 %v14409_v15  ;;  %v14521_v15 = vld [vmem:[%s13767_s25 + $0x48] ss:$36 sps:$4 sm:$0xff]  }
 0x3a9   : > { %5255 = vmatprep.mubr.bf16.mxu1 %v13726_v44  ;;  %5224 = vmatpush1.bf16.msra.mxu1 %v14500_v29 }
 0x3aa   : > { %5225 = vmatprep.subr.bf16.mxu1 %v14512_v33 }
 0x3ad   : > { %5226 = vmatpush1.bf16.msra.mxu1 %v14521_v15 }
 0x3ae   : > { %5227 = vmatprep.subr.bf16.mxu1 %v14529_v35 }
 0x3b1   : > { %5228 = vmatpush1.bf16.msra.mxu1 %v14534_v36 }
 0x3b2   : > { %5229 = vmatprep.subr.bf16.mxu1 %v14548_v41 }
 0x3b5   : > { %5230 = vmatpush1.bf16.msra.mxu1 %v14551_v42 }
 0x3b6   : > { %5264 = vmatprep.subr.bf16.mxu1 %v14564_v45 }
 0x41b   : > { %v4816_v46 = vpop.f32.mrb[48].mxu1  ;;  %v4857_v40 = vpop.f32.mrb[24].mxu0 }
 0x41c   : > { %v4818_v47 = vpop.f32.mrb[49].mxu1  ;;  %v4859_v48 = vpop.f32.mrb[25].mxu0 }
 0x41d   : > { %v4986_v49 = vmax.f32 %v4816_v46, %v4818_v47  ;;  %v4820_v50 = vpop.f32.mrb[50].mxu1  ;;  %v4861_v51 = vpop.f32.mrb[26].mxu0  ;;  %v14640_v46 = vld [vmem:[%s13767_s25 + $0x20] ss:$36 sps:$4 sm:$0xff]   ;;  %v14653_v47 = vld [vmem:[%s13767_s25 + $0xb0] ss:$36 sps:$4 sm:$0xff]  }
 0x41e   : > { %v4821_v53 = vpop.f32.mrb[51].mxu1  ;;  %v4862_v54 = vpop.f32.mrb[27].mxu0 }
 0x41f   : > { %v4987_v55 = vmax.f32 %v4986_v49, %v4857_v40  ;;  %v14646_v40 = vld [vmem:[%s13767_s25 + $0x68] ss:$36 sps:$4 sm:$0xff]  }
 0x421   : > { %v4988_v56 = vmax.f32 %v4987_v55, %v4859_v48  ;;  %v14658_v48 = vld [vmem:[%s13767_s25 + $0xf8] ss:$36 sps:$4 sm:$0xff]  }
 0x45b   : > { %v4898_v58 = vpop.f32.mrb[52].mxu1  ;;  %v4939_v59 = vpop.f32.mrb[28].mxu0 }
 0x45c   : > { %v4989_v60 = vmax.f32 %v4988_v56, %v4898_v58  ;;  %v4900_v61 = vpop.f32.mrb[53].mxu1  ;;  %v4941_v62 = vpop.f32.mrb[29].mxu0 }
 0x45d   : > { %v4902_v63 = vpop.f32.mrb[54].mxu1  ;;  %v4943_v0 = vpop.f32.mrb[30].mxu0 }
 0x45e   : > { %v4990_v1 = vmax.f32 %v4989_v60, %v4900_v61  ;;  %v4903_v2 = vpop.f32.mrb[55].mxu1  ;;  %v4944_v3 = vpop.f32.mrb[31].mxu0  ;;  %v5436_v0 = vld [vmem:[%s15284_s2] sm:$0xf] }
 0x460   : > { %v4991_v4 = vmax.f32 %v4990_v1, %v4939_v59 }
 0x462   : > { %v4992_v6 = vmax.f32 %v4991_v4, %v4941_v62  ;;  %v11655_v62 = vld [vmem:[%s15284_s2 + $0x4] sm:$0xf] }
 0x47b   : > { %v12024_v7 = vpop.f32.mrb[56].mxu1 }
 0x47c   : > { %v12025_v8 = vpop.f32.mrb[57].mxu1 }
 0x47d   : > { %v12026_v9 = vadd.f32 %v12025_v8, %v12024_v7  ;;  %v12027_v10 = vpop.f32.mrb[58].mxu1 }
 0x47e   : > { %v12028_v11 = vpop.f32.mrb[59].mxu1  ;;  %v11658_v10 = vld [vmem:[%s15284_s2 + $0x8] sm:$0xf] }
 0x47f   : > { %v14568_v13 = vmax.f32 %v4992_v6, %v12026_v9  ;;  %v11660_v11 = vld [vmem:[%s15284_s2 + $0xc] sm:$0xf] }
 0x481   : > { %v4994_v5 = vpack.c.bf16 %v14568_v13, %v14568_v13 }
 0x483   : > { %11650 = vmatmul.mubr.msk.bf16.vlgmr.msra.gmra.mrb[60].mxu1 %vm5219_vm3, %v4994_v5  ;;  %11653 = vmatmul.mubr.msk.bf16.vlgmr.msra.gmra.mrb[32].mxu0 %vm5219_vm3, %v4994_v5 }
 0x484   : > { %5265 = vmatpush1.bf16.msra.mxu1 %v14571_v14  ;;  %5296 = vmatprep.mubr.bf16.mxu1 %v13726_v44 }
 0x485   : > { %5266 = vmatprep.subr.bf16.mxu1 %v14576_v16  ;;  %12222 = vmatprep.mubr.msk.bf16.mxu0 %vm13729_vm4, %v13728_v57 }
 0x488   : > { %5267 = vmatpush1.bf16.msra.mxu1 %v14582_v17 }
 0x489   : > { %5268 = vmatprep.subr.bf16.mxu1 %v14587_v18 }
 0x48c   : > { %5269 = vmatpush1.bf16.msra.mxu1 %v14593_v19 }
 0x48d   : > { %5270 = vmatprep.subr.bf16.mxu1 %v14597_v20 }
 0x490   : > { %5271 = vmatpush1.bf16.msra.mxu1 %v14601_v21 }
 0x491   : > { %5305 = vmatprep.subr.bf16.mxu1 %v14605_v22 }
 0x493   : > { %11651 = vmatmul.mubr.msk.bf16.vlgmr.msra.gmra.mrb[64].mxu1 %vm5219_vm3, %v4994_v5 }
 0x494   : > { %5306 = vmatpush1.bf16.msra.mxu1 %v14609_v12  ;;  %5337 = vmatprep.mubr.bf16.mxu1 %v13726_v44 }
 0x495   : > { %5307 = vmatprep.subr.bf16.mxu1 %v14613_v23 }
 0x498   : > { %5308 = vmatpush1.bf16.msra.mxu1 %v14618_v52 }
 0x499   : > { %5309 = vmatprep.subr.bf16.mxu1 %v14623_v25 }
 0x49c   : > { %5310 = vmatpush1.bf16.msra.mxu1 %v14627_v26 }
 0x49d   : > { %5311 = vmatprep.subr.bf16.mxu1 %v14631_v27 }
 0x4a0   : > { %5312 = vmatpush1.bf16.msra.mxu1 %v14635_v28 }
 0x4a1   : > { %12208 = vmatprep.subr.bf16.mxu1 %v13728_v57 }
 0x4a3   : > { %11652 = vmatmul.mubr.msk.bf16.vlgmr.msra.gmra.mrb[68].mxu1 %vm5219_vm3, %v4994_v5 }
 0x4a4   : > { %12209 = vmatpush3.bf16.msra.mxu1 %v14640_v46  ;;  %12216 = vmatprep.mubr.msk.bf16.mxu1 %vm13729_vm4, %v13728_v57 }
 0x4a5   : > { %12210 = vmatprep.subr.bf16.mxu1 %v13728_v57 }
 0x4a8   : > { %12211 = vmatpush3.bf16.msra.mxu1 %v14646_v40 }
 0x4a9   : > { %12212 = vmatprep.subr.bf16.mxu1 %v13728_v57 }
 0x4ac   : > { %12213 = vmatpush3.bf16.msra.mxu1 %v14653_v47 }
 0x4ad   : > { %12214 = vmatprep.subr.bf16.mxu1 %v13728_v57 }
 0x4b0   : > { %12215 = vmatpush3.bf16.msra.mxu1 %v14658_v48 }
 0x4b1   : > { %12232 = vmatprep.subr.bf16.mxu1 %v13728_v57 }
 0x4b3   : > { %12217 = vmatmul.mubr.msk.bf16.vlgmr.msra.gmra.mrb[72].mxu1 %vm5219_vm3, %v4994_v5 }
 0x4b4   : > { %12234 = vmatprep.mubr.msk.bf16.mxu1 %vm13729_vm4, %v13728_v57 }
 0x556   : > { %v5257_v49 = vpop.f32.mrb[60].mxu1  ;;  %v5380_v50 = vpop.f32.mrb[32].mxu0 }
 0x557   : > { %v5259_v51 = vpop.f32.mrb[61].mxu1  ;;  %v5382_v53 = vpop.f32.mrb[33].mxu0  ;;  %v5427_v60 = vpack.c.bf16 %v5257_v49, %v5257_v49 }
 0x558   : > { %v5428_v54 = vpack.c.bf16 %v5259_v51, %v5259_v51  ;;  %v5261_v55 = vpop.f32.mrb[62].mxu1  ;;  %v5384_v56 = vpop.f32.mrb[34].mxu0 }
 0x559   : > { %v5262_v58 = vpop.f32.mrb[63].mxu1  ;;  %v5385_v59 = vpop.f32.mrb[35].mxu0  ;;  %v5491_v63 = vsel %vm5443_vm5, %v5427_v60, 0  ;;  %v5433_v56 = vpack.c.bf16 %v5380_v50, %v5380_v50  ;;  %v5434_v60 = vpack.c.bf16 %v5382_v53, %v5382_v53  ;;  %v11666_v53 = vld [vmem:[%s15284_s2 + $0x18] sm:$0xf] }
 0x55a   : > { %v5445_v61 = vsel %vm5443_vm5, %v5428_v54, 0 }
 0x55b   : > { %12221 = vmatpush3.bf16.msra.mxu0 %v5445_v61  ;;  %v5784_v50 = vsel %vm5443_vm5, %v5434_v60, 0 }
 0x55c   : > { %12226 = vmatprep.subr.bf16.mxu0 %v13728_v57 }
 0x55e   : > { %12223 = vmatmul.mubr.msk.bf16.vlgmr.msra.gmra.mrb[36].mxu0 %vm5439_vm6, %v11655_v62  ;;  %v11662_v62 = vld [vmem:[%s15284_s2 + $0x10] sm:$0xf] }
 0x55f   : > { %12227 = vmatpush3.bf16.msra.mxu0 %v5491_v63  ;;  %12228 = vmatprep.mubr.msk.bf16.mxu0 %vm13729_vm4, %v13728_v57  ;;  %v11664_v63 = vld [vmem:[%s15284_s2 + $0x14] sm:$0xf] }
 0x560   : > { %12238 = vmatprep.subr.bf16.mxu0 %v13728_v57 }
 0x566   : > { %v5298_v1 = vpop.f32.mrb[64].mxu1  ;;  %12229 = vmatmul.mubr.msk.bf16.vlgmr.msra.gmra.mrb[40].mxu0 %vm5439_vm6, %v5436_v0  ;;  %v5735_v0 = vsel %vm5443_vm5, %v5433_v56, 0 }
 0x567   : > { %v5429_v2 = vpack.c.bf16 %v5298_v1, %v5298_v1  ;;  %v5300_v3 = vpop.f32.mrb[65].mxu1  ;;  %12240 = vmatprep.mubr.msk.bf16.mxu0 %vm13729_vm4, %v13728_v57  ;;  %v11668_v1 = vld [vmem:[%s15284_s2 + $0x1c] sm:$0xf] }
 0x568   : > { %v5430_v4 = vpack.c.bf16 %v5300_v3, %v5300_v3  ;;  %v5302_v6 = vpop.f32.mrb[66].mxu1 }
 0x569   : > { %v5539_v7 = vsel %vm5443_vm5, %v5429_v2, 0  ;;  %v5303_v8 = vpop.f32.mrb[67].mxu1 }
 0x56a   : > { %v5588_v9 = vsel %vm5443_vm5, %v5430_v4, 0  ;;  %12233 = vmatpush3.bf16.msra.mxu1 %v5539_v7  ;;  %v11670_v8 = vld [vmem:[%s15284_s2 + $0x20] sm:$0xf]  ;;  %s15301_s2 = sld [smem:[#allocation27_spill]] }
 0x56b   : > { %12239 = vmatpush3.bf16.msra.mxu0 %v5588_v9  ;;  %12244 = vmatprep.subr.bf16.mxu1 %v13728_v57 }
 0x56c   : > { %12250 = vmatprep.subr.bf16.mxu0 %v13728_v57 }
 0x56d   : > { %12235 = vmatmul.mubr.msk.bf16.vlgmr.msra.gmra.mrb[76].mxu1 %vm5439_vm6, %v11658_v10 }
 0x56e   : > { %12241 = vmatmul.mubr.msk.bf16.vlgmr.msra.gmra.mrb[44].mxu0 %vm5439_vm6, %v11660_v11  ;;  %12246 = vmatprep.mubr.msk.bf16.mxu1 %vm13729_vm4, %v13728_v57 }
 0x56f   : > { %12252 = vmatprep.mubr.msk.bf16.mxu0 %vm13729_vm4, %v13728_v57 }
 0x576   : > { %v5339_v5 = vpop.f32.mrb[68].mxu1 }
 0x577   : > { %v5431_v49 = vpack.c.bf16 %v5339_v5, %v5339_v5  ;;  %v5341_v51 = vpop.f32.mrb[69].mxu1 }
 0x578   : > { %v5432_v54 = vpack.c.bf16 %v5341_v51, %v5341_v51  ;;  %v5343_v55 = vpop.f32.mrb[70].mxu1 }
 0x579   : > { %v5637_v58 = vsel %vm5443_vm5, %v5431_v49, 0  ;;  %v5344_v59 = vpop.f32.mrb[71].mxu1 }
 0x57a   : > { %v5686_v61 = vsel %vm5443_vm5, %v5432_v54, 0  ;;  %12245 = vmatpush3.bf16.msra.mxu1 %v5637_v58 }
 0x57b   : > { %12251 = vmatpush3.bf16.msra.mxu0 %v5686_v61  ;;  %12256 = vmatprep.subr.bf16.mxu1 %v13728_v57 }
 0x57c   : > { %12262 = vmatprep.subr.bf16.mxu0 %v13728_v57 }
 0x57d   : > { %12247 = vmatmul.mubr.msk.bf16.vlgmr.msra.gmra.mrb[80].mxu1 %vm5439_vm6, %v11662_v62 }
 0x57e   : > { %12257 = vmatpush3.bf16.msra.mxu1 %v5735_v0  ;;  %12253 = vmatmul.mubr.msk.bf16.vlgmr.msra.gmra.mrb[48].mxu0 %vm5439_vm6, %v11664_v63 }
 0x57f   : > { %12263 = vmatpush3.bf16.msra.mxu0 %v5784_v50  ;;  %12258 = vmatprep.mubr.msk.bf16.mxu1 %vm13729_vm4, %v13728_v57 }
 0x580   : > { %12264 = vmatprep.mubr.msk.bf16.mxu0 %vm13729_vm4, %v13728_v57  ;;  %12268 = vmatprep.subr.bf16.mxu1 %v13728_v57 }
 0x581   : > { %5888 = vmatprep.subr.bf16.mxu0 %v14503_v30 }
 0x585   : > { %12259 = vmatmul.mubr.msk.bf16.vlgmr.msra.gmra.mrb[84].mxu1 %vm5439_vm6, %v11666_v53 }
 0x586   : > { %v5421_v2 = vpop.f32.mrb[72].mxu1  ;;  %12265 = vmatmul.mubr.msk.bf16.vlgmr.msra.gmra.mrb[52].mxu0 %vm5439_vm6, %v11668_v1  ;;  %12270 = vmatprep.mubr.msk.bf16.mxu1 %vm13729_vm4, %v13728_v57 }
 0x587   : > { %v5435_v3 = vpack.c.bf16 %v5421_v2, %v5421_v2  ;;  %v12218_v4 = vpop.f32.mrb[73].mxu1  ;;  %5889 = vmatpush1.bf16.msra.mxu0 %v14500_v29  ;;  %5920 = vmatprep.mubr.bf16.mxu0 %v13726_v44 }
 0x588   : > { %v5424_v6 = vpop.f32.mrb[74].mxu1  ;;  %5890 = vmatprep.subr.bf16.mxu0 %v14512_v33 }
 0x589   : > { %v5833_v30 = vsel %vm5443_vm5, %v5435_v3, 0  ;;  %v12219_v7 = vpop.f32.mrb[75].mxu1 }
 0x58a   : > { %12269 = vmatpush3.bf16.msra.mxu1 %v5833_v30 }
 0x58b   : > { %5929 = vmatprep.subr.bf16.mxu1 %v14564_v45  ;;  %5891 = vmatpush1.bf16.msra.mxu0 %v14521_v15 }
 0x58c   : > { %5892 = vmatprep.subr.bf16.mxu0 %v14529_v35 }
 0x58d   : > { %12271 = vmatmul.mubr.msk.bf16.vlgmr.msra.gmra.mrb[88].mxu1 %vm5439_vm6, %v11670_v8  ;;  %v5880_v8 = vpop.permute.xlu0 %5879 }
 0x58e   : > { %5930 = vmatpush1.bf16.msra.mxu1 %v14571_v14  ;;  %5961 = vmatprep.mubr.bf16.mxu1 %v13726_v44 }
 0x58f   : > { %5931 = vmatprep.subr.bf16.mxu1 %v14576_v16  ;;  %5893 = vmatpush1.bf16.msra.mxu0 %v14534_v36 }
 0x590   : > { %5894 = vmatprep.subr.bf16.mxu0 %v14548_v41 }
 0x592   : > { %5932 = vmatpush1.bf16.msra.mxu1 %v14582_v17 }
 0x593   : > { %5933 = vmatprep.subr.bf16.mxu1 %v14587_v18  ;;  %5895 = vmatpush1.bf16.msra.mxu0 %v14551_v42 }
 0x594   : > { %5970 = vmatprep.subr.bf16.mxu0 %v14605_v22 }
 0x596   : > { %5934 = vmatpush1.bf16.msra.mxu1 %v14593_v19 }
 0x597   : > { %5935 = vmatprep.subr.bf16.mxu1 %v14597_v20 }
 0x59a   : > { %5936 = vmatpush1.bf16.msra.mxu1 %v14601_v21 }
 0x59b   : > { %6011 = vmatprep.subr.bf16.mxu1 %v14509_v32 }
 0x631   : > { %v5481_v29 = vpop.f32.mrb[36].mxu0 }
 0x632   : > { %v12224_v33 = vpop.f32.mrb[37].mxu0 }
 0x633   : > { %v5484_v15 = vpop.f32.mrb[38].mxu0 }
 0x634   : > { %v12225_v35 = vpop.f32.mrb[39].mxu0 }
 0x639   : > { %v5527_v36 = vpop.f32.mrb[40].mxu0 }
 0x63a   : > { %v5528_v41 = vadd.f32 %v5527_v36, %v5481_v29  ;;  %v12230_v45 = vpop.f32.mrb[41].mxu0 }
 0x63b   : > { %v5530_v14 = vpop.f32.mrb[42].mxu0 }
 0x63c   : > { %v12231_v16 = vpop.f32.mrb[43].mxu0 }
 0x640   : > { %v5575_v42 = vpop.f32.mrb[76].mxu1 }
 0x641   : > { %v5581_v17 = vadd.f32 %v5575_v42, %v5528_v41  ;;  %v5624_v18 = vpop.f32.mrb[44].mxu0  ;;  %v12236_v22 = vpop.f32.mrb[77].mxu1 }
 0x642   : > { %v5578_v19 = vpop.f32.mrb[78].mxu1  ;;  %v12242_v9 = vpop.f32.mrb[45].mxu0 }
 0x643   : > { %v5630_v20 = vadd.f32 %v5624_v18, %v5581_v17  ;;  %v12237_v10 = vpop.f32.mrb[79].mxu1  ;;  %v5627_v21 = vpop.f32.mrb[46].mxu0  ;;  %v11680_v17 = vld [vmem:[%s15286_s10 + $0x8] sm:$0xf]  ;;  %v11677_v18 = vld [vmem:[%s15286_s10 + $0x4] sm:$0xf] }
 0x644   : > { %v12243_v11 = vpop.f32.mrb[47].mxu0  ;;  %v6101_v9 = vld [vmem:[%s15286_s10] sm:$0xf] }
 0x650   : > { %v5673_v32 = vpop.f32.mrb[80].mxu1 }
 0x651   : > { %v5679_v5 = vadd.f32 %v5673_v32, %v5630_v20  ;;  %v12248_v49 = vpop.f32.mrb[81].mxu1  ;;  %v5722_v51 = vpop.f32.mrb[48].mxu0 }
 0x652   : > { %v5676_v54 = vpop.f32.mrb[82].mxu1  ;;  %v12254_v55 = vpop.f32.mrb[49].mxu0 }
 0x653   : > { %v5728_v56 = vadd.f32 %v5722_v51, %v5679_v5  ;;  %v12249_v58 = vpop.f32.mrb[83].mxu1  ;;  %v5725_v59 = vpop.f32.mrb[50].mxu0 }
 0x654   : > { %v12255_v60 = vpop.f32.mrb[51].mxu0 }
 0x655   : > { %v11684_v60 = vld [vmem:[%s15286_s10 + $0x10] sm:$0xf] }
 0x658   : > { %v5771_v61 = vpop.f32.mrb[84].mxu1 }
 0x659   : > { %v5777_v62 = vadd.f32 %v5771_v61, %v5728_v56  ;;  %v12260_v63 = vpop.f32.mrb[85].mxu1  ;;  %v5820_v0 = vpop.f32.mrb[52].mxu0  ;;  %v11682_v61 = vld [vmem:[%s15286_s10 + $0xc] sm:$0xf] }
 0x65a   : > { %v5774_v50 = vpop.f32.mrb[86].mxu1  ;;  %v12266_v53 = vpop.f32.mrb[53].mxu0 }
 0x65b   : > { %v5826_v1 = vadd.f32 %v5820_v0, %v5777_v62  ;;  %v12261_v2 = vpop.f32.mrb[87].mxu1  ;;  %v5823_v3 = vpop.f32.mrb[54].mxu0  ;;  %v11688_v50 = vld [vmem:[%s15286_s10 + $0x18] sm:$0xf]  ;;  %v11686_v53 = vld [vmem:[%s15286_s10 + $0x14] sm:$0xf] }
 0x65c   : > { %v12267_v4 = vpop.f32.mrb[55].mxu0 }
 0x660   : > { %v5869_v6 = vpop.f32.mrb[88].mxu1 }
 0x661   : > { %v5875_v30 = vadd.f32 %v5869_v6, %v5826_v1  ;;  %v12272_v7 = vpop.f32.mrb[89].mxu1 }
 0x662   : > { %v5872_v29 = vpop.f32.mrb[90].mxu1 }
 0x663   : > { %v5882_v33 = vadd.f32 %v5880_v8, %v5875_v30  ;;  %v12273_v15 = vpop.f32.mrb[91].mxu1  ;;  %v11692_v8 = vld [vmem:[%s15286_s10 + $0x20] sm:$0xf]  ;;  %v11690_v29 = vld [vmem:[%s15286_s10 + $0x1c] sm:$0xf] }
 0x664   : > { %v13537_v15 = vld [vmem:[%s15287_s11 + $0x4] ss:$36 sps:$4 sm:$0xff]  }
 0x665   : > { %v5883_v35 = vmax.f32 %v5882_v33, 0.0  ;;  %v13535_v33 = vld [vmem:[%s15287_s11] ss:$36 sps:$4 sm:$0xff]  }
 0x667   : > { %v5884_v36 = vpack.c.bf16 %v5883_v35, %v5883_v35  ;;  %v13538_v35 = vld [vmem:[%s15287_s11 + $0x8] ss:$36 sps:$4 sm:$0xff]  }
 0x669   : > { %11672 = vmatmul.mubr.msk.bf16.vlgmr.msra.gmra.mrb[56].mxu0 %vm5219_vm3, %v5884_v36  ;;  %11673 = vmatmul.mubr.msk.bf16.vlgmr.msra.gmra.mrb[92].mxu1 %vm5219_vm3, %v5884_v36 }
 0x66a   : > { %5971 = vmatpush1.bf16.msra.mxu0 %v14609_v12  ;;  %6012 = vmatpush1.bf16.msra.mxu1 %v14506_v31  ;;  %v6539_v31 = vld [vmem:[%s15285_s7] sm:$0xff]  ;;  %s15293_s7 = sld [smem:[#allocation12_spill]] }
 0x66b   : > { %5972 = vmatprep.subr.bf16.mxu0 %v14613_v23  ;;  %6013 = vmatprep.subr.bf16.mxu1 %v14516_v34  ;;  %v7498_v34 = vld [vmem:[%s15280_s6] sm:$0xff]  ;;  %v10430_v23 = vld [vmem:[%s13862_s27 + $0x10] sm:$0xff] }
 0x66c   : > { %6002 = vmatprep.mubr.bf16.mxu0 %v13726_v44  ;;  %6043 = vmatprep.mubr.bf16.mxu1 %v13726_v44  ;;  %v10510_v12 = vld [vmem:[%s13872_s19] sm:$0xff] }
 0x66d   : > { %6542 = vperm.xlu1 %12841, %v6539_v31   ;;  %v13543_v31 = vld [vmem:[%s15287_s11 + $0x4c] ss:$36 sps:$4 sm:$0xff]  }
 0x66e   : > { %5973 = vmatpush1.bf16.msra.mxu0 %v14618_v52  ;;  %6014 = vmatpush1.bf16.msra.mxu1 %v14526_v24  ;;  %v8278_v24 = vld [vmem:[%s13817_s20] sm:$0xff]  ;;  %v10512_v52 = vld [vmem:[%s13872_s19 + $0x10] sm:$0xff] }
 0x66f   : > { %5974 = vmatprep.subr.bf16.mxu0 %v14623_v25  ;;  %6015 = vmatprep.subr.bf16.mxu1 %v14540_v37  ;;  %v8367_v37 = vld [vmem:[%s15281_s4] sm:$0xff]  ;;  %s1254_s4 = scalar_lea.vmem %s13927_s30, %s14401_s28 }
 0x671   : > { %7502 = vperm.xlu1 %12841, %v7498_v34   ;;  %v13546_v34 = vld [vmem:[%s15287_s11 + $0x54] ss:$36 sps:$4 sm:$0xff]  }
 0x672   : > { %5975 = vmatpush1.bf16.msra.mxu0 %v14627_v26  ;;  %6016 = vmatpush1.bf16.msra.mxu1 %v14543_v39  ;;  %v9376_v39 = vld [vmem:[%s13852_s12] sm:$0xff] }
 0x673   : > { %5976 = vmatprep.subr.bf16.mxu0 %v14631_v27  ;;  %6017 = vmatprep.subr.bf16.mxu1 %v14554_v43  ;;  %v9378_v43 = vld [vmem:[%s13852_s12 + $0x10] sm:$0xff] }
 0x675   : > { %8282 = vperm.xlu1 %12841, %v8278_v24   ;;  %v13541_v24 = vld [vmem:[%s15287_s11 + $0x48] ss:$36 sps:$4 sm:$0xff]  }
 0x676   : > { %5977 = vmatpush1.bf16.msra.mxu0 %v14635_v28  ;;  %6018 = vmatpush1.bf16.msra.mxu1 %v14558_v38  ;;  %v10428_v38 = vld [vmem:[%s13862_s27] sm:$0xff] }
 0x677   : > { %12274 = vmatprep.subr.bf16.mxu0 %v13728_v57  ;;  %12286 = vmatprep.subr.bf16.mxu1 %v13728_v57 }
 0x679   : > { %11674 = vmatmul.mubr.msk.bf16.vlgmr.msra.gmra.mrb[60].mxu0 %vm5219_vm3, %v5884_v36  ;;  %11675 = vmatmul.mubr.msk.bf16.vlgmr.msra.gmra.mrb[96].mxu1 %vm5219_vm3, %v5884_v36 }
 0x67a   : > { %12275 = vmatpush3.bf16.msra.mxu0 %v14640_v46  ;;  %12282 = vmatprep.mubr.msk.bf16.mxu0 %vm13729_vm4, %v13728_v57 }
 0x67b   : > { %12276 = vmatprep.subr.bf16.mxu0 %v13728_v57  ;;  %12288 = vmatprep.mubr.msk.bf16.mxu1 %vm13729_vm4, %v13728_v57 }
 0x67c   : > { %8371 = vperm.xlu1 %12841, %v8367_v37   ;;  %v13544_v37 = vld [vmem:[%s15287_s11 + $0x50] ss:$36 sps:$4 sm:$0xff]  }
 0x67e   : > { %12277 = vmatpush3.bf16.msra.mxu0 %v14646_v40 }
 0x67f   : > { %12278 = vmatprep.subr.bf16.mxu0 %v13728_v57 }
 0x680   : > { %9382 = vperm.xlu1 %12841, %v9376_v39   ;;  %v13549_v39 = vld [vmem:[%s15287_s11 + $0x94] ss:$36 sps:$4 sm:$0xff]  }
 0x682   : > { %12279 = vmatpush3.bf16.msra.mxu0 %v14653_v47 }
 0x683   : > { %12280 = vmatprep.subr.bf16.mxu0 %v13728_v57 }
 0x684   : > { %9392 = vperm.xlu1 %12841, %v9378_v43   ;;  %v13552_v43 = vld [vmem:[%s15287_s11 + $0x9c] ss:$36 sps:$4 sm:$0xff]  }
 0x686   : > { %12281 = vmatpush3.bf16.msra.mxu0 %v14658_v48 }
 0x687   : > { %12298 = vmatprep.subr.bf16.mxu0 %v13728_v57 }
 0x688   : > { %10434 = vperm.xlu1 %12841, %v10428_v38   ;;  %v13547_v38 = vld [vmem:[%s15287_s11 + $0x90] ss:$36 sps:$4 sm:$0xff]  }
 0x689   : > { %12283 = vmatmul.mubr.msk.bf16.vlgmr.msra.gmra.mrb[64].mxu0 %vm5219_vm3, %v5884_v36  ;;  %v13540_v36 = vld [vmem:[%s15287_s11 + $0xc] ss:$36 sps:$4 sm:$0xff]  }
 0x68a   : > { %12300 = vmatprep.mubr.msk.bf16.mxu0 %vm13729_vm4, %v13728_v57 }
 0x68c   : > { %10516 = vperm.xlu1 %12841, %v10510_v12   ;;  %v13550_v12 = vld [vmem:[%s15287_s11 + $0x98] ss:$36 sps:$4 sm:$0xff]  }
 0x690   : > { %10444 = vperm.xlu1 %12841, %v10430_v23   ;;  %v13555_v23 = vld [vmem:[%s15287_s11 + $0xdc] ss:$36 sps:$4 sm:$0xff]  }
 0x694   : > { %10526 = vperm.xlu1 %12841, %v10512_v52   ;;  %v13558_v52 = vld [vmem:[%s15287_s11 + $0xe4] ss:$36 sps:$4 sm:$0xff]  }
 0x73c   : > { %v5922_v25 = vpop.f32.mrb[56].mxu0  ;;  %v5963_v26 = vpop.f32.mrb[92].mxu1 }
 0x73d   : > { %v6094_v27 = vpack.c.bf16 %v5963_v26, %v5963_v26  ;;  %v5924_v28 = vpop.f32.mrb[57].mxu0  ;;  %v5965_v46 = vpop.f32.mrb[93].mxu1  ;;  %v6092_v16 = vpack.c.bf16 %v5922_v25, %v5922_v25  ;;  %v13553_v25 = vld [vmem:[%s15287_s11 + $0xd8] ss:$36 sps:$4 sm:$0xff]   ;;  %v13556_v26 = vld [vmem:[%s15287_s11 + $0xe0] ss:$36 sps:$4 sm:$0xff]  }
 0x73e   : > { %v6093_v40 = vpack.c.bf16 %v5924_v28, %v5924_v28  ;;  %v5926_v47 = vpop.f32.mrb[58].mxu0  ;;  %v5967_v48 = vpop.f32.mrb[94].mxu1  ;;  %v6095_v19 = vpack.c.bf16 %v5965_v46, %v5965_v46  ;;  %v13564_v28 = vld [vmem:[%s15287_s11 + $0x1c] ss:$36 sps:$4 sm:$0xff]  }
 0x73f   : > { %v6202_v41 = vsel %vm5443_vm5, %v6094_v27, 0  ;;  %v5927_v45 = vpop.f32.mrb[59].mxu0  ;;  %v5968_v14 = vpop.f32.mrb[95].mxu1  ;;  %v6154_v22 = vsel %vm5443_vm5, %v6092_v16, 0  ;;  %v13561_v27 = vld [vmem:[%s15287_s11 + $0x14] ss:$36 sps:$4 sm:$0xff]  }
 0x740   : > { %v6108_v42 = vsel %vm5443_vm5, %v6093_v40, 0  ;;  %12299 = vmatpush3.bf16.msra.mxu0 %v6202_v41  ;;  %v6251_v20 = vsel %vm5443_vm5, %v6095_v19, 0 }
 0x741   : > { %12287 = vmatpush3.bf16.msra.mxu1 %v6108_v42  ;;  %12310 = vmatprep.subr.bf16.mxu0 %v13728_v57 }
 0x742   : > { %12292 = vmatprep.subr.bf16.mxu1 %v13728_v57 }
 0x743   : > { %12301 = vmatmul.mubr.msk.bf16.vlgmr.msra.gmra.mrb[68].mxu0 %vm5439_vm6, %v11680_v17 }
 0x744   : > { %12289 = vmatmul.mubr.msk.bf16.vlgmr.msra.gmra.mrb[100].mxu1 %vm5439_vm6, %v11677_v18  ;;  %12312 = vmatprep.mubr.msk.bf16.mxu0 %vm13729_vm4, %v13728_v57 }
 0x745   : > { %12293 = vmatpush3.bf16.msra.mxu1 %v6154_v22  ;;  %12294 = vmatprep.mubr.msk.bf16.mxu1 %vm13729_vm4, %v13728_v57 }
 0x746   : > { %12304 = vmatprep.subr.bf16.mxu1 %v13728_v57 }
 0x74c   : > { %v6004_v10 = vpop.f32.mrb[60].mxu0  ;;  %v6045_v21 = vpop.f32.mrb[96].mxu1  ;;  %12295 = vmatmul.mubr.msk.bf16.vlgmr.msra.gmra.mrb[104].mxu1 %vm5439_vm6, %v6101_v9 }
 0x74d   : > { %v6096_v11 = vpack.c.bf16 %v6004_v10, %v6004_v10  ;;  %v6006_v32 = vpop.f32.mrb[61].mxu0  ;;  %v6047_v5 = vpop.f32.mrb[97].mxu1  ;;  %12305 = vmatpush3.bf16.msra.mxu1 %v6251_v20  ;;  %12306 = vmatprep.mubr.msk.bf16.mxu1 %vm13729_vm4, %v13728_v57  ;;  %v6098_v55 = vpack.c.bf16 %v6045_v21, %v6045_v21 }
 0x74e   : > { %v6008_v49 = vpop.f32.mrb[62].mxu0  ;;  %v6049_v51 = vpop.f32.mrb[98].mxu1  ;;  %12316 = vmatprep.subr.bf16.mxu1 %v13728_v57  ;;  %v6097_v59 = vpack.c.bf16 %v6006_v32, %v6006_v32  ;;  %v6099_v0 = vpack.c.bf16 %v6047_v5, %v6047_v5 }
 0x74f   : > { %v6300_v54 = vsel %vm5443_vm5, %v6096_v11, 0  ;;  %v6009_v56 = vpop.f32.mrb[63].mxu0  ;;  %v6050_v58 = vpop.f32.mrb[99].mxu1  ;;  %v6398_v62 = vsel %vm5443_vm5, %v6098_v55, 0 }
 0x750   : > { %12311 = vmatpush3.bf16.msra.mxu0 %v6300_v54  ;;  %v6349_v63 = vsel %vm5443_vm5, %v6097_v59, 0  ;;  %v6447_v1 = vsel %vm5443_vm5, %v6099_v0, 0 }
 0x751   : > { %12322 = vmatprep.subr.bf16.mxu0 %v13728_v57 }
 0x753   : > { %12313 = vmatmul.mubr.msk.bf16.vlgmr.msra.gmra.mrb[72].mxu0 %vm5439_vm6, %v11684_v60 }
 0x754   : > { %12323 = vmatpush3.bf16.msra.mxu0 %v6398_v62  ;;  %12307 = vmatmul.mubr.msk.bf16.vlgmr.msra.gmra.mrb[108].mxu1 %vm5439_vm6, %v11682_v61 }
 0x755   : > { %12317 = vmatpush3.bf16.msra.mxu1 %v6349_v63  ;;  %12324 = vmatprep.mubr.msk.bf16.mxu0 %vm13729_vm4, %v13728_v57 }
 0x756   : > { %12318 = vmatprep.mubr.msk.bf16.mxu1 %vm13729_vm4, %v13728_v57  ;;  %12328 = vmatprep.subr.bf16.mxu1 %v13728_v57 }
 0x757   : > { %12334 = vmatprep.subr.bf16.mxu0 %v13728_v57 }
 0x75b   : > { %12325 = vmatmul.mubr.msk.bf16.vlgmr.msra.gmra.mrb[76].mxu0 %vm5439_vm6, %v11688_v50 }
 0x75c   : > { %v6086_v2 = vpop.f32.mrb[64].mxu0  ;;  %12319 = vmatmul.mubr.msk.bf16.vlgmr.msra.gmra.mrb[112].mxu1 %vm5439_vm6, %v11686_v53  ;;  %12336 = vmatprep.mubr.msk.bf16.mxu0 %vm13729_vm4, %v13728_v57 }
 0x75d   : > { %v6100_v3 = vpack.c.bf16 %v6086_v2, %v6086_v2  ;;  %v12284_v4 = vpop.f32.mrb[65].mxu0  ;;  %12329 = vmatpush3.bf16.msra.mxu1 %v6447_v1  ;;  %12330 = vmatprep.mubr.msk.bf16.mxu1 %vm13729_vm4, %v13728_v57 }
 0x75e   : > { %v6089_v6 = vpop.f32.mrb[66].mxu0  ;;  %6777 = vmatprep.subr.bf16.mxu1 %v13537_v15  ;;  %v6543_v15 = vpop.permute.xlu1 %6542 }
 0x75f   : > { %v6496_v30 = vsel %vm5443_vm5, %v6100_v3, 0  ;;  %v12285_v7 = vpop.f32.mrb[67].mxu0 }
 0x760   : > { %12335 = vmatpush3.bf16.msra.mxu0 %v6496_v30 }
 0x761   : > { %6818 = vmatprep.subr.bf16.mxu0 %v13540_v36 }
 0x763   : > { %12337 = vmatmul.mubr.msk.bf16.vlgmr.msra.gmra.mrb[80].mxu0 %vm5439_vm6, %v11692_v8 }
 0x764   : > { %12331 = vmatmul.mubr.msk.bf16.vlgmr.msra.gmra.mrb[116].mxu1 %vm5439_vm6, %v11690_v29  ;;  %6850 = vmatprep.mubr.bf16.mxu0 %v13726_v44 }
 0x765   : > { %6809 = vmatprep.mubr.bf16.mxu1 %v13726_v44  ;;  %6778 = vmatpush1.bf16.msra.mxu1 %v13535_v33 }
 0x766   : > { %6819 = vmatpush1.bf16.msra.mxu0 %v13538_v35  ;;  %6779 = vmatprep.subr.bf16.mxu1 %v13543_v31 }
 0x767   : > { %6820 = vmatprep.subr.bf16.mxu0 %v13546_v34  ;;  %v13559_v34 = vld [vmem:[%s15287_s11 + $0x10] ss:$36 sps:$4 sm:$0xff]  }
 0x769   : > { %6780 = vmatpush1.bf16.msra.mxu1 %v13541_v24  ;;  %v13562_v24 = vld [vmem:[%s15287_s11 + $0x18] ss:$36 sps:$4 sm:$0xff]  }
 0x76a   : > { %6821 = vmatpush1.bf16.msra.mxu0 %v13544_v37  ;;  %6781 = vmatprep.subr.bf16.mxu1 %v13549_v39  ;;  %v13567_v39 = vld [vmem:[%s15287_s11 + $0x5c] ss:$36 sps:$4 sm:$0xff]  }
 0x76b   : > { %6822 = vmatprep.subr.bf16.mxu0 %v13552_v43  ;;  %v13570_v43 = vld [vmem:[%s15287_s11 + $0x64] ss:$36 sps:$4 sm:$0xff]  }
 0x76d   : > { %6782 = vmatpush1.bf16.msra.mxu1 %v13547_v38  ;;  %v13568_v38 = vld [vmem:[%s15287_s11 + $0x60] ss:$36 sps:$4 sm:$0xff]  }
 0x76e   : > { %6823 = vmatpush1.bf16.msra.mxu0 %v13550_v12  ;;  %6783 = vmatprep.subr.bf16.mxu1 %v13555_v23  ;;  %v13573_v12 = vld [vmem:[%s15287_s11 + $0xa4] ss:$36 sps:$4 sm:$0xff]   ;;  %v13576_v23 = vld [vmem:[%s15287_s11 + $0xac] ss:$36 sps:$4 sm:$0xff]  }
 0x76f   : > { %6824 = vmatprep.subr.bf16.mxu0 %v13558_v52  ;;  %v13571_v52 = vld [vmem:[%s15287_s11 + $0xa0] ss:$36 sps:$4 sm:$0xff]  }
 0x771   : > { %6784 = vmatpush1.bf16.msra.mxu1 %v13553_v25  ;;  %v13574_v25 = vld [vmem:[%s15287_s11 + $0xa8] ss:$36 sps:$4 sm:$0xff]  }
 0x772   : > { %6825 = vmatpush1.bf16.msra.mxu0 %v13556_v26  ;;  %6859 = vmatprep.subr.bf16.mxu1 %v13561_v27  ;;  %v13579_v26 = vld [vmem:[%s15287_s11 + $0xec] ss:$36 sps:$4 sm:$0xff]   ;;  %v13582_v27 = vld [vmem:[%s15287_s11 + $0xf4] ss:$36 sps:$4 sm:$0xff]  }
 0x773   : > { %6900 = vmatprep.subr.bf16.mxu0 %v13564_v28  ;;  %v13577_v28 = vld [vmem:[%s15287_s11 + $0xe8] ss:$36 sps:$4 sm:$0xff]  }
 0x816   : > { %v6238_v46 = vpop.f32.mrb[68].mxu0 }
 0x817   : > { %v6144_v40 = vpop.f32.mrb[100].mxu1  ;;  %v12302_v47 = vpop.f32.mrb[69].mxu0 }
 0x818   : > { %v12290_v48 = vpop.f32.mrb[101].mxu1  ;;  %v6241_v41 = vpop.f32.mrb[70].mxu0  ;;  %v13584_v47 = vld [vmem:[%s15287_s11 + $0x68] ss:$36 sps:$4 sm:$0xff]  }
 0x819   : > { %v6147_v45 = vpop.f32.mrb[102].mxu1  ;;  %v12303_v14 = vpop.f32.mrb[71].mxu0  ;;  %v13585_v48 = vld [vmem:[%s15287_s11 + $0xb0] ss:$36 sps:$4 sm:$0xff]   ;;  %v13586_v41 = vld [vmem:[%s15287_s11 + $0xf8] ss:$36 sps:$4 sm:$0xff]  }
 0x81a   : > { %v12291_v16 = vpop.f32.mrb[103].mxu1 }
 0x81f   : > { %v6190_v42 = vpop.f32.mrb[104].mxu1 }
 0x820   : > { %v6191_v17 = vadd.f32 %v6190_v42, %v6144_v40  ;;  %v12296_v18 = vpop.f32.mrb[105].mxu1  ;;  %v13583_v40 = vld [vmem:[%s15287_s11 + $0x20] ss:$36 sps:$4 sm:$0xff]  }
 0x821   : > { %v6193_v22 = vpop.f32.mrb[106].mxu1 }
 0x822   : > { %v12297_v19 = vpop.f32.mrb[107].mxu1  ;;  %v6244_v9 = vadd.f32 %v6238_v46, %v6191_v17  ;;  %v13580_v46 = vld [vmem:[%s15287_s11 + $0xf0] ss:$36 sps:$4 sm:$0xff]  }
 0x826   : > { %v6336_v20 = vpop.f32.mrb[72].mxu0 }
 0x827   : > { %v6287_v10 = vpop.f32.mrb[108].mxu1  ;;  %v12314_v21 = vpop.f32.mrb[73].mxu0 }
 0x828   : > { %v6293_v11 = vadd.f32 %v6287_v10, %v6244_v9  ;;  %v12308_v32 = vpop.f32.mrb[109].mxu1  ;;  %v6339_v5 = vpop.f32.mrb[74].mxu0  ;;  %v13588_v21 = vld [vmem:[%s15289_s18 + $0x10] sm:$0xff]  }
 0x829   : > { %v6290_v49 = vpop.f32.mrb[110].mxu1  ;;  %v12315_v51 = vpop.f32.mrb[75].mxu0  ;;  %v13587_v5 = vld [vmem:[%s15289_s18 + $0x8] sm:$0xff]  }
 0x82a   : > { %v12309_v54 = vpop.f32.mrb[111].mxu1  ;;  %v6342_v55 = vadd.f32 %v6336_v20, %v6293_v11 }
 0x82b   : > { %v13589_v54 = vld [vmem:[%s15289_s18] sm:$0xff]  }
 0x82e   : > { %v6434_v56 = vpop.f32.mrb[76].mxu0 }
 0x82f   : > { %v6385_v58 = vpop.f32.mrb[112].mxu1  ;;  %v12326_v59 = vpop.f32.mrb[77].mxu0 }
 0x830   : > { %v6391_v60 = vadd.f32 %v6385_v58, %v6342_v55  ;;  %v12320_v61 = vpop.f32.mrb[113].mxu1  ;;  %v6437_v62 = vpop.f32.mrb[78].mxu0 }
 0x831   : > { %v6388_v63 = vpop.f32.mrb[114].mxu1  ;;  %v12327_v0 = vpop.f32.mrb[79].mxu0 }
 0x832   : > { %v12321_v50 = vpop.f32.mrb[115].mxu1  ;;  %v6440_v53 = vadd.f32 %v6434_v56, %v6391_v60 }
 0x836   : > { %v6532_v1 = vpop.f32.mrb[80].mxu0 }
 0x837   : > { %v6483_v2 = vpop.f32.mrb[116].mxu1  ;;  %v12338_v3 = vpop.f32.mrb[81].mxu0 }
 0x838   : > { %v6489_v4 = vadd.f32 %v6483_v2, %v6440_v53  ;;  %v12332_v6 = vpop.f32.mrb[117].mxu1  ;;  %v6535_v30 = vpop.f32.mrb[82].mxu0  ;;  %v13590_v2 = vld [vmem:[%s15289_s18 + $0x20] sm:$0xff]  }
 0x839   : > { %v6486_v7 = vpop.f32.mrb[118].mxu1  ;;  %v12339_v8 = vpop.f32.mrb[83].mxu0 }
 0x83a   : > { %v6538_v29 = vadd.f32 %v6532_v1, %v6489_v4  ;;  %v12333_v33 = vpop.f32.mrb[119].mxu1  ;;  %v13591_v4 = vld [vmem:[%s15289_s18 + $0x18] sm:$0xff]   ;;  %v13592_v7 = vld [vmem:[%s15289_s18 + $0x30] sm:$0xff]  }
 0x83c   : > { %v6545_v35 = vadd.f32 %v6543_v15, %v6538_v29  ;;  %v13593_v29 = vld [vmem:[%s15289_s18 + $0x28] sm:$0xff]  }
 0x83e   : > { %v6546_v36 = vadd.f32 %v6545_v35, %v14568_v13  ;;  %v13565_v13 = vld [vmem:[%s15287_s11 + $0x58] ss:$36 sps:$4 sm:$0xff]  }
 0x840   : > { %v6547_v31 = vmax.f32 %v6546_v36, 0.0 }
 0x842   : > { %v14855_v37 = vpack.c.bf16 %v6547_v31, %v6547_v31  ;;  %6549 = vst.msk [vmem:[%s1234_s16] sm:$0xff] %vm5219_vm3, %v6547_v31  ;;  %s15295_s16 = sld [smem:[#allocation26_spill]] }
 0x844   : > { %11730 = vmatmul.mubr.msk.bf16.vlgmr.msra.gmra.mrb[120].mxu1 %vm5219_vm3, %v14855_v37  ;;  %11731 = vmatmul.mubr.msk.bf16.vlgmr.msra.gmra.mrb[84].mxu0 %vm5219_vm3, %v14855_v37 }
 0x845   : > { %6860 = vmatpush1.bf16.msra.mxu1 %v13559_v34  ;;  %6901 = vmatpush1.bf16.msra.mxu0 %v13562_v24 }
 0x846   : > { %6861 = vmatprep.subr.bf16.mxu1 %v13567_v39  ;;  %6902 = vmatprep.subr.bf16.mxu0 %v13570_v43  ;;  %v13594_v39 = vld [vmem:[%s15289_s18 + $0x40] sm:$0xff]   ;;  %v13595_v43 = vld [vmem:[%s15289_s18 + $0x38] sm:$0xff]  }
 0x847   : > { %6891 = vmatprep.mubr.bf16.mxu1 %v13726_v44  ;;  %6932 = vmatprep.mubr.bf16.mxu0 %v13726_v44 }
 0x849   : > { %6862 = vmatpush1.bf16.msra.mxu1 %v13565_v13  ;;  %6903 = vmatpush1.bf16.msra.mxu0 %v13568_v38  ;;  %v13598_v13 = vld [vmem:[%s15290_s0 + $0x4] ss:$36 sps:$4 sm:$0xff]   ;;  %v13601_v38 = vld [vmem:[%s15290_s0 + $0xc] ss:$36 sps:$4 sm:$0xff]  }
 0x84a   : > { %6863 = vmatprep.subr.bf16.mxu1 %v13573_v12  ;;  %6904 = vmatprep.subr.bf16.mxu0 %v13576_v23  ;;  %v13596_v12 = vld [vmem:[%s15290_s0] ss:$36 sps:$4 sm:$0xff]   ;;  %v13599_v23 = vld [vmem:[%s15290_s0 + $0x8] ss:$36 sps:$4 sm:$0xff]  }
 0x84d   : > { %6864 = vmatpush1.bf16.msra.mxu1 %v13571_v52  ;;  %6905 = vmatpush1.bf16.msra.mxu0 %v13574_v25  ;;  %v13604_v52 = vld [vmem:[%s15290_s0 + $0x14] ss:$36 sps:$4 sm:$0xff]   ;;  %v13607_v25 = vld [vmem:[%s15290_s0 + $0x1c] ss:$36 sps:$4 sm:$0xff]  }
 0x84e   : > { %6865 = vmatprep.subr.bf16.mxu1 %v13579_v26  ;;  %6906 = vmatprep.subr.bf16.mxu0 %v13582_v27 }
 0x851   : > { %6866 = vmatpush1.bf16.msra.mxu1 %v13577_v28  ;;  %6907 = vmatpush1.bf16.msra.mxu0 %v13580_v46 }
 0x852   : > { %12340 = vmatprep.subr.bf16.mxu1 %v13728_v57  ;;  %12352 = vmatprep.subr.bf16.mxu0 %v13728_v57 }
 0x854   : > { %11732 = vmatmul.mubr.msk.bf16.vlgmr.msra.gmra.mrb[124].mxu1 %vm5219_vm3, %v14855_v37  ;;  %11733 = vmatmul.mubr.msk.bf16.vlgmr.msra.gmra.mrb[88].mxu0 %vm5219_vm3, %v14855_v37 }
 0x855   : > { %12341 = vmatpush3.bf16.msra.mxu1 %v13583_v40  ;;  %12348 = vmatprep.mubr.msk.bf16.mxu1 %vm13729_vm4, %v13728_v57 }
 0x856   : > { %12342 = vmatprep.subr.bf16.mxu1 %v13728_v57  ;;  %12354 = vmatprep.mubr.msk.bf16.mxu0 %vm13729_vm4, %v13728_v57 }
 0x859   : > { %12343 = vmatpush3.bf16.msra.mxu1 %v13584_v47 }
 0x85a   : > { %12344 = vmatprep.subr.bf16.mxu1 %v13728_v57 }
 0x85d   : > { %12345 = vmatpush3.bf16.msra.mxu1 %v13585_v48 }
 0x85e   : > { %12346 = vmatprep.subr.bf16.mxu1 %v13728_v57 }
 0x861   : > { %12347 = vmatpush3.bf16.msra.mxu1 %v13586_v41 }
 0x862   : > { %12364 = vmatprep.subr.bf16.mxu1 %v13728_v57 }
 0x864   : > { %12349 = vmatmul.mubr.msk.bf16.vlgmr.msra.gmra.mrb[128].mxu1 %vm5219_vm3, %v14855_v37 }
 0x865   : > { %12366 = vmatprep.mubr.msk.bf16.mxu1 %vm13729_vm4, %v13728_v57 }
 0x917   : > { %v6811_v45 = vpop.f32.mrb[120].mxu1  ;;  %v6852_v14 = vpop.f32.mrb[84].mxu0 }
 0x918   : > { %v6983_v16 = vpack.c.bf16 %v6852_v14, %v6852_v14  ;;  %v6813_v42 = vpop.f32.mrb[121].mxu1  ;;  %v6854_v17 = vpop.f32.mrb[85].mxu0  ;;  %v6981_v11 = vpack.c.bf16 %v6811_v45, %v6811_v45 }
 0x919   : > { %v6982_v18 = vpack.c.bf16 %v6813_v42, %v6813_v42  ;;  %v6815_v22 = vpop.f32.mrb[122].mxu1  ;;  %v6856_v19 = vpop.f32.mrb[86].mxu0  ;;  %v6984_v51 = vpack.c.bf16 %v6854_v17, %v6854_v17 }
 0x91a   : > { %v7111_v9 = vsel %vm5443_vm5, %v6983_v16, 0  ;;  %v6816_v20 = vpop.f32.mrb[123].mxu1  ;;  %v6857_v10 = vpop.f32.mrb[87].mxu0  ;;  %v7056_v49 = vsel %vm5443_vm5, %v6981_v11, 0 }
 0x91b   : > { %v7004_v32 = vsel %vm5443_vm5, %v6982_v18, 0  ;;  %12365 = vmatpush3.bf16.msra.mxu1 %v7111_v9  ;;  %v7168_v55 = vsel %vm5443_vm5, %v6984_v51, 0 }
 0x91c   : > { %12353 = vmatpush3.bf16.msra.mxu0 %v7004_v32  ;;  %12376 = vmatprep.subr.bf16.mxu1 %v13728_v57 }
 0x91d   : > { %12358 = vmatprep.subr.bf16.mxu0 %v13728_v57 }
 0x91e   : > { %12367 = vmatmul.mubr.msk.bf16.vlgmr.msra.gmra.mrb[132].mxu1 %vm5439_vm6, %v13588_v21 }
 0x91f   : > { %12355 = vmatmul.mubr.msk.bf16.vlgmr.msra.gmra.mrb[92].mxu0 %vm5439_vm6, %v13587_v5  ;;  %12378 = vmatprep.mubr.msk.bf16.mxu1 %vm13729_vm4, %v13728_v57 }
 0x920   : > { %12359 = vmatpush3.bf16.msra.mxu0 %v7056_v49  ;;  %12360 = vmatprep.mubr.msk.bf16.mxu0 %vm13729_vm4, %v13728_v57 }
 0x921   : > { %12370 = vmatprep.subr.bf16.mxu0 %v13728_v57 }
 0x927   : > { %v6893_v56 = vpop.f32.mrb[124].mxu1  ;;  %v6934_v58 = vpop.f32.mrb[88].mxu0  ;;  %12361 = vmatmul.mubr.msk.bf16.vlgmr.msra.gmra.mrb[96].mxu0 %vm5439_vm6, %v13589_v54 }
 0x928   : > { %v6985_v59 = vpack.c.bf16 %v6893_v56, %v6893_v56  ;;  %v6895_v60 = vpop.f32.mrb[125].mxu1  ;;  %v6936_v61 = vpop.f32.mrb[89].mxu0  ;;  %12371 = vmatpush3.bf16.msra.mxu0 %v7168_v55  ;;  %12372 = vmatprep.mubr.msk.bf16.mxu0 %vm13729_vm4, %v13728_v57  ;;  %v6987_v50 = vpack.c.bf16 %v6934_v58, %v6934_v58 }
 0x929   : > { %v6897_v62 = vpop.f32.mrb[126].mxu1  ;;  %v6938_v63 = vpop.f32.mrb[90].mxu0  ;;  %12382 = vmatprep.subr.bf16.mxu0 %v13728_v57  ;;  %v6986_v3 = vpack.c.bf16 %v6895_v60, %v6895_v60  ;;  %v6988_v8 = vpack.c.bf16 %v6936_v61, %v6936_v61 }
 0x92a   : > { %v7225_v0 = vsel %vm5443_vm5, %v6985_v59, 0  ;;  %v6898_v53 = vpop.f32.mrb[127].mxu1  ;;  %v6939_v1 = vpop.f32.mrb[91].mxu0  ;;  %v7339_v6 = vsel %vm5443_vm5, %v6987_v50, 0 }
 0x92b   : > { %12377 = vmatpush3.bf16.msra.mxu1 %v7225_v0  ;;  %v7282_v30 = vsel %vm5443_vm5, %v6986_v3, 0  ;;  %v7396_v33 = vsel %vm5443_vm5, %v6988_v8, 0 }
 0x92c   : > { %12388 = vmatprep.subr.bf16.mxu1 %v13728_v57 }
 0x92e   : > { %12379 = vmatmul.mubr.msk.bf16.vlgmr.msra.gmra.mrb[136].mxu1 %vm5439_vm6, %v13590_v2 }
 0x92f   : > { %12389 = vmatpush3.bf16.msra.mxu1 %v7339_v6  ;;  %12373 = vmatmul.mubr.msk.bf16.vlgmr.msra.gmra.mrb[100].mxu0 %vm5439_vm6, %v13591_v4 }
 0x930   : > { %12383 = vmatpush3.bf16.msra.mxu0 %v7282_v30  ;;  %12390 = vmatprep.mubr.msk.bf16.mxu1 %vm13729_vm4, %v13728_v57 }
 0x931   : > { %12384 = vmatprep.mubr.msk.bf16.mxu0 %vm13729_vm4, %v13728_v57  ;;  %12394 = vmatprep.subr.bf16.mxu0 %v13728_v57 }
 0x932   : > { %12400 = vmatprep.subr.bf16.mxu1 %v13728_v57 }
 0x936   : > { %12391 = vmatmul.mubr.msk.bf16.vlgmr.msra.gmra.mrb[140].mxu1 %vm5439_vm6, %v13592_v7 }
 0x937   : > { %v6975_v15 = vpop.f32.mrb[128].mxu1  ;;  %12385 = vmatmul.mubr.msk.bf16.vlgmr.msra.gmra.mrb[104].mxu0 %vm5439_vm6, %v13593_v29  ;;  %12402 = vmatprep.mubr.msk.bf16.mxu1 %vm13729_vm4, %v13728_v57 }
 0x938   : > { %v6989_v35 = vpack.c.bf16 %v6975_v15, %v6975_v15  ;;  %v12350_v36 = vpop.f32.mrb[129].mxu1  ;;  %12395 = vmatpush3.bf16.msra.mxu0 %v7396_v33  ;;  %12396 = vmatprep.mubr.msk.bf16.mxu0 %vm13729_vm4, %v13728_v57 }
 0x939   : > { %v6978_v31 = vpop.f32.mrb[130].mxu1  ;;  %7575 = vmatprep.subr.bf16.mxu0 %v13598_v13 }
 0x93a   : > { %v7453_v34 = vsel %vm5443_vm5, %v6989_v35, 0  ;;  %v12351_v24 = vpop.f32.mrb[131].mxu1 }
 0x93b   : > { %12401 = vmatpush3.bf16.msra.mxu1 %v7453_v34  ;;  %v7503_v34 = vpop.permute.xlu1 %7502 }
 0x93c   : > { %7618 = vmatprep.subr.bf16.mxu1 %v13601_v38 }
 0x93e   : > { %12403 = vmatmul.mubr.msk.bf16.vlgmr.msra.gmra.mrb[144].mxu1 %vm5439_vm6, %v13594_v39 }
 0x93f   : > { %12397 = vmatmul.mubr.msk.bf16.vlgmr.msra.gmra.mrb[108].mxu0 %vm5439_vm6, %v13595_v43  ;;  %7650 = vmatprep.mubr.bf16.mxu1 %v13726_v44  ;;  %v7508_v43 = vpop.permute.xlu0 %7507 }
 0x940   : > { %7607 = vmatprep.mubr.bf16.mxu0 %v13726_v44  ;;  %7576 = vmatpush1.bf16.msra.mxu0 %v13596_v12 }
 0x941   : > { %7619 = vmatpush1.bf16.msra.mxu1 %v13599_v23  ;;  %7661 = vmatprep.subr.bf16.mxu0 %v13604_v52  ;;  %v13602_v23 = vld [vmem:[%s15290_s0 + $0x10] ss:$36 sps:$4 sm:$0xff]   ;;  %v13605_v52 = vld [vmem:[%s15290_s0 + $0x18] ss:$36 sps:$4 sm:$0xff]  }
 0x942   : > { %7704 = vmatprep.subr.bf16.mxu1 %v13607_v25 }
 0x9f1   : > { %v7147_v26 = vpop.f32.mrb[132].mxu1 }
 0x9f2   : > { %v7040_v27 = vpop.f32.mrb[92].mxu0  ;;  %v12368_v28 = vpop.f32.mrb[133].mxu1 }
 0x9f3   : > { %v12356_v46 = vpop.f32.mrb[93].mxu0  ;;  %v7150_v40 = vpop.f32.mrb[134].mxu1  ;;  %v13610_v28 = vld [vmem:[%s15291_s26 + $0x8] sm:$0xff]  }
 0x9f4   : > { %v7043_v47 = vpop.f32.mrb[94].mxu0  ;;  %v12369_v48 = vpop.f32.mrb[135].mxu1  ;;  %v13611_v46 = vld [vmem:[%s15291_s26 + $0x10] sm:$0xff]  }
 0x9f5   : > { %v12357_v41 = vpop.f32.mrb[95].mxu0 }
 0x9fa   : > { %v7092_v45 = vpop.f32.mrb[96].mxu0 }
 0x9fb   : > { %v7093_v14 = vadd.f32 %v7092_v45, %v7040_v27  ;;  %v12362_v16 = vpop.f32.mrb[97].mxu0  ;;  %v13609_v27 = vld [vmem:[%s15291_s26] sm:$0xff]  }
 0x9fc   : > { %v7095_v42 = vpop.f32.mrb[98].mxu0 }
 0x9fd   : > { %v7096_v17 = vadd.f32 %v7095_v42, %v7043_v47  ;;  %v12363_v18 = vpop.f32.mrb[99].mxu0  ;;  %v7154_v22 = vadd.f32 %v7147_v26, %v7093_v14  ;;  %v13608_v26 = vld [vmem:[%s15290_s0 + $0x20] ss:$36 sps:$4 sm:$0xff]   ;;  %s15298_s0 = sld [smem:[#allocation20_spill]] }
 0x9ff   : > { %v7155_v19 = vadd.f32 %v7150_v40, %v7096_v17  ;;  %v13612_v40 = vld [vmem:[%s15291_s26 + $0x18] sm:$0xff]  }
 0xa01   : > { %v7261_v9 = vpop.f32.mrb[136].mxu1 }
 0xa02   : > { %v7204_v20 = vpop.f32.mrb[100].mxu0  ;;  %v12380_v10 = vpop.f32.mrb[137].mxu1 }
 0xa03   : > { %v7211_v21 = vadd.f32 %v7204_v20, %v7154_v22  ;;  %v12374_v11 = vpop.f32.mrb[101].mxu0  ;;  %v7264_v32 = vpop.f32.mrb[138].mxu1  ;;  %v13613_v20 = vld [vmem:[%s15292_s1 + $0x8] sm:$0xff]  }
 0xa04   : > { %v7207_v5 = vpop.f32.mrb[102].mxu0  ;;  %v12381_v49 = vpop.f32.mrb[139].mxu1 }
 0xa05   : > { %v7212_v51 = vadd.f32 %v7207_v5, %v7155_v19  ;;  %v12375_v54 = vpop.f32.mrb[103].mxu0  ;;  %v7268_v55 = vadd.f32 %v7261_v9, %v7211_v21 }
 0xa07   : > { %v7269_v56 = vadd.f32 %v7264_v32, %v7212_v51 }
 0xa09   : > { %v7375_v58 = vpop.f32.mrb[140].mxu1 }
 0xa0a   : > { %v7318_v59 = vpop.f32.mrb[104].mxu0  ;;  %v12392_v60 = vpop.f32.mrb[141].mxu1 }
 0xa0b   : > { %v7325_v61 = vadd.f32 %v7318_v59, %v7268_v55  ;;  %v12386_v62 = vpop.f32.mrb[105].mxu0  ;;  %v7378_v63 = vpop.f32.mrb[142].mxu1 }
 0xa0c   : > { %v7321_v0 = vpop.f32.mrb[106].mxu0  ;;  %v12393_v50 = vpop.f32.mrb[143].mxu1 }
 0xa0d   : > { %v7326_v53 = vadd.f32 %v7321_v0, %v7269_v56  ;;  %v12387_v1 = vpop.f32.mrb[107].mxu0  ;;  %v7382_v2 = vadd.f32 %v7375_v58, %v7325_v61  ;;  %v13614_v61 = vld [vmem:[%s15292_s1] sm:$0xff]   ;;  %v13615_v50 = vld [vmem:[%s15292_s1 + $0x10] sm:$0xff]  }
 0xa0f   : > { %v7383_v3 = vadd.f32 %v7378_v63, %v7326_v53 }
 0xa11   : > { %v7489_v4 = vpop.f32.mrb[144].mxu1 }
 0xa12   : > { %v7432_v6 = vpop.f32.mrb[108].mxu0  ;;  %v12404_v30 = vpop.f32.mrb[145].mxu1 }
 0xa13   : > { %v7439_v7 = vadd.f32 %v7432_v6, %v7382_v2  ;;  %v12398_v8 = vpop.f32.mrb[109].mxu0  ;;  %v7492_v29 = vpop.f32.mrb[146].mxu1  ;;  %v13617_v6 = vld [vmem:[%s15292_s1 + $0x20] sm:$0xff]   ;;  %v13618_v30 = vld [vmem:[%s15292_s1 + $0x28] sm:$0xff]  }
 0xa14   : > { %v7435_v33 = vpop.f32.mrb[110].mxu0  ;;  %v12405_v15 = vpop.f32.mrb[147].mxu1  ;;  %v13620_v8 = vld [vmem:[%s15292_s1 + $0x38] sm:$0xff]  }
 0xa15   : > { %v7496_v35 = vadd.f32 %v7489_v4, %v7439_v7  ;;  %v7440_v36 = vadd.f32 %v7435_v33, %v7383_v3  ;;  %v12399_v31 = vpop.f32.mrb[111].mxu0  ;;  %v13616_v4 = vld [vmem:[%s15292_s1 + $0x18] sm:$0xff]   ;;  %v13619_v7 = vld [vmem:[%s15292_s1 + $0x30] sm:$0xff]   ;;  %v13621_v33 = vld [vmem:[%s15292_s1 + $0x40] sm:$0xff]   ;;  %s15299_s1 = sld [smem:[#allocation18_spill]] }
 0xa16   : > { %v13623_v31 = vld [vmem:[%s15294_s15] ss:$36 sps:$4 sm:$0xff]  }
 0xa17   : > { %v7510_v24 = vadd.f32 %v7503_v34, %v7496_v35  ;;  %v7497_v39 = vadd.f32 %v7492_v29, %v7440_v36  ;;  %v13622_v35 = vld [vmem:[%s15293_s7] sm:$0xff]   ;;  %v13628_v34 = vld [vmem:[%s15294_s15 + $0xc] ss:$36 sps:$4 sm:$0xff]   ;;  %s1239_s7 = scalar_lea.vmem %s15295_s16, %s14401_s28  ;;  %s15296_s16 = sld [smem:[#allocation17_spill]] }
 0xa18   : > { %v13625_v36 = vld [vmem:[%s15294_s15 + $0x4] ss:$36 sps:$4 sm:$0xff]  }
 0xa19   : > { %v7511_v13 = vadd.f32 %v7508_v43, %v7497_v39  ;;  %v7512_v38 = vmax.f32 %v7510_v24, 0.0  ;;  %v8283_v24 = vpop.permute.xlu1 %8282  ;;  %v8288_v39 = vpop.permute.xlu0 %8287 }
 0xa1b   : > { %v7513_v12 = vmax.f32 %v7511_v13, 0.0 }
 0xa1d   : > { %v7514_v25 = vpack.c.bf16 %v7513_v12, %v7512_v38  ;;  %v8372_v43 = vpop.permute.xlu1 %8371  ;;  %v8377_v38 = vpop.permute.xlu0 %8376 }
 0xa1e   : > { %v12664_v13 = vadd.f32 %v8372_v43, %v8283_v24  ;;  %v13648_v24 = vld [vmem:[%s15296_s16 + $0x60] sm:$0xff]   ;;  %v13650_v43 = vld [vmem:[%s15296_s16 + $0x70] sm:$0xff]  }
 0xa1f   : > { %11778 = vmatmul.mubr.msk.bf16.vlgmr.msra.gmra.mrb[112].mxu0 %vm7571_vm7, %v7514_v25  ;;  %11779 = vmatmul.mubr.msk.bf16.vlgmr.msra.gmra.mrb[148].mxu1 %vm7571_vm7, %v7514_v25 }
 0xa20   : > { %7662 = vmatpush1.bf16.msra.mxu0 %v13602_v23  ;;  %7705 = vmatpush1.bf16.msra.mxu1 %v13605_v52  ;;  %v12666_v23 = vadd.f32 %v8377_v38, %v8288_v39  ;;  %v13649_v39 = vld [vmem:[%s15296_s16 + $0x68] sm:$0xff]   ;;  %v13652_v38 = vld [vmem:[%s15296_s16 + $0x80] sm:$0xff]  }
 0xa21   : > { %7693 = vmatprep.mubr.bf16.mxu0 %v13726_v44  ;;  %7736 = vmatprep.mubr.bf16.mxu1 %v13726_v44 }
 0xa22   : > { %12406 = vmatprep.subr.bf16.mxu0 %v13728_v57  ;;  %12412 = vmatprep.subr.bf16.mxu1 %v13728_v57 }
 0xa27   : > { %11780 = vmatmul.mubr.msk.bf16.vlgmr.msra.gmra.mrb[116].mxu0 %vm7571_vm7, %v7514_v25  ;;  %11781 = vmatmul.mubr.msk.bf16.vlgmr.msra.gmra.mrb[152].mxu1 %vm7571_vm7, %v7514_v25 }
 0xa28   : > { %12407 = vmatpush3.bf16.msra.mxu0 %v13608_v26  ;;  %12408 = vmatprep.mubr.msk.bf16.mxu0 %vm13729_vm4, %v13728_v57 }
 0xa29   : > { %12466 = vmatprep.subr.bf16.mxu0 %v13728_v57  ;;  %12414 = vmatprep.mubr.msk.bf16.mxu1 %vm13729_vm4, %v13728_v57 }
 0xa2f   : > { %12409 = vmatmul.mubr.msk.bf16.vlgmr.msra.gmra.mrb[120].mxu0 %vm7571_vm7, %v7514_v25 }
 0xa30   : > { %12467 = vmatpush3.bf16.msra.mxu0 %v13609_v27  ;;  %12474 = vmatprep.mubr.msk.bf16.mxu0 %vm13729_vm4, %v13728_v57 }
 0xa31   : > { %12468 = vmatprep.subr.bf16.mxu0 %v13728_v57 }
 0xa34   : > { %12469 = vmatpush3.bf16.msra.mxu0 %v13610_v28 }
 0xa35   : > { %12470 = vmatprep.subr.bf16.mxu0 %v13728_v57 }
 0xa38   : > { %12471 = vmatpush3.bf16.msra.mxu0 %v13611_v46 }
 0xa39   : > { %12472 = vmatprep.subr.bf16.mxu0 %v13728_v57 }
 0xa3c   : > { %12473 = vmatpush3.bf16.msra.mxu0 %v13612_v40 }
 0xa3d   : > { %8497 = vmatprep.subr.bf16.mxu0 %v13625_v36  ;;  %v13645_v36 = vld [vmem:[%s15296_s16 + $0x48] sm:$0xff]  }
 0xa3f   : > { %12475 = vmatmul.mubr.msk.bf16.vlgmr.msra.gmra.mrb[124].mxu0 %vm5219_vm3, %v14855_v37 }
 0xa40   : > { %8529 = vmatprep.mubr.bf16.mxu0 %v13726_v44  ;;  %8498 = vmatpush1.bf16.msra.mxu0 %v13623_v31  ;;  %v13646_v31 = vld [vmem:[%s15296_s16 + $0x50] sm:$0xff]  }
 0xa41   : > { %8540 = vmatprep.subr.bf16.mxu0 %v13628_v34  ;;  %v13647_v34 = vld [vmem:[%s15296_s16 + $0x58] sm:$0xff]  }
 0xaf2   : > { %v7609_v47 = vpop.f32.mrb[112].mxu0  ;;  %v7652_v48 = vpop.f32.mrb[148].mxu1 }
 0xaf3   : > { %v7611_v41 = vpop.f32.mrb[113].mxu0  ;;  %v7654_v45 = vpop.f32.mrb[149].mxu1 }
 0xaf4   : > { %v7613_v14 = vpop.f32.mrb[114].mxu0  ;;  %v7656_v16 = vpop.f32.mrb[150].mxu1 }
 0xaf5   : > { %v7788_v42 = vpack.c.bf16 %v7613_v14, %v7609_v47  ;;  %v7790_v17 = vpack.c.bf16 %v7656_v16, %v7652_v48  ;;  %v7615_v18 = vpop.f32.mrb[115].mxu0  ;;  %v7658_v22 = vpop.f32.mrb[151].mxu1  ;;  %v13626_v47 = vld [vmem:[%s15294_s15 + $0x8] ss:$36 sps:$4 sm:$0xff]   ;;  %v13634_v14 = vld [vmem:[%s15294_s15 + $0x1c] ss:$36 sps:$4 sm:$0xff]  }
 0xaf6   : > { %v7789_v19 = vpack.c.bf16 %v7615_v18, %v7611_v41  ;;  %v7791_v9 = vpack.c.bf16 %v7658_v22, %v7654_v45  ;;  %v13631_v41 = vld [vmem:[%s15294_s15 + $0x14] ss:$36 sps:$4 sm:$0xff]  }
 0xaf7   : > { %v13629_v45 = vld [vmem:[%s15294_s15 + $0x10] ss:$36 sps:$4 sm:$0xff]   ;;  %v13632_v16 = vld [vmem:[%s15294_s15 + $0x18] ss:$36 sps:$4 sm:$0xff]  }
 0xaf8   : > { %12413 = vmatpush3.bf16.msra.mxu1 %v7789_v19 }
 0xaf9   : > { %12418 = vmatprep.subr.bf16.mxu1 %v13728_v57 }
 0xafa   : > { %v7695_v10 = vpop.f32.mrb[116].mxu0  ;;  %v7738_v37 = vpop.f32.mrb[152].mxu1 }
 0xafb   : > { %v7697_v21 = vpop.f32.mrb[117].mxu0  ;;  %v7740_v11 = vpop.f32.mrb[153].mxu1  ;;  %12415 = vmatmul.mubr.msk.bf16.vlgmr.msra.gmra.mrb[156].mxu1 %vm7571_vm7, %v13613_v20 }
 0xafc   : > { %v7699_v32 = vpop.f32.mrb[118].mxu0  ;;  %v7742_v5 = vpop.f32.mrb[154].mxu1  ;;  %12419 = vmatpush3.bf16.msra.mxu1 %v7788_v42  ;;  %12420 = vmatprep.mubr.msk.bf16.mxu1 %vm13729_vm4, %v13728_v57  ;;  %v13635_v42 = vld [vmem:[%s15294_s15 + $0x20] ss:$36 sps:$4 sm:$0xff]  }
 0xafd   : > { %v7792_v49 = vpack.c.bf16 %v7699_v32, %v7695_v10  ;;  %v7794_v51 = vpack.c.bf16 %v7742_v5, %v7738_v37  ;;  %v7701_v54 = vpop.f32.mrb[119].mxu0  ;;  %v7744_v55 = vpop.f32.mrb[155].mxu1  ;;  %12424 = vmatprep.subr.bf16.mxu1 %v13728_v57  ;;  %v13637_v37 = vld [vmem:[%s15296_s16 + $0x18] sm:$0xff]  }
 0xafe   : > { %v7793_v56 = vpack.c.bf16 %v7701_v54, %v7697_v21  ;;  %v7795_v58 = vpack.c.bf16 %v7744_v55, %v7740_v11  ;;  %v13638_v21 = vld [vmem:[%s15296_s16] sm:$0xff]  }
 0xb02   : > { %v7781_v59 = vpop.f32.mrb[120].mxu0 }
 0xb03   : > { %v12410_v60 = vpop.f32.mrb[121].mxu0 }
 0xb04   : > { %v7784_v62 = vpop.f32.mrb[122].mxu0 }
 0xb05   : > { %v7796_v63 = vpack.c.bf16 %v7784_v62, %v7781_v59  ;;  %v12411_v0 = vpop.f32.mrb[123].mxu0  ;;  %v13639_v59 = vld [vmem:[%s15296_s16 + $0x8] sm:$0xff]   ;;  %v13640_v62 = vld [vmem:[%s15296_s16 + $0x20] sm:$0xff]  }
 0xb07   : > { %12421 = vmatmul.mubr.msk.bf16.vlgmr.msra.gmra.mrb[156].mxu1 %vm7571_vm7, %v13614_v61 }
 0xb08   : > { %12425 = vmatpush3.bf16.msra.mxu1 %v7790_v17  ;;  %12426 = vmatprep.mubr.msk.bf16.mxu1 %vm13729_vm4, %v13728_v57  ;;  %v13636_v17 = vld [vmem:[%s15296_s16 + $0x10] sm:$0xff]  }
 0xb09   : > { %12430 = vmatprep.subr.bf16.mxu1 %v13728_v57 }
 0xb12   : > { %v8358_v53 = vpop.f32.mrb[124].mxu0 }
 0xb13   : > { %v12476_v1 = vpop.f32.mrb[125].mxu0  ;;  %12427 = vmatmul.mubr.msk.bf16.vlgmr.msra.gmra.mrb[156].mxu1 %vm7571_vm7, %v13615_v50  ;;  %v8364_v29 = vpack.c.bf16 %v8358_v53, %v8358_v53 }
 0xb14   : > { %12431 = vmatpush3.bf16.msra.mxu1 %v7791_v9  ;;  %v8361_v2 = vpop.f32.mrb[126].mxu0  ;;  %12432 = vmatprep.mubr.msk.bf16.mxu1 %vm13729_vm4, %v13728_v57 }
 0xb15   : > { %v12477_v3 = vpop.f32.mrb[127].mxu0  ;;  %12436 = vmatprep.subr.bf16.mxu1 %v13728_v57  ;;  %v8388_v15 = vsel %vm5443_vm5, %v8364_v29, 0 }
 0xb1f   : > { %12433 = vmatmul.mubr.msk.bf16.vlgmr.msra.gmra.mrb[156].mxu1 %vm7571_vm7, %v13616_v4  ;;  %v13641_v4 = vld [vmem:[%s15296_s16 + $0x28] sm:$0xff]  }
 0xb20   : > { %12437 = vmatpush3.bf16.msra.mxu1 %v7792_v49  ;;  %12438 = vmatprep.mubr.msk.bf16.mxu1 %vm13729_vm4, %v13728_v57 }
 0xb21   : > { %12442 = vmatprep.subr.bf16.mxu1 %v13728_v57 }
 0xb2b   : > { %12439 = vmatmul.mubr.msk.bf16.vlgmr.msra.gmra.mrb[156].mxu1 %vm7571_vm7, %v13617_v6  ;;  %v13642_v6 = vld [vmem:[%s15296_s16 + $0x30] sm:$0xff]  }
 0xb2c   : > { %12443 = vmatpush3.bf16.msra.mxu1 %v7793_v56  ;;  %12444 = vmatprep.mubr.msk.bf16.mxu1 %vm13729_vm4, %v13728_v57 }
 0xb2d   : > { %12448 = vmatprep.subr.bf16.mxu1 %v13728_v57 }
 0xb37   : > { %12445 = vmatmul.mubr.msk.bf16.vlgmr.msra.gmra.mrb[156].mxu1 %vm7571_vm7, %v13618_v30 }
 0xb38   : > { %12449 = vmatpush3.bf16.msra.mxu1 %v7794_v51  ;;  %12450 = vmatprep.mubr.msk.bf16.mxu1 %vm13729_vm4, %v13728_v57 }
 0xb39   : > { %12454 = vmatprep.subr.bf16.mxu1 %v13728_v57 }
 0xb43   : > { %12451 = vmatmul.mubr.msk.bf16.vlgmr.msra.gmra.mrb[156].mxu1 %vm7571_vm7, %v13619_v7 }
 0xb44   : > { %12455 = vmatpush3.bf16.msra.mxu1 %v7795_v58  ;;  %12456 = vmatprep.mubr.msk.bf16.mxu1 %vm13729_vm4, %v13728_v57 }
 0xb45   : > { %12460 = vmatprep.subr.bf16.mxu1 %v13728_v57 }
 0xb4f   : > { %12457 = vmatmul.mubr.msk.bf16.vlgmr.msra.gmra.mrb[156].mxu1 %vm7571_vm7, %v13620_v8 }
 0xb50   : > { %12461 = vmatpush3.bf16.msra.mxu1 %v7796_v63  ;;  %12462 = vmatprep.mubr.msk.bf16.mxu1 %vm13729_vm4, %v13728_v57 }
 0xb51   : > { %12478 = vmatprep.subr.bf16.mxu1 %v13728_v57 }
 0xb5b   : > { %12463 = vmatmul.mubr.msk.bf16.vlgmr.msra.gmra.mrb[156].mxu1 %vm7571_vm7, %v13621_v33 }
 0xb5c   : > { %12479 = vmatpush3.bf16.msra.mxu1 %v8388_v15  ;;  %12480 = vmatprep.mubr.msk.bf16.mxu1 %vm13729_vm4, %v13728_v57  ;;  %v13643_v15 = vld [vmem:[%s15296_s16 + $0x38] sm:$0xff]  }
 0xb67   : > { %12481 = vmatmul.mubr.msk.bf16.vlgmr.msra.gmra.mrb[156].mxu1 %vm5439_vm6, %v13622_v35  ;;  %v13644_v35 = vld [vmem:[%s15296_s16 + $0x40] sm:$0xff]  }
 0xb68   : > { %9523 = vmatprep.mubr.bf16.mxu1 %v13726_v44 }
 0xc3a   : > { %v8424_v12 = vpop.f32.mrb[156].mxu1 }
 0xc3b   : > { %v12665_v52 = vadd.f32 %v12664_v13, %v8424_v12  ;;  %v12482_v25 = vpop.f32.mrb[157].mxu1  ;;  %v13651_v13 = vld [vmem:[%s15296_s16 + $0x78] sm:$0xff]   ;;  %v13653_v12 = vld [vmem:[%s15296_s16 + $0x88] sm:$0xff]  }
 0xc3c   : > { %v8427_v26 = vpop.f32.mrb[158].mxu1  ;;  %v9420_v25 = vlaneseq }
 0xc3d   : > { %v8433_v27 = vmax.f32 %v12665_v52, 0.0  ;;  %v12667_v28 = vadd.f32 %v12666_v23, %v8427_v26  ;;  %v12483_v46 = vpop.f32.mrb[159].mxu1  ;;  %v13730_v23 = vmov 1983009808  }
 0xc3e   : > { %v9418_v52 = vunpack.c.l.s4 %v13730_v23  ;;  %v13659_v23 = vld [vmem:[%s15299_s1] sm:$0xff]  }
 0xc3f   : > { %8436 = vst.msk [vmem:[%s1239_s7] sm:$0xff] %vm7571_vm7, %v8433_v27  ;;  %v8434_v40 = vmax.f32 %v12667_v28, 0.0 }
 0xc40   : > { %v9419_v26 = vunpack.c.0.s8 %v9418_v52 }
 0xc41   : > { %v15039_v48 = vpack.c.bf16 %v8434_v40, %v8433_v27  ;;  %8437 = vst.msk [vmem:[%s1239_s7 + $0x8] sm:$0xff] %vm7571_vm7, %v8434_v40  ;;  %s15297_s7 = sld [smem:[#allocation16_spill]]  ;;  %v9421_v27 = vshrl.u32 %v9420_v25, 7 }
 0xc43   : > { %11833 = vmatmul.mubr.msk.bf16.vlgmr.msra.gmra.mrb[128].mxu0 %vm7571_vm7, %v15039_v48  ;;  %v9422_v28 = vsub.s32 %v9419_v26, %v9421_v27 }
 0xc44   : > { %8541 = vmatpush1.bf16.msra.mxu0 %v13626_v47  ;;  %8572 = vmatprep.mubr.bf16.mxu0 %v13726_v44 }
 0xc45   : > { %8583 = vmatprep.subr.bf16.mxu0 %v13631_v41 }
 0xc47   : > { %v9410_v46 = vld [vmem:[%s15297_s7] sm:$0xff] }
 0xc48   : > { %v9423_v40 = vrot.slane %v9410_v46, %v9422_v28 }
 0xc4a   : > { %v9431_v47 = vcombine.high %v9423_v40, %v9423_v40  ;;  %v9465_v41 = vsel %vm3394_vm1, %v9423_v40, 0 }
 0xc4b   : > { %11834 = vmatmul.mubr.msk.bf16.vlgmr.msra.gmra.mrb[132].mxu0 %vm7571_vm7, %v15039_v48 }
 0xc4c   : > { %8584 = vmatpush1.bf16.msra.mxu0 %v13629_v45  ;;  %8615 = vmatprep.mubr.bf16.mxu0 %v13726_v44  ;;  %v11906_v45 = vld.sshfl [vmem:[%s15297_s7 + $0x10] sm:$0x3 pattern:$0x76325410] }
 0xc4d   : > { %8626 = vmatprep.subr.bf16.mxu0 %v13634_v14  ;;  %11907 = vmatprep.subr.msk.bf16.mxu1 %vm3394_vm1, %v9431_v47  ;;  %v9489_v14 = vsel %vm3394_vm1, %v11906_v45, 0 }
 0xc4e   : > { %9492 = vmatpush1.bf16.msra.mxu1 %v9465_v41 }
 0xc53   : > { %11835 = vmatmul.mubr.msk.bf16.vlgmr.msra.gmra.mrb[136].mxu0 %vm7571_vm7, %v15039_v48 }
 0xc54   : > { %8627 = vmatpush1.bf16.msra.mxu0 %v13632_v16  ;;  %8658 = vmatprep.mubr.bf16.mxu0 %v13726_v44  ;;  %v9416_v16 = vcombine.high %v9410_v46, %v9410_v46 }
 0xc55   : > { %12484 = vmatprep.subr.bf16.mxu0 %v13728_v57 }
 0xc5b   : > { %11836 = vmatmul.mubr.msk.bf16.vlgmr.msra.gmra.mrb[140].mxu0 %vm7571_vm7, %v15039_v48 }
 0xc5c   : > { %12485 = vmatpush3.bf16.msra.mxu0 %v13635_v42  ;;  %12486 = vmatprep.mubr.msk.bf16.mxu0 %vm13729_vm4, %v13728_v57  ;;  %v9430_v42 = vrot.slane %v9416_v16, %v9422_v28 }
 0xc63   : > { %12487 = vmatmul.mubr.msk.bf16.vlgmr.msra.gmra.mrb[144].mxu0 %vm7571_vm7, %v15039_v48 }
 0xc64   : > { %12492 = vmatprep.mubr.msk.bf16.mxu0 %vm7571_vm7, %v13636_v17  ;;  %v9432_v17 = vcombine.high %v9430_v42, %v9430_v42 }
 0xc66   : > { %11910 = vmatprep.subr.msk.bf16.mxu1 %vm3394_vm1, %v9432_v17 }
 0xd16   : > { %v8531_v18 = vpop.f32.mrb[128].mxu0 }
 0xd17   : > { %v8533_v22 = vpop.f32.mrb[129].mxu0 }
 0xd18   : > { %v8535_v19 = vpop.f32.mrb[130].mxu0 }
 0xd19   : > { %v8710_v9 = vpack.c.bf16 %v8535_v19, %v8531_v18  ;;  %v8537_v20 = vpop.f32.mrb[131].mxu0  ;;  %v9383_v18 = vpop.permute.xlu1 %9382 }
 0xd1a   : > { %v8711_v10 = vpack.c.bf16 %v8537_v20, %v8533_v22  ;;  %v9388_v22 = vpop.permute.xlu0 %9387 }
 0xd1c   : > { %12490 = vmatprep.subr.bf16.mxu0 %v8711_v10 }
 0xd1d   : > { %12491 = vmatpush3.bf16.msra.mxu0 %v8711_v10  ;;  %v9393_v19 = vpop.permute.xlu1 %9392 }
 0xd1e   : > { %v8574_v11 = vpop.f32.mrb[132].mxu0  ;;  %12496 = vmatprep.subr.bf16.mxu0 %v8710_v9 }
 0xd1f   : > { %v8576_v32 = vpop.f32.mrb[133].mxu0 }
 0xd20   : > { %v8578_v5 = vpop.f32.mrb[134].mxu0  ;;  %12493 = vmatmul.mubr.msk.bf16.vlgmr.msra.gmra.mrb[148].mxu0 %vm7571_vm7, %v13637_v37  ;;  %v9398_v37 = vpop.permute.xlu0 %9397 }
 0xd21   : > { %v8712_v49 = vpack.c.bf16 %v8578_v5, %v8574_v11  ;;  %v8580_v51 = vpop.f32.mrb[135].mxu0  ;;  %12497 = vmatpush3.bf16.msra.mxu0 %v8710_v9  ;;  %12498 = vmatprep.mubr.msk.bf16.mxu0 %vm7571_vm7, %v13638_v21 }
 0xd22   : > { %v8713_v54 = vpack.c.bf16 %v8580_v51, %v8576_v32  ;;  %v9411_v32 = vld [vmem:[%s15297_s7 + $0x8] sm:$0xff]  ;;  %s1259_s7 = scalar_lea.vmem %s13932_s14, %s14401_s28 }
 0xd23   : > { %12502 = vmatprep.subr.bf16.mxu0 %v8712_v49 }
 0xd26   : > { %v8617_v55 = vpop.f32.mrb[136].mxu0 }
 0xd27   : > { %v8619_v56 = vpop.f32.mrb[137].mxu0 }
 0xd28   : > { %v8621_v58 = vpop.f32.mrb[138].mxu0 }
 0xd29   : > { %v8714_v60 = vpack.c.bf16 %v8621_v58, %v8617_v55  ;;  %v8623_v61 = vpop.f32.mrb[139].mxu0 }
 0xd2a   : > { %v8715_v63 = vpack.c.bf16 %v8623_v61, %v8619_v56  ;;  %v9440_v56 = vrot.slane %v9411_v32, %v9422_v28 }
 0xd2c   : > { %12499 = vmatmul.mubr.msk.bf16.vlgmr.msra.gmra.mrb[148].mxu0 %vm7571_vm7, %v13639_v59 }
 0xd2d   : > { %12503 = vmatpush3.bf16.msra.mxu0 %v8712_v49  ;;  %12504 = vmatprep.mubr.msk.bf16.mxu0 %vm7571_vm7, %v13640_v62  ;;  %v9471_v62 = vsel %vm3394_vm1, %v9430_v42, 0  ;;  %v13661_v42 = vld [vmem:[%s15299_s1 + $0x20] sm:$0xff]  }
 0xd2e   : > { %12508 = vmatprep.subr.bf16.mxu0 %v8713_v54  ;;  %v8660_v0 = vpop.f32.mrb[140].mxu0 }
 0xd2f   : > { %v8662_v50 = vpop.f32.mrb[141].mxu0 }
 0xd30   : > { %v8664_v53 = vpop.f32.mrb[142].mxu0 }
 0xd31   : > { %v8716_v1 = vpack.c.bf16 %v8664_v53, %v8660_v0  ;;  %v8666_v2 = vpop.f32.mrb[143].mxu0  ;;  %v9433_v0 = vcombine.high %v9411_v32, %v9411_v32  ;;  %v9477_v53 = vsel %vm3394_vm1, %v9440_v56, 0 }
 0xd32   : > { %v8717_v3 = vpack.c.bf16 %v8666_v2, %v8662_v50 }
 0xd33   : > { %v9447_v50 = vrot.slane %v9433_v0, %v9422_v28 }
 0xd35   : > { %v9483_v2 = vsel %vm3394_vm1, %v9447_v50, 0 }
 0xd36   : > { %v8703_v30 = vpop.f32.mrb[144].mxu0 }
 0xd37   : > { %v12488_v7 = vpop.f32.mrb[145].mxu0 }
 0xd38   : > { %v8706_v8 = vpop.f32.mrb[146].mxu0  ;;  %12505 = vmatmul.mubr.msk.bf16.vlgmr.msra.gmra.mrb[148].mxu0 %vm7571_vm7, %v13641_v4  ;;  %v13657_v4 = vld [vmem:[%s15299_s1 + $0x10] sm:$0xff]  }
 0xd39   : > { %v8718_v29 = vpack.c.bf16 %v8706_v8, %v8703_v30  ;;  %12509 = vmatpush3.bf16.msra.mxu0 %v8713_v54  ;;  %v12489_v33 = vpop.f32.mrb[147].mxu0  ;;  %12510 = vmatprep.mubr.msk.bf16.mxu0 %vm7571_vm7, %v13642_v6 }
 0xd3a   : > { %12514 = vmatprep.subr.bf16.mxu0 %v8714_v60 }
 0xd44   : > { %12511 = vmatmul.mubr.msk.bf16.vlgmr.msra.gmra.mrb[148].mxu0 %vm7571_vm7, %v13643_v15 }
 0xd45   : > { %12515 = vmatpush3.bf16.msra.mxu0 %v8714_v60  ;;  %12516 = vmatprep.mubr.msk.bf16.mxu0 %vm7571_vm7, %v13644_v35 }
 0xd46   : > { %12520 = vmatprep.subr.bf16.mxu0 %v8715_v63 }
 0xd50   : > { %12517 = vmatmul.mubr.msk.bf16.vlgmr.msra.gmra.mrb[148].mxu0 %vm7571_vm7, %v13645_v36 }
 0xd51   : > { %12521 = vmatpush3.bf16.msra.mxu0 %v8715_v63  ;;  %12522 = vmatprep.mubr.msk.bf16.mxu0 %vm7571_vm7, %v13646_v31  ;;  %v9448_v63 = vcombine.high %v9440_v56, %v9440_v56 }
 0xd52   : > { %12526 = vmatprep.subr.bf16.mxu0 %v8716_v1 }
 0xd5c   : > { %12523 = vmatmul.mubr.msk.bf16.vlgmr.msra.gmra.mrb[148].mxu0 %vm7571_vm7, %v13647_v34 }
 0xd5d   : > { %12527 = vmatpush3.bf16.msra.mxu0 %v8716_v1  ;;  %12528 = vmatprep.mubr.msk.bf16.mxu0 %vm7571_vm7, %v13648_v24  ;;  %v9449_v1 = vcombine.high %v9447_v50, %v9447_v50 }
 0xd5e   : > { %12532 = vmatprep.subr.bf16.mxu0 %v8717_v3 }
 0xd68   : > { %12529 = vmatmul.mubr.msk.bf16.vlgmr.msra.gmra.mrb[148].mxu0 %vm7571_vm7, %v13649_v39 }
 0xd69   : > { %12533 = vmatpush3.bf16.msra.mxu0 %v8717_v3  ;;  %12534 = vmatprep.mubr.msk.bf16.mxu0 %vm7571_vm7, %v13650_v43  ;;  %v13656_v3 = vld [vmem:[%s15298_s0] sm:$0xff]   ;;  %s15300_s0 = sld [smem:[#allocation19_spill]] }
 0xd6a   : > { %12538 = vmatprep.subr.bf16.mxu0 %v8718_v29 }
 0xd74   : > { %12535 = vmatmul.mubr.msk.bf16.vlgmr.msra.gmra.mrb[148].mxu0 %vm7571_vm7, %v13651_v13 }
 0xd75   : > { %12539 = vmatpush3.bf16.msra.mxu0 %v8718_v29  ;;  %12540 = vmatprep.mubr.msk.bf16.mxu0 %vm7571_vm7, %v13652_v38 }
 0xd76   : > { %12780 = vmatprep.subr.msk.bf16.mxu0 %vm3394_vm1, %v11906_v45  ;;  %v13660_v45 = vld [vmem:[%s15299_s1 + $0x8] sm:$0xff]  }
 0xd80   : > { %12541 = vmatmul.mubr.msk.bf16.vlgmr.msra.gmra.mrb[148].mxu0 %vm7571_vm7, %v13653_v12  ;;  %v13658_v12 = vld [vmem:[%s15299_s1 + $0x18] sm:$0xff]  }
 0xd81   : > { %12545 = vmatpush3.bf16.msra.mxu0 %v9489_v14 }
 0xe53   : > { %v12542_v9 = vpop.f32.mrb[148].mxu0 }
 0xe54   : > { %v9402_v20 = vadd.f32 %v12542_v9, %v9393_v19  ;;  %v9357_v10 = vpop.f32.mrb[149].mxu0 }
 0xe55   : > { %v9400_v21 = vadd.f32 %v9383_v18, %v9357_v10  ;;  %v12543_v11 = vpop.f32.mrb[150].mxu0 }
 0xe56   : > { %v9403_v5 = vadd.f32 %v12543_v11, %v9398_v37  ;;  %v9360_v49 = vpop.f32.mrb[151].mxu0  ;;  %v9406_v54 = vmax.f32 %v9402_v20, 0.0  ;;  %v13662_v37 = vld [vmem:[%s15299_s1 + $0x28] sm:$0xff]  }
 0xe57   : > { %v9401_v51 = vadd.f32 %v9388_v22, %v9360_v49  ;;  %v9404_v58 = vmax.f32 %v9400_v21, 0.0  ;;  %v13663_v21 = vld [vmem:[%s15299_s1 + $0x30] sm:$0xff]  }
 0xe58   : > { %v9407_v55 = vmax.f32 %v9403_v5, 0.0 }
 0xe59   : > { %v9405_v59 = vmax.f32 %v9401_v51, 0.0 }
 0xe5a   : > { %v9409_v60 = vpack.c.bf16 %v9407_v55, %v9406_v54 }
 0xe5b   : > { %v9408_v61 = vpack.c.bf16 %v9405_v59, %v9404_v58  ;;  %v13664_v59 = vld [vmem:[%s15299_s1 + $0x38] sm:$0xff]  }
 0xe5d   : > { %11908 = vmatmul.mubr.msk.bf16.vlgmr.msra.gmra.mrb[160].mxu1 %vm9457_vm8, %v9408_v61  ;;  %12546 = vmatprep.mubr.msk.bf16.mxu0 %vm9457_vm8, %v9408_v61 }
 0xe5e   : > { %12547 = vmatmul.mubr.msk.bf16.vlgmr.msra.gmra.mrb[152].mxu0 %vm9457_vm8, %v9409_v60  ;;  %9533 = vmatprep.mubr.bf16.mxu1 %v13726_v44 }
 0xe5f   : > { %9545 = vmatpush1.bf16.msra.mxu1 %v9471_v62  ;;  %12554 = vmatprep.mubr.msk.bf16.mxu0 %vm9789_vm9, %v13657_v4  ;;  %v13665_v62 = vld [vmem:[%s15299_s1 + $0x40] sm:$0xff]   ;;  %v13666_v4 = vld [vmem:[%s15299_s1 + $0x48] sm:$0xff]  }
 0xe60   : > { %11913 = vmatprep.subr.msk.bf16.mxu1 %vm3394_vm1, %v9448_v63 }
 0xe65   : > { %11909 = vmatmul.mubr.msk.bf16.gmra.mrb[164].mxu1 %vm9457_vm8, %v9409_v60 }
 0xe66   : > { %9576 = vmatprep.mubr.bf16.mxu1 %v13726_v44 }
 0xe6d   : > { %11911 = vmatmul.mubr.msk.bf16.vlgmr.msra.gmra.mrb[168].mxu1 %vm9457_vm8, %v9408_v61 }
 0xe6e   : > { %9586 = vmatprep.mubr.bf16.mxu1 %v13726_v44  ;;  %9598 = vmatpush1.bf16.msra.mxu1 %v9477_v53 }
 0xe6f   : > { %11916 = vmatprep.subr.msk.bf16.mxu1 %vm3394_vm1, %v9449_v1 }
 0xe75   : > { %11912 = vmatmul.mubr.msk.bf16.gmra.mrb[172].mxu1 %vm9457_vm8, %v9409_v60 }
 0xe76   : > { %9629 = vmatprep.mubr.bf16.mxu1 %v13726_v44 }
 0xe7d   : > { %11914 = vmatmul.mubr.msk.bf16.vlgmr.msra.gmra.mrb[176].mxu1 %vm9457_vm8, %v9408_v61 }
 0xe7e   : > { %9639 = vmatprep.mubr.bf16.mxu1 %v13726_v44  ;;  %9651 = vmatpush1.bf16.msra.mxu1 %v9483_v2 }
 0xe7f   : > { %12622 = vmatprep.subr.bf16.mxu1 %v13728_v57 }
 0xe85   : > { %11915 = vmatmul.mubr.msk.bf16.gmra.mrb[180].mxu1 %vm9457_vm8, %v9409_v60 }
 0xe86   : > { %9682 = vmatprep.mubr.bf16.mxu1 %v13726_v44 }
 0xe8d   : > { %11917 = vmatmul.mubr.msk.bf16.vlgmr.msra.gmra.mrb[184].mxu1 %vm9457_vm8, %v9408_v61 }
 0xe8e   : > { %9692 = vmatprep.mubr.bf16.mxu1 %v13726_v44  ;;  %12623 = vmatpush3.bf16.msra.mxu1 %v13656_v3 }
 0xe95   : > { %11918 = vmatmul.mubr.msk.bf16.gmra.mrb[188].mxu1 %vm9457_vm8, %v9409_v60 }
 0xe96   : > { %12624 = vmatprep.mubr.msk.bf16.mxu1 %vm13729_vm4, %v13728_v57 }
 0xe9d   : > { %12625 = vmatmul.mubr.msk.bf16.vlgmr.msra.gmra.mrb[192].mxu1 %vm7571_vm7, %v15039_v48 }
 0xf30   : > { %v9525_v6 = vpop.f32.mrb[160].mxu1 }
 0xf31   : > { %v9527_v30 = vpop.f32.mrb[161].mxu1  ;;  %v12548_v7 = vpop.f32.mrb[152].mxu0 }
 0xf32   : > { %v9529_v8 = vpop.f32.mrb[162].mxu1  ;;  %v9737_v29 = vpop.f32.mrb[153].mxu0 }
 0xf33   : > { %v9752_v33 = vpack.c.bf16 %v9529_v8, %v9525_v6  ;;  %v9531_v44 = vpop.f32.mrb[163].mxu1  ;;  %v12549_v15 = vpop.f32.mrb[154].mxu0  ;;  %v13667_v6 = vld [vmem:[%s15299_s1 + $0x50] sm:$0xff]  }
 0xf34   : > { %v9753_v35 = vpack.c.bf16 %v9531_v44, %v9527_v30  ;;  %v15137_v36 = vpack.c.bf16 %v12549_v15, %v12548_v7  ;;  %v9740_v31 = vpop.f32.mrb[155].mxu0  ;;  %v13668_v44 = vld [vmem:[%s15299_s1 + $0x58] sm:$0xff]   ;;  %v13669_v15 = vld [vmem:[%s15299_s1 + $0x60] sm:$0xff]  }
 0xf35   : > { %v15139_v34 = vpack.c.bf16 %v9740_v31, %v9737_v29  ;;  %v13671_v31 = vld [vmem:[%s15299_s1 + $0x70] sm:$0xff]  }
 0xf36   : > { %12550 = vmatprep.subr.bf16.mxu0 %v9753_v35 }
 0xf37   : > { %12551 = vmatpush3.bf16.msra.mxu0 %v9753_v35  ;;  %v13670_v35 = vld [vmem:[%s15299_s1 + $0x68] sm:$0xff]  }
 0xf38   : > { %v9535_v48 = vpop.f32.mrb[164].mxu1 }
 0xf39   : > { %v9537_v24 = vpop.f32.mrb[165].mxu1 }
 0xf3a   : > { %v9539_v39 = vpop.f32.mrb[166].mxu1 }
 0xf3b   : > { %v9761_v43 = vpack.c.bf16 %v9539_v39, %v9535_v48  ;;  %v9541_v13 = vpop.f32.mrb[167].mxu1  ;;  %v13672_v48 = vld [vmem:[%s15299_s1 + $0x78] sm:$0xff]   ;;  %v13674_v39 = vld [vmem:[%s15299_s1 + $0x88] sm:$0xff]  }
 0xf3c   : > { %v9762_v38 = vpack.c.bf16 %v9541_v13, %v9537_v24  ;;  %v13673_v24 = vld [vmem:[%s15299_s1 + $0x80] sm:$0xff]   ;;  %v13676_v13 = vld [vmem:[%s15300_s0 + $0x8] sm:$0xff]   ;;  %s12004_s1 = sshll.u32 %s15307_s23, 5 }
 0xf3e   : > { %12552 = vmatprep.subr.bf16.mxu0 %v9762_v38 }
 0xf3f   : > { %12553 = vmatpush3.bf16.msra.mxu0 %v9762_v38  ;;  %v10435_v38 = vpop.permute.xlu1 %10434 }
 0xf40   : > { %v9578_v52 = vpop.f32.mrb[168].mxu1  ;;  %12558 = vmatprep.subr.bf16.mxu0 %v9752_v33 }
 0xf41   : > { %v9580_v25 = vpop.f32.mrb[169].mxu1 }
 0xf42   : > { %v9582_v26 = vpop.f32.mrb[170].mxu1  ;;  %12555 = vmatmul.mubr.msk.bf16.vlgmr.msra.gmra.mrb[156].mxu0 %vm9789_vm9, %v13658_v12 }
 0xf43   : > { %v9754_v27 = vpack.c.bf16 %v9582_v26, %v9578_v52  ;;  %v9584_v28 = vpop.f32.mrb[171].mxu1  ;;  %12559 = vmatpush3.bf16.msra.mxu0 %v9752_v33  ;;  %12562 = vmatprep.mubr.msk.bf16.mxu0 %vm9789_vm9, %v13659_v23  ;;  %v10517_v12 = vpop.permute.xlu1 %10516 }
 0xf44   : > { %v9755_v46 = vpack.c.bf16 %v9584_v28, %v9580_v25  ;;  %12560 = vmatprep.subr.bf16.mxu0 %v9761_v43  ;;  %v12670_v28 = vadd.f32 %v10517_v12, %v10435_v38 }
 0xf47   : > { %12561 = vmatpush3.bf16.msra.mxu0 %v9761_v43  ;;  %v13675_v43 = vld [vmem:[%s15300_s0] sm:$0xff]   ;;  %v10445_v52 = vpop.permute.xlu1 %10444  ;;  %s1244_s0 = scalar_lea.vmem %s15301_s2, %s12004_s1  ;;  %s1249_s2 = scalar_lea.vmem %s13922_s29, %s12004_s1 }
 0xf48   : > { %v9588_v40 = vpop.f32.mrb[172].mxu1  ;;  %12566 = vmatprep.subr.bf16.mxu0 %v9754_v27  ;;  %s15304_s1 = sld [smem:[#allocation23_spill]] }
 0xf49   : > { %v9590_v47 = vpop.f32.mrb[173].mxu1 }
 0xf4a   : > { %v9592_v41 = vpop.f32.mrb[174].mxu1 }
 0xf4b   : > { %v9763_v14 = vpack.c.bf16 %v9592_v41, %v9588_v40  ;;  %v9594_v16 = vpop.f32.mrb[175].mxu1  ;;  %v10527_v25 = vpop.permute.xlu1 %10526 }
 0xf4c   : > { %v9764_v17 = vpack.c.bf16 %v9594_v16, %v9590_v47 }
 0xf4e   : > { %12563 = vmatmul.mubr.msk.bf16.vlgmr.msra.gmra.mrb[156].mxu0 %vm9789_vm9, %v13660_v45 }
 0xf4f   : > { %12567 = vmatpush3.bf16.msra.mxu0 %v9754_v27  ;;  %12570 = vmatprep.mubr.msk.bf16.mxu0 %vm9789_vm9, %v13661_v42  ;;  %v12668_v27 = vadd.f32 %v10527_v25, %v10445_v52 }
 0xf50   : > { %12568 = vmatprep.subr.bf16.mxu0 %v9763_v14  ;;  %v9631_v18 = vpop.f32.mrb[176].mxu1 }
 0xf51   : > { %v9633_v22 = vpop.f32.mrb[177].mxu1 }
 0xf52   : > { %v9635_v19 = vpop.f32.mrb[178].mxu1 }
 0xf53   : > { %v9756_v9 = vpack.c.bf16 %v9635_v19, %v9631_v18  ;;  %12569 = vmatpush3.bf16.msra.mxu0 %v9763_v14  ;;  %v9637_v20 = vpop.f32.mrb[179].mxu1 }
 0xf54   : > { %v9757_v10 = vpack.c.bf16 %v9637_v20, %v9633_v22  ;;  %12574 = vmatprep.subr.bf16.mxu0 %v9755_v46 }
 0xf58   : > { %v9641_v11 = vpop.f32.mrb[180].mxu1 }
 0xf59   : > { %v9643_v32 = vpop.f32.mrb[181].mxu1 }
 0xf5a   : > { %v9645_v5 = vpop.f32.mrb[182].mxu1  ;;  %12571 = vmatmul.mubr.msk.bf16.vlgmr.msra.gmra.mrb[156].mxu0 %vm9789_vm9, %v13662_v37 }
 0xf5b   : > { %v9765_v49 = vpack.c.bf16 %v9645_v5, %v9641_v11  ;;  %12575 = vmatpush3.bf16.msra.mxu0 %v9755_v46  ;;  %v9647_v51 = vpop.f32.mrb[183].mxu1  ;;  %12578 = vmatprep.mubr.msk.bf16.mxu0 %vm9789_vm9, %v13663_v21 }
 0xf5c   : > { %v9766_v54 = vpack.c.bf16 %v9647_v51, %v9643_v32  ;;  %12576 = vmatprep.subr.bf16.mxu0 %v9764_v17  ;;  %v10627_v32 = vld [vmem:[%s15302_s3] sm:$0xff] }
 0xf5d   : > { %12642 = vmatprep.mubr.msk.f32.mxu1 %vm9789_vm9, %v10627_v32 }
 0xf5f   : > { %12577 = vmatpush3.bf16.msra.mxu0 %v9764_v17 }
 0xf60   : > { %12582 = vmatprep.subr.bf16.mxu0 %v9756_v9  ;;  %v9684_v55 = vpop.f32.mrb[184].mxu1 }
 0xf61   : > { %v9686_v56 = vpop.f32.mrb[185].mxu1 }
 0xf62   : > { %v9688_v58 = vpop.f32.mrb[186].mxu1 }
 0xf63   : > { %v9758_v60 = vpack.c.bf16 %v9688_v58, %v9684_v55  ;;  %v9690_v61 = vpop.f32.mrb[187].mxu1 }
 0xf64   : > { %v9759_v63 = vpack.c.bf16 %v9690_v61, %v9686_v56 }
 0xf66   : > { %12579 = vmatmul.mubr.msk.bf16.vlgmr.msra.gmra.mrb[156].mxu0 %vm9789_vm9, %v13664_v59 }
 0xf67   : > { %12583 = vmatpush3.bf16.msra.mxu0 %v9756_v9  ;;  %12586 = vmatprep.mubr.msk.bf16.mxu0 %vm9789_vm9, %v13665_v62  ;;  %v10628_v62 = vld [vmem:[%s15302_s3 + $0x8] sm:$0x3]  ;;  %s11164_s3 = sshll.u32 %s15307_s23, 1 }
 0xf68   : > { %12584 = vmatprep.subr.bf16.mxu0 %v9765_v49  ;;  %v9694_v0 = vpop.f32.mrb[188].mxu1  ;;  %s1263_s5 = scalar_lea.vmem %s13937_s24, %s11164_s3 }
 0xf69   : > { %v9696_v50 = vpop.f32.mrb[189].mxu1 }
 0xf6a   : > { %v9698_v53 = vpop.f32.mrb[190].mxu1 }
 0xf6b   : > { %v9767_v1 = vpack.c.bf16 %v9698_v53, %v9694_v0  ;;  %12585 = vmatpush3.bf16.msra.mxu0 %v9765_v49  ;;  %v9700_v2 = vpop.f32.mrb[191].mxu1 }
 0xf6c   : > { %v9768_v3 = vpack.c.bf16 %v9700_v2, %v9696_v50  ;;  %12590 = vmatprep.subr.bf16.mxu0 %v9757_v10 }
 0xf70   : > { %v10498_v30 = vpop.f32.mrb[192].mxu1 }
 0xf71   : > { %v12626_v7 = vpop.f32.mrb[193].mxu1 }
 0xf72   : > { %12587 = vmatmul.mubr.msk.bf16.vlgmr.msra.gmra.mrb[156].mxu0 %vm9789_vm9, %v13666_v4  ;;  %v10501_v8 = vpop.f32.mrb[194].mxu1 }
 0xf73   : > { %12591 = vmatpush3.bf16.msra.mxu0 %v9757_v10  ;;  %v10505_v29 = vpack.c.bf16 %v10501_v8, %v10498_v30  ;;  %v12627_v33 = vpop.f32.mrb[195].mxu1  ;;  %12594 = vmatprep.mubr.msk.bf16.mxu0 %vm9789_vm9, %v13667_v6  ;;  %v10735_v8 = vld [vmem:[%s15304_s1] sm:$0x3] }
 0xf74   : > { %12592 = vmatprep.subr.bf16.mxu0 %v9766_v54 }
 0xf77   : > { %12593 = vmatpush3.bf16.msra.mxu0 %v9766_v54 }
 0xf78   : > { %12598 = vmatprep.subr.bf16.mxu0 %v9758_v60 }
 0xf7e   : > { %12595 = vmatmul.mubr.msk.bf16.vlgmr.msra.gmra.mrb[156].mxu0 %vm9789_vm9, %v13668_v44 }
 0xf7f   : > { %12599 = vmatpush3.bf16.msra.mxu0 %v9758_v60  ;;  %12602 = vmatprep.mubr.msk.bf16.mxu0 %vm9789_vm9, %v13669_v15 }
 0xf80   : > { %12600 = vmatprep.subr.bf16.mxu0 %v9767_v1 }
 0xf83   : > { %12601 = vmatpush3.bf16.msra.mxu0 %v9767_v1 }
 0xf84   : > { %12606 = vmatprep.subr.bf16.mxu0 %v9759_v63 }
 0xf8a   : > { %12603 = vmatmul.mubr.msk.bf16.vlgmr.msra.gmra.mrb[156].mxu0 %vm9789_vm9, %v13670_v35 }
 0xf8b   : > { %12607 = vmatpush3.bf16.msra.mxu0 %v9759_v63  ;;  %12610 = vmatprep.mubr.msk.bf16.mxu0 %vm9789_vm9, %v13671_v31  ;;  %v13731_v63 = vmov 0.0|0.0  }
 0xf8c   : > { %12608 = vmatprep.subr.bf16.mxu0 %v9768_v3 }
 0xf8f   : > { %12609 = vmatpush3.bf16.msra.mxu0 %v9768_v3 }
 0xf90   : > { %12614 = vmatprep.subr.bf16.mxu0 %v15139_v34 }
 0xf96   : > { %12611 = vmatmul.mubr.msk.bf16.vlgmr.msra.gmra.mrb[156].mxu0 %vm9789_vm9, %v13672_v48 }
 0xf97   : > { %12615 = vmatpush3.bf16.msra.mxu0 %v15139_v34  ;;  %12618 = vmatprep.mubr.msk.bf16.mxu0 %vm9789_vm9, %v13673_v24  ;;  %v10440_v34 = vpop.permute.xlu0 %10439 }
 0xf98   : > { %12616 = vmatprep.subr.bf16.mxu0 %v15137_v36 }
 0xf9b   : > { %12617 = vmatpush3.bf16.msra.mxu0 %v15137_v36  ;;  %v10522_v23 = vpop.permute.xlu0 %10521 }
 0xf9c   : > { %12628 = vmatprep.subr.bf16.mxu0 %v10505_v29  ;;  %v12674_v45 = vadd.f32 %v10522_v23, %v10440_v34 }
 0xf9f   : > { %v10450_v36 = vpop.permute.xlu0 %10449 }
 0xfa2   : > { %12619 = vmatmul.mubr.msk.bf16.vlgmr.msra.gmra.mrb[156].mxu0 %vm9789_vm9, %v13674_v39 }
 0xfa3   : > { %12629 = vmatpush3.bf16.msra.mxu0 %v10505_v29  ;;  %12630 = vmatprep.mubr.msk.bf16.mxu0 %vm7571_vm7, %v13675_v43  ;;  %v10532_v26 = vpop.permute.xlu0 %10531 }
 0xfa4   : > { %v12672_v40 = vadd.f32 %v10532_v26, %v10450_v36 }
 0xfae   : > { %12631 = vmatmul.mubr.msk.bf16.vlgmr.msra.gmra.mrb[156].mxu0 %vm7571_vm7, %v13676_v13 }
0x1081   : > { %v12632_v46 = vpop.f32.mrb[156].mxu0 }
0x1082   : > { %v12669_v47 = vadd.f32 %v12668_v27, %v12632_v46  ;;  %v10584_v41 = vpop.f32.mrb[157].mxu0 }
0x1083   : > { %v12671_v14 = vadd.f32 %v12670_v28, %v10584_v41  ;;  %v12633_v16 = vpop.f32.mrb[158].mxu0 }
0x1084   : > { %v10605_v42 = vmax.f32 %v12669_v47, 0.0  ;;  %v12673_v17 = vadd.f32 %v12672_v40, %v12633_v16  ;;  %v10587_v18 = vpop.f32.mrb[159].mxu0 }
0x1085   : > { %v10603_v22 = vmax.f32 %v12671_v14, 0.0  ;;  %v12675_v19 = vadd.f32 %v12674_v45, %v10587_v18 }
0x1086   : > { %10609 = vst.msk [vmem:[%s1244_s0 + $0x10] sm:$0xff] %vm9457_vm8, %v10605_v42  ;;  %v10606_v9 = vmax.f32 %v12673_v17, 0.0  ;;  %v10617_v11 = vsel %vm9457_vm8, %v10605_v42, 0.0 }
0x1087   : > { %10607 = vst.msk [vmem:[%s1244_s0] sm:$0xff] %vm9457_vm8, %v10603_v22  ;;  %v10604_v20 = vmax.f32 %v12675_v19, 0.0  ;;  %v10611_v10 = vsel %vm9457_vm8, %v10603_v22, 0.0 }
0x1088   : > { %10610 = vst.msk [vmem:[%s1244_s0 + $0x18] sm:$0xff] %vm9457_vm8, %v10606_v9  ;;  %10612 = vadd.xlane.f32.xlu1 %v10611_v10  ;;  %v10620_v21 = vsel %vm9457_vm8, %v10606_v9, 0.0 }
0x1089   : > { %10608 = vst.msk [vmem:[%s1244_s0 + $0x8] sm:$0xff] %vm9457_vm8, %v10604_v20  ;;  %v10614_v37 = vsel %vm9457_vm8, %v10604_v20, 0.0  ;;  %s15303_s0 = sld [smem:[#allocation22_spill]] }
0x108a   : > { %10615 = vadd.xlane.f32.xlu0 %v10614_v37 }
0x108c   : > { %10621 = vadd.xlane.f32.xlu1 %v10620_v21 }
0x108e   : > { %10618 = vadd.xlane.f32.xlu0 %v10617_v11 }
0x108f   : > { %v10630_v0 = vld [vmem:[%s15303_s0 + $0x8] sm:$0x3]  ;;  %v10629_v50 = vld [vmem:[%s15303_s0] sm:$0xff]  ;;  %s13733_s0 = smov 1e-24  }
0x1115   : > { %v10613_v5 = vpop.xlane.xlu1 %10612 }
0x1116   : > { %v10623_v49 = vmul.f32 0.25, %v10613_v5 }
0x1117   : > { %v10616_v51 = vpop.xlane.xlu0 %10615 }
0x1118   : > { %10814 = vst.msk [vmem:[%s1249_s2] sm:$0xff] %vm10714_vm10, %v10623_v49  ;;  %v10624_v54 = vmul.f32 0.25, %v10616_v51 }
0x1119   : > { %v10622_v55 = vpop.xlane.xlu1 %10621 }
0x111a   : > { %v12652_v56 = vpack.c.bf16 %v10624_v54, %v10623_v49  ;;  %10815 = vst.msk [vmem:[%s1249_s2 + $0x8] sm:$0xff] %vm10714_vm10, %v10624_v54  ;;  %v10626_v58 = vmul.f32 0.25, %v10622_v55 }
0x111b   : > { %v10619_v59 = vpop.xlane.xlu0 %10618 }
0x111c   : > { %10817 = vst.msk [vmem:[%s1249_s2 + $0x18] sm:$0xff] %vm10714_vm10, %v10626_v58  ;;  %v10625_v60 = vmul.f32 0.25, %v10619_v59  ;;  %12653 = vmatprep.subr.bf16.mxu1 %v12652_v56 }
0x111d   : > { %12655 = vmatpush3.bf16.msra.mxu1 %v12652_v56 }
0x111e   : > { %v12656_v61 = vpack.c.bf16 %v10626_v58, %v10625_v60  ;;  %10816 = vst.msk [vmem:[%s1249_s2 + $0x10] sm:$0xff] %vm10714_vm10, %v10625_v60  ;;  %s15305_s2 = sld [smem:[#allocation24_spill]] }
0x1120   : > { %12657 = vmatprep.subr.bf16.mxu1 %v12656_v61 }
0x1121   : > { %12659 = vmatpush3.bf16.msra.mxu1 %v12656_v61 }
0x1122   : > { %12660 = vmatprep.subr.bf16.mxu1 %v13731_v63 }
0x1124   : > { %12643 = vmatmul.mubr.msk.f32.vlgmr.msra.gmra.mrb[196].mxu1 %vm9789_vm9, %v10628_v62  ;;  %v10736_v43 = vld [vmem:[%s15305_s2] sm:$0x3] }
0x1125   : > { %12649 = vmatprep.mubr.msk.f32.mxu1 %vm13729_vm4, %v13728_v57 }
0x11f7   : > { %v12644_v53 = vpop.f32.mrb[196].mxu1 }
0x11f8   : > { %v10709_v1 = vadd.f32 %v12644_v53, %v10630_v0  ;;  %v10703_v2 = vpop.f32.mrb[197].mxu1 }
0x11f9   : > { %v10704_v3 = vadd.f32 %v10703_v2, %v10629_v50 }
0x11fa   : > { %v10713_v4 = vmul.f32 %v10709_v1, %v10709_v1  ;;  %10819 = vst.msk [vmem:[%s1254_s4 + $0x8] sm:$0x3] %vm10716_vm11, %v10709_v1 }
0x11fb   : > { %v12661_v6 = vpack.c.bf16 %v10709_v1, %v10704_v3  ;;  %10818 = vst.msk [vmem:[%s1254_s4] sm:$0xff] %vm10714_vm10, %v10704_v3  ;;  %v10712_v57 = vmul.f32 %v10704_v3, %v10704_v3 }
0x11fc   : > { %v10717_v30 = vsel %vm10716_vm11, %v10713_v4, 0.0 }
0x11fd   : > { %v10715_v7 = vsel %vm10714_vm10, %v10712_v57, 0.0  ;;  %12663 = vmatpush3.bf16.msk.msra.mxu1 %vm12662_vm13, %v12661_v6 }
0x11fe   : > { %v10718_v29 = vadd.f32 %v10717_v30, %v10715_v7 }
0x1200   : > { %10719 = vadd.xlane.f32.xlu0 %v10718_v29  ;;  %12650 = vmatmul.mubr.msk.f32.vlgmr.msra.gmra.mrb[198].mxu1 %vm10737_vm14, %v10735_v8 }
0x128d   : > { %v10720_v33 = vpop.xlane.xlu0 %10719 }
0x128e   : > { %v10721_v44 = vrot.slane %v10720_v33, 4 }
0x1290   : > { %v10722_v15 = vadd.f32 %v10721_v44, %v10720_v33 }
0x1292   : > { %v10723_v35 = vrot.slane %v10722_v15, 2 }
0x1294   : > { %v10724_v31 = vadd.f32 %v10723_v35, %v10722_v15 }
0x1296   : > { %v10725_v48 = vrot.slane %v10724_v31, 1 }
0x1298   : > { %v10726_v24 = vadd.f32 %v10725_v48, %v10724_v31 }
0x129a   : > { %12781 = vpush %v10726_v24 }
0x12cb   : > { %s12782_s4 = spop %12781 }
0x12cc   : > { %s10728_s1 = smax.f32 %s13733_s0, %s12782_s4 }
0x12cd   : > { %v10729_v39 = vstv %s10728_s1 }
0x12ce   : > { %13677 = vrsqrt.f32 %v10729_v39 }
0x12d3   : > { %v10810_v13 = vpop.f32.mrb[198].mxu1 }
0x12d4   : > { %v10811_v38 = vadd.f32 %v10810_v13, %v10736_v43  ;;  %v12651_v34 = vpop.f32.mrb[199].mxu1 }
0x12d6   : > { %10822 = vst.msk [vmem:[%s1263_s5] sm:$0x3] %vm10716_vm11, %v10811_v38 }
0x12d8   : > { %v13678_v12 = vpop.eup %13677 }
0x12d9   : > { %12783 = vpush %v13678_v12 }
0x130a   : > { %s12784_s6 = spop %12783 }
0x130b   : > { %v10732_v23 = vstv %s12784_s6 }
0x130c   : > { %v10733_v52 = vmul.f32 %v10732_v23, %v10704_v3  ;;  %v10734_v36 = vmul.f32 %v10732_v23, %v10709_v1 }
0x130e   : > { %10820 = vst.msk [vmem:[%s1259_s7] sm:$0xff] %vm10714_vm10, %v10733_v52 }
0x130f   : > { %10821 = vst.msk [vmem:[%s1259_s7 + $0x8] sm:$0x3] %vm10716_vm11, %v10734_v36 }
0x1310 PF: > { %s90_s22 = sadd.s32 1, %s13685_s22  }
0x1311   : > { %p87_p4 = scmp.ge.s32.totalorder %s90_s22, 4  }
0x1313   :  { %89 = sbr.rel (!%p87_p4) target bundleno = 71 (0x47), region = 357 }

</bundles_post_ra>
